<compile_context>
chip_gen: v7x
topology: tpu7x:2x2x1
jax: 0.10.0
libtpu: 0.0.40
codegen_flags: <defaults>
</compile_context>

<pallas_src>
import numpy as np
import jax
import jax.numpy as jnp
from jax.experimental import pallas as pl
from jax.experimental.pallas import tpu as pltpu

C_IN, C_OUT, K = 3, 6, 3          # fixed by the PyTorch module
HIDDEN, N_ACT = 258, 17
CONV_LANES = 256                  # even-w half [0,128) | odd-w half [128,256)
POOL_LANES = 128
TB_MAX = 256                      # batch tile (multiple of 256 fills the v6e/v7x MXU)


def _round_up(n, m):
    return ((n + m - 1) // m) * m


# -------------------- fused kernel: conv3x3 + ReLU + maxpool2x2 + dueling head --------------------
def _make_kernel(H, W, TB):
    H2 = H // 2

    def kernel(x_ref, tconv_ref, bconv_ref, w1_ref, b1_ref, w2_ref, b2_ref, o_ref):
        # x_ref    : ((H+2)*TB, C_IN*(W+2))  rows ordered (h, batch-in-tile); zero padded
        # tconv_ref: (K, C_IN*(W+2), 256)    per-kh banded conv weights (MXU RHS)
        # bconv_ref: (1, 256)                conv bias in the pooled lane layout
        # w1_ref   : (H2*128, 640)           [val_hidden | adv_hidden], rows by (j, co, w2)
        # b1_ref   : (1, 640)
        # w2_ref   : (640, 128)              cols 0..16 = adv, col 17 = val, rest 0
        # b2_ref   : (1, 128)
        # o_ref    : (TB, 128)               lanes 0..16 hold Q(s, a)

        # ---- 3x3 conv (pad=1) as 3 accumulated matmuls over vertically shifted slabs ----
        acc = None
        for kh in range(K):
            slab = x_ref[kh * TB:(kh + H) * TB, :]                   # (H*TB, C_IN*(W+2))
            part = jnp.dot(slab, tconv_ref[kh],
                           preferred_element_type=jnp.float32)       # (H*TB, 256)
            acc = part if acc is None else acc + part
        conv = jnp.maximum(acc + bconv_ref[...], 0.0)                # bias + ReLU

        # ---- 2x2 max-pool: W-partners are the two vreg-aligned lane halves ----
        wp = jnp.maximum(conv[:, :POOL_LANES], conv[:, POOL_LANES:])  # (H*TB, 128)

        # ---- H-pool + dueling hidden layer, fused: one matmul per pooled row block ----
        hid_acc = None
        for j in range(H2):
            blk = jnp.maximum(wp[(2 * j) * TB:(2 * j + 1) * TB, :],
                              wp[(2 * j + 1) * TB:(2 * j + 2) * TB, :])   # (TB, 128)
            part = jnp.dot(blk, w1_ref[j * 128:(j + 1) * 128, :],
                           preferred_element_type=jnp.float32)            # (TB, 640)
            hid_acc = part if hid_acc is None else hid_acc + part
        hid = jnp.maximum(hid_acc + b1_ref[...], 0.0)                     # (TB, 640)

        # ---- [adv | val] head + dueling combine; full-vreg lane-dense writeback ----
        q = jnp.dot(hid, w2_ref[...], preferred_element_type=jnp.float32) + b2_ref[...]
        val = q[:, N_ACT:N_ACT + 1]                                       # (TB, 1)
        adv_mean = jnp.mean(q[:, :N_ACT], axis=1, keepdims=True)          # (TB, 1)
        o_ref[...] = q + val - adv_mean                                   # lanes 0..16 valid

    return kernel


# -------------------- wrapper --------------------
def cnn_dueling_forward(x, params, tb=TB_MAX):
    B, C, H, W = x.shape
    assert C == C_IN and H % 2 == 0 and W % 2 == 0
    assert C_OUT * (W // 2) <= POOL_LANES
    Wp2 = W + 2
    TB = min(tb, _round_up(max(B, 1), 8))
    nb = pl.cdiv(B, TB)
    Bp = nb * TB
    HID_PAD = params["w1_eff"].shape[1]

    # Layout plumbing (no arithmetic): zero-pad batch + spatial, interleave channels into
    # lanes, order rows as (tile, padded-row h, element-in-tile).
    xp = jnp.pad(x.astype(jnp.float32), ((0, Bp - B), (0, 0), (1, 1), (1, 1)))
    xp = jnp.transpose(xp, (0, 2, 1, 3)).reshape(Bp, H + 2, C_IN * Wp2)
    xp = xp.reshape(nb, TB, H + 2, C_IN * Wp2).transpose(0, 2, 1, 3)
    x2 = xp.reshape(nb * (H + 2) * TB, C_IN * Wp2)

    out = pl.pallas_call(
        _make_kernel(H, W, TB),
        out_shape=jax.ShapeDtypeStruct((Bp, POOL_LANES), jnp.float32),
        grid=(nb,),
        in_specs=[
            pl.BlockSpec(((H + 2) * TB, C_IN * Wp2), lambda i: (i, 0)),
            pl.BlockSpec((K, C_IN * Wp2, CONV_LANES), lambda i: (0, 0, 0)),
            pl.BlockSpec((1, CONV_LANES), lambda i: (0, 0)),
            pl.BlockSpec(((H // 2) * 128, HID_PAD), lambda i: (0, 0)),
            pl.BlockSpec((1, HID_PAD), lambda i: (0, 0)),
            pl.BlockSpec((HID_PAD, POOL_LANES), lambda i: (0, 0)),
            pl.BlockSpec((1, POOL_LANES), lambda i: (0, 0)),
        ],
        out_specs=pl.BlockSpec((TB, POOL_LANES), lambda i: (i, 0)),
        compiler_params=pltpu.CompilerParams(
            dimension_semantics=("parallel",),
            vmem_limit_bytes=40 * 1024 * 1024),
    )(x2, params["tconv"], params["bconv_row"],
      params["w1_eff"], params["b1_row"],
      params["w2_eff"], params["b2_row"])
    return out[:B, :N_ACT]


# -------------------- parameter preparation (pure layout transforms, done once) --------------------
def prepare_fused_params(p, H, W):
    H2, W2 = H // 2, W // 2
    Wp2 = W + 2
    HID2 = 2 * HIDDEN
    HID_PAD = _round_up(HID2, 128)
    cw = np.asarray(p["conv_w"], np.float32)
    cb = np.asarray(p["conv_b"], np.float32)

    # Per-kh banded conv weights; output lane(co, w) = (w % 2) * 128 + co * W2 + w // 2,
    # so the 2x2 W-pool partners sit in vreg-aligned lane halves.
    tconv = np.zeros((K, C_IN * Wp2, CONV_LANES), np.float32)
    bconv_row = np.zeros((1, CONV_LANES), np.float32)
    for co in range(C_OUT):
        for w in range(W):
            lane = (w % 2) * POOL_LANES + co * W2 + (w // 2)
            bconv_row[0, lane] = cb[co]
            for kh in range(K):
                for ci in range(C_IN):
                    for kw in range(K):
                        tconv[kh, ci * Wp2 + w + kw, lane] = cw[co, ci, kh, kw]

    # Hidden weights: kernel feature (j, lane = co*W2 + w2) <-> torch flatten index
    # f = co*(H2*W2) + j*W2 + w2; lanes 48..127 of each block are zero padding.
    w1cat = np.concatenate([np.asarray(p["wvh"], np.float32),
                            np.asarray(p["wah"], np.float32)], axis=1)   # (F, 516)
    b1cat = np.concatenate([np.asarray(p["bvh"], np.float32),
                            np.asarray(p["bah"], np.float32)], axis=1)   # (1, 516)
    w1_eff = np.zeros((H2 * 128, HID_PAD), np.float32)
    for j in range(H2):
        for co in range(C_OUT):
            for w2 in range(W2):
                w1_eff[j * 128 + co * W2 + w2, :HID2] = w1cat[co * (H2 * W2) + j * W2 + w2]
    b1_row = np.zeros((1, HID_PAD), np.float32)
    b1_row[:, :HID2] = b1cat

    # Head: columns 0..16 = adv (fed by adv_hidden lanes), column 17 = val.
    w2_eff = np.zeros((HID_PAD, POOL_LANES), np.float32)
    w2_eff[HIDDEN:HID2, :N_ACT] = np.asarray(p["wa"], np.float32)
    w2_eff[:HIDDEN, N_ACT:N_ACT + 1] = np.asarray(p["wv"], np.float32)
    b2_row = np.zeros((1, POOL_LANES), np.float32)
    b2_row[0, :N_ACT] = np.asarray(p["ba"], np.float32).ravel()
    b2_row[0, N_ACT] = float(np.asarray(p["bv"], np.float32).ravel()[0])

    return dict(tconv=jnp.asarray(tconv), bconv_row=jnp.asarray(bconv_row),
                w1_eff=jnp.asarray(w1_eff), b1_row=jnp.asarray(b1_row),
                w2_eff=jnp.asarray(w2_eff), b2_row=jnp.asarray(b2_row))


def init_params(key, J_num, O_max_len):
    H, W = J_num, O_max_len
    F_in = C_OUT * (H // 2) * (W // 2)
    ks = jax.random.split(key, 10)
    s = 0.1
    params = dict(
        conv_w=jax.random.normal(ks[0], (C_OUT, C_IN, K, K), jnp.float32) * s,
        conv_b=jax.random.normal(ks[1], (C_OUT,), jnp.float32) * s,
        wvh=jax.random.normal(ks[2], (F_in, HIDDEN), jnp.float32) * s,
        bvh=jax.random.normal(ks[3], (1, HIDDEN), jnp.float32) * s,
        wah=jax.random.normal(ks[4], (F_in, HIDDEN), jnp.float32) * s,
        bah=jax.random.normal(ks[5], (1, HIDDEN), jnp.float32) * s,
        wv=jax.random.normal(ks[6], (HIDDEN, 1), jnp.float32) * s,
        bv=jax.random.normal(ks[7], (1, 1), jnp.float32) * s,
        wa=jax.random.normal(ks[8], (HIDDEN, N_ACT), jnp.float32) * s,
        ba=jax.random.normal(ks[9], (1, N_ACT), jnp.float32) * s,
    )
    params.update(prepare_fused_params(params, H, W))
    return params


# -------------------- pure-JAX reference (for sanity check) --------------------
def reference_forward(x, p):
    y = jax.lax.conv_general_dilated(
        x, p["conv_w"], window_strides=(1, 1), padding=((1, 1), (1, 1)),
        dimension_numbers=("NCHW", "OIHW", "NCHW"))
    y = jnp.maximum(y + p["conv_b"][None, :, None, None], 0.0)
    B, C, H, W = y.shape
    y = jnp.max(y.reshape(B, C, H // 2, 2, W // 2, 2), axis=(3, 5))
    xf = y.reshape(B, -1)
    vh = jnp.maximum(xf @ p["wvh"] + p["bvh"], 0.0)
    ah = jnp.maximum(xf @ p["wah"] + p["bah"], 0.0)
    val = vh @ p["wv"] + p["bv"]
    adv = ah @ p["wa"] + p["ba"]
    return adv + val - jnp.mean(adv, axis=1, keepdims=True)


if __name__ == "__main__":
    J_num, O_max_len, B = 16, 16, 2
    key = jax.random.PRNGKey(0)
    kx, kp = jax.random.split(key)
    x = jax.random.normal(kx, (B, C_IN, J_num, O_max_len), jnp.float32)
    params = init_params(kp, J_num, O_max_len)

    fwd = jax.jit(cnn_dueling_forward)
    out = jax.block_until_ready(fwd(x, params))
    ref = jax.block_until_ready(reference_forward(x, params))

    assert out.shape == (B, N_ACT)
    assert jnp.allclose(out, ref, atol=1e-3, rtol=1e-3), "mismatch vs reference"
    print("KERNEL_OK")
</pallas_src>

<mosaic_0001>
module attributes {stable_mosaic.version = 11 : i64} {
  func.func @kernel(%arg0: i32, %arg1: memref<144x54xf32, #tpu.memory_space<vmem>>, %arg2: memref<3x54x256xf32, #tpu.memory_space<vmem>>, %arg3: memref<1x256xf32, #tpu.memory_space<vmem>>, %arg4: memref<1024x640xf32, #tpu.memory_space<vmem>>, %arg5: memref<1x640xf32, #tpu.memory_space<vmem>>, %arg6: memref<640x128xf32, #tpu.memory_space<vmem>>, %arg7: memref<1x128xf32, #tpu.memory_space<vmem>>, %arg8: memref<8x128xf32, #tpu.memory_space<vmem>>) attributes {dimension_semantics = [#tpu.dimension_semantics<parallel>], iteration_bounds = array<i64: 1>, scalar_prefetch = 0 : i64, scratch_operands = 0 : i64, tpu.core_type = #tpu.core_type<tc>, window_params = [{transform_indices = @transform_0, window_bounds = array<i64: 144, 54>}, {pipeline_mode = #tpu.pipeline_mode<synchronous>, transform_indices = @transform_1, window_bounds = array<i64: 3, 54, 256>}, {pipeline_mode = #tpu.pipeline_mode<synchronous>, transform_indices = @transform_2, window_bounds = array<i64: 1, 256>}, {pipeline_mode = #tpu.pipeline_mode<synchronous>, transform_indices = @transform_3, window_bounds = array<i64: 1024, 640>}, {pipeline_mode = #tpu.pipeline_mode<synchronous>, transform_indices = @transform_4, window_bounds = array<i64: 1, 640>}, {pipeline_mode = #tpu.pipeline_mode<synchronous>, transform_indices = @transform_5, window_bounds = array<i64: 640, 128>}, {pipeline_mode = #tpu.pipeline_mode<synchronous>, transform_indices = @transform_6, window_bounds = array<i64: 1, 128>}, {transform_indices = @transform_7, window_bounds = array<i64: 8, 128>}]} {
    %c0 = arith.constant 0 : index
    %c0_0 = arith.constant 0 : index
    %0 = vector.load %arg1[%c0, %c0_0] : memref<144x54xf32, #tpu.memory_space<vmem>>, vector<128x54xf32>
    %c0_1 = arith.constant 0 : index
    %c0_2 = arith.constant 0 : index
    %c0_3 = arith.constant 0 : index
    %1 = vector.load %arg2[%c0_1, %c0_2, %c0_3] : memref<3x54x256xf32, #tpu.memory_space<vmem>>, vector<1x54x256xf32>
    %2 = vector.shape_cast %1 : vector<1x54x256xf32> to vector<54x256xf32>
    %cst = arith.constant dense<0.000000e+00> : vector<128x256xf32>
    %3 = tpu.matmul %0, %2, %cst {dimension_numbers = #tpu.dot_dimension_numbers<[1], [0], [0], [1], [0, 0, 1, 1], [], []>} : vector<128x54xf32>, vector<54x256xf32>, vector<128x256xf32> -> vector<128x256xf32>
    %c8 = arith.constant 8 : index
    %c0_4 = arith.constant 0 : index
    %4 = vector.load %arg1[%c8, %c0_4] : memref<144x54xf32, #tpu.memory_space<vmem>>, vector<128x54xf32>
    %c1 = arith.constant 1 : index
    %c0_5 = arith.constant 0 : index
    %c0_6 = arith.constant 0 : index
    %5 = vector.load %arg2[%c1, %c0_5, %c0_6] : memref<3x54x256xf32, #tpu.memory_space<vmem>>, vector<1x54x256xf32>
    %6 = vector.shape_cast %5 : vector<1x54x256xf32> to vector<54x256xf32>
    %cst_7 = arith.constant dense<0.000000e+00> : vector<128x256xf32>
    %7 = tpu.matmul %4, %6, %cst_7 {dimension_numbers = #tpu.dot_dimension_numbers<[1], [0], [0], [1], [0, 0, 1, 1], [], []>} : vector<128x54xf32>, vector<54x256xf32>, vector<128x256xf32> -> vector<128x256xf32>
    %8 = arith.addf %3, %7 : vector<128x256xf32>
    %c16 = arith.constant 16 : index
    %c0_8 = arith.constant 0 : index
    %9 = vector.load %arg1[%c16, %c0_8] : memref<144x54xf32, #tpu.memory_space<vmem>>, vector<128x54xf32>
    %c2 = arith.constant 2 : index
    %c0_9 = arith.constant 0 : index
    %c0_10 = arith.constant 0 : index
    %10 = vector.load %arg2[%c2, %c0_9, %c0_10] : memref<3x54x256xf32, #tpu.memory_space<vmem>>, vector<1x54x256xf32>
    %11 = vector.shape_cast %10 : vector<1x54x256xf32> to vector<54x256xf32>
    %cst_11 = arith.constant dense<0.000000e+00> : vector<128x256xf32>
    %12 = tpu.matmul %9, %11, %cst_11 {dimension_numbers = #tpu.dot_dimension_numbers<[1], [0], [0], [1], [0, 0, 1, 1], [], []>} : vector<128x54xf32>, vector<54x256xf32>, vector<128x256xf32> -> vector<128x256xf32>
    %13 = arith.addf %8, %12 : vector<128x256xf32>
    %c0_12 = arith.constant 0 : index
    %c0_13 = arith.constant 0 : index
    %14 = vector.load %arg3[%c0_12, %c0_13] : memref<1x256xf32, #tpu.memory_space<vmem>>, vector<1x256xf32>
    %15 = vector.broadcast %14 : vector<1x256xf32> to vector<128x256xf32>
    %16 = arith.addf %13, %15 : vector<128x256xf32>
    %cst_14 = arith.constant 0.000000e+00 : f32
    %17 = vector.broadcast %cst_14 : f32 to vector<128x256xf32>
    %18 = arith.maximumf %16, %17 : vector<128x256xf32>
    %19 = vector.extract_strided_slice %18 {offsets = [0, 0], sizes = [128, 128], strides = [1, 1]} : vector<128x256xf32> to vector<128x128xf32>
    %20 = vector.extract_strided_slice %18 {offsets = [0, 128], sizes = [128, 128], strides = [1, 1]} : vector<128x256xf32> to vector<128x128xf32>
    %21 = arith.maximumf %19, %20 : vector<128x128xf32>
    %22 = vector.extract_strided_slice %21 {offsets = [0, 0], sizes = [8, 128], strides = [1, 1]} : vector<128x128xf32> to vector<8x128xf32>
    %23 = vector.extract_strided_slice %21 {offsets = [8, 0], sizes = [8, 128], strides = [1, 1]} : vector<128x128xf32> to vector<8x128xf32>
    %24 = arith.maximumf %22, %23 : vector<8x128xf32>
    %c0_15 = arith.constant 0 : index
    %c0_16 = arith.constant 0 : index
    %25 = vector.load %arg4[%c0_15, %c0_16] : memref<1024x640xf32, #tpu.memory_space<vmem>>, vector<128x640xf32>
    %cst_17 = arith.constant dense<0.000000e+00> : vector<8x640xf32>
    %26 = tpu.matmul %24, %25, %cst_17 {dimension_numbers = #tpu.dot_dimension_numbers<[1], [0], [0], [1], [0, 0, 1, 1], [], []>} : vector<8x128xf32>, vector<128x640xf32>, vector<8x640xf32> -> vector<8x640xf32>
    %27 = vector.extract_strided_slice %21 {offsets = [16, 0], sizes = [8, 128], strides = [1, 1]} : vector<128x128xf32> to vector<8x128xf32>
    %28 = vector.extract_strided_slice %21 {offsets = [24, 0], sizes = [8, 128], strides = [1, 1]} : vector<128x128xf32> to vector<8x128xf32>
    %29 = arith.maximumf %27, %28 : vector<8x128xf32>
    %c128 = arith.constant 128 : index
    %c0_18 = arith.constant 0 : index
    %30 = vector.load %arg4[%c128, %c0_18] : memref<1024x640xf32, #tpu.memory_space<vmem>>, vector<128x640xf32>
    %cst_19 = arith.constant dense<0.000000e+00> : vector<8x640xf32>
    %31 = tpu.matmul %29, %30, %cst_19 {dimension_numbers = #tpu.dot_dimension_numbers<[1], [0], [0], [1], [0, 0, 1, 1], [], []>} : vector<8x128xf32>, vector<128x640xf32>, vector<8x640xf32> -> vector<8x640xf32>
    %32 = arith.addf %26, %31 : vector<8x640xf32>
    %33 = vector.extract_strided_slice %21 {offsets = [32, 0], sizes = [8, 128], strides = [1, 1]} : vector<128x128xf32> to vector<8x128xf32>
    %34 = vector.extract_strided_slice %21 {offsets = [40, 0], sizes = [8, 128], strides = [1, 1]} : vector<128x128xf32> to vector<8x128xf32>
    %35 = arith.maximumf %33, %34 : vector<8x128xf32>
    %c256 = arith.constant 256 : index
    %c0_20 = arith.constant 0 : index
    %36 = vector.load %arg4[%c256, %c0_20] : memref<1024x640xf32, #tpu.memory_space<vmem>>, vector<128x640xf32>
    %cst_21 = arith.constant dense<0.000000e+00> : vector<8x640xf32>
    %37 = tpu.matmul %35, %36, %cst_21 {dimension_numbers = #tpu.dot_dimension_numbers<[1], [0], [0], [1], [0, 0, 1, 1], [], []>} : vector<8x128xf32>, vector<128x640xf32>, vector<8x640xf32> -> vector<8x640xf32>
    %38 = arith.addf %32, %37 : vector<8x640xf32>
    %39 = vector.extract_strided_slice %21 {offsets = [48, 0], sizes = [8, 128], strides = [1, 1]} : vector<128x128xf32> to vector<8x128xf32>
    %40 = vector.extract_strided_slice %21 {offsets = [56, 0], sizes = [8, 128], strides = [1, 1]} : vector<128x128xf32> to vector<8x128xf32>
    %41 = arith.maximumf %39, %40 : vector<8x128xf32>
    %c384 = arith.constant 384 : index
    %c0_22 = arith.constant 0 : index
    %42 = vector.load %arg4[%c384, %c0_22] : memref<1024x640xf32, #tpu.memory_space<vmem>>, vector<128x640xf32>
    %cst_23 = arith.constant dense<0.000000e+00> : vector<8x640xf32>
    %43 = tpu.matmul %41, %42, %cst_23 {dimension_numbers = #tpu.dot_dimension_numbers<[1], [0], [0], [1], [0, 0, 1, 1], [], []>} : vector<8x128xf32>, vector<128x640xf32>, vector<8x640xf32> -> vector<8x640xf32>
    %44 = arith.addf %38, %43 : vector<8x640xf32>
    %45 = vector.extract_strided_slice %21 {offsets = [64, 0], sizes = [8, 128], strides = [1, 1]} : vector<128x128xf32> to vector<8x128xf32>
    %46 = vector.extract_strided_slice %21 {offsets = [72, 0], sizes = [8, 128], strides = [1, 1]} : vector<128x128xf32> to vector<8x128xf32>
    %47 = arith.maximumf %45, %46 : vector<8x128xf32>
    %c512 = arith.constant 512 : index
    %c0_24 = arith.constant 0 : index
    %48 = vector.load %arg4[%c512, %c0_24] : memref<1024x640xf32, #tpu.memory_space<vmem>>, vector<128x640xf32>
    %cst_25 = arith.constant dense<0.000000e+00> : vector<8x640xf32>
    %49 = tpu.matmul %47, %48, %cst_25 {dimension_numbers = #tpu.dot_dimension_numbers<[1], [0], [0], [1], [0, 0, 1, 1], [], []>} : vector<8x128xf32>, vector<128x640xf32>, vector<8x640xf32> -> vector<8x640xf32>
    %50 = arith.addf %44, %49 : vector<8x640xf32>
    %51 = vector.extract_strided_slice %21 {offsets = [80, 0], sizes = [8, 128], strides = [1, 1]} : vector<128x128xf32> to vector<8x128xf32>
    %52 = vector.extract_strided_slice %21 {offsets = [88, 0], sizes = [8, 128], strides = [1, 1]} : vector<128x128xf32> to vector<8x128xf32>
    %53 = arith.maximumf %51, %52 : vector<8x128xf32>
    %c640 = arith.constant 640 : index
    %c0_26 = arith.constant 0 : index
    %54 = vector.load %arg4[%c640, %c0_26] : memref<1024x640xf32, #tpu.memory_space<vmem>>, vector<128x640xf32>
    %cst_27 = arith.constant dense<0.000000e+00> : vector<8x640xf32>
    %55 = tpu.matmul %53, %54, %cst_27 {dimension_numbers = #tpu.dot_dimension_numbers<[1], [0], [0], [1], [0, 0, 1, 1], [], []>} : vector<8x128xf32>, vector<128x640xf32>, vector<8x640xf32> -> vector<8x640xf32>
    %56 = arith.addf %50, %55 : vector<8x640xf32>
    %57 = vector.extract_strided_slice %21 {offsets = [96, 0], sizes = [8, 128], strides = [1, 1]} : vector<128x128xf32> to vector<8x128xf32>
    %58 = vector.extract_strided_slice %21 {offsets = [104, 0], sizes = [8, 128], strides = [1, 1]} : vector<128x128xf32> to vector<8x128xf32>
    %59 = arith.maximumf %57, %58 : vector<8x128xf32>
    %c768 = arith.constant 768 : index
    %c0_28 = arith.constant 0 : index
    %60 = vector.load %arg4[%c768, %c0_28] : memref<1024x640xf32, #tpu.memory_space<vmem>>, vector<128x640xf32>
    %cst_29 = arith.constant dense<0.000000e+00> : vector<8x640xf32>
    %61 = tpu.matmul %59, %60, %cst_29 {dimension_numbers = #tpu.dot_dimension_numbers<[1], [0], [0], [1], [0, 0, 1, 1], [], []>} : vector<8x128xf32>, vector<128x640xf32>, vector<8x640xf32> -> vector<8x640xf32>
    %62 = arith.addf %56, %61 : vector<8x640xf32>
    %63 = vector.extract_strided_slice %21 {offsets = [112, 0], sizes = [8, 128], strides = [1, 1]} : vector<128x128xf32> to vector<8x128xf32>
    %64 = vector.extract_strided_slice %21 {offsets = [120, 0], sizes = [8, 128], strides = [1, 1]} : vector<128x128xf32> to vector<8x128xf32>
    %65 = arith.maximumf %63, %64 : vector<8x128xf32>
    %c896 = arith.constant 896 : index
    %c0_30 = arith.constant 0 : index
    %66 = vector.load %arg4[%c896, %c0_30] : memref<1024x640xf32, #tpu.memory_space<vmem>>, vector<128x640xf32>
    %cst_31 = arith.constant dense<0.000000e+00> : vector<8x640xf32>
    %67 = tpu.matmul %65, %66, %cst_31 {dimension_numbers = #tpu.dot_dimension_numbers<[1], [0], [0], [1], [0, 0, 1, 1], [], []>} : vector<8x128xf32>, vector<128x640xf32>, vector<8x640xf32> -> vector<8x640xf32>
    %68 = arith.addf %62, %67 : vector<8x640xf32>
    %c0_32 = arith.constant 0 : index
    %c0_33 = arith.constant 0 : index
    %69 = vector.load %arg5[%c0_32, %c0_33] : memref<1x640xf32, #tpu.memory_space<vmem>>, vector<1x640xf32>
    %70 = vector.broadcast %69 : vector<1x640xf32> to vector<8x640xf32>
    %71 = arith.addf %68, %70 : vector<8x640xf32>
    %cst_34 = arith.constant 0.000000e+00 : f32
    %72 = vector.broadcast %cst_34 : f32 to vector<8x640xf32>
    %73 = arith.maximumf %71, %72 : vector<8x640xf32>
    %c0_35 = arith.constant 0 : index
    %c0_36 = arith.constant 0 : index
    %74 = vector.load %arg6[%c0_35, %c0_36] : memref<640x128xf32, #tpu.memory_space<vmem>>, vector<640x128xf32>
    %cst_37 = arith.constant dense<0.000000e+00> : vector<8x128xf32>
    %75 = tpu.matmul %73, %74, %cst_37 {dimension_numbers = #tpu.dot_dimension_numbers<[1], [0], [0], [1], [0, 0, 1, 1], [], []>} : vector<8x640xf32>, vector<640x128xf32>, vector<8x128xf32> -> vector<8x128xf32>
    %c0_38 = arith.constant 0 : index
    %c0_39 = arith.constant 0 : index
    %76 = vector.load %arg7[%c0_38, %c0_39] : memref<1x128xf32, #tpu.memory_space<vmem>>, vector<1x128xf32>
    %77 = vector.broadcast %76 : vector<1x128xf32> to vector<8x128xf32>
    %78 = arith.addf %75, %77 : vector<8x128xf32>
    %79 = vector.extract_strided_slice %78 {offsets = [0, 17], sizes = [8, 1], strides = [1, 1]} : vector<8x128xf32> to vector<8x1xf32>
    %80 = vector.extract_strided_slice %78 {offsets = [0, 0], sizes = [8, 17], strides = [1, 1]} : vector<8x128xf32> to vector<8x17xf32>
    %cst_40 = arith.constant dense<0.000000e+00> : vector<8xf32>
    %81 = vector.multi_reduction <add>, %80, %cst_40 [1] : vector<8x17xf32> to vector<8xf32>
    %82 = vector.shape_cast %81 : vector<8xf32> to vector<8x1xf32>
    %cst_41 = arith.constant 1.700000e+01 : f32
    %83 = vector.broadcast %cst_41 : f32 to vector<8x1xf32>
    %84 = arith.divf %82, %83 : vector<8x1xf32>
    %85 = vector.broadcast %79 : vector<8x1xf32> to vector<8x128xf32>
    %86 = arith.addf %78, %85 : vector<8x128xf32>
    %87 = vector.broadcast %84 : vector<8x1xf32> to vector<8x128xf32>
    %88 = arith.subf %86, %87 : vector<8x128xf32>
    %c0_42 = arith.constant 0 : index
    %c0_43 = arith.constant 0 : index
    %89 = vector.load %arg8[%c0_42, %c0_43] : memref<8x128xf32, #tpu.memory_space<vmem>>, vector<8x128xf32>
    tpu.vector_store %arg8[%c0_42, %c0_43], %88 {strides = array<i32>} : memref<8x128xf32, #tpu.memory_space<vmem>>, vector<8x128xf32>,
    return
  }
  func.func @transform_0(%arg0: i32) -> (i32, i32) {
    %c0_i32 = arith.constant 0 : i32
    %c0_i32_0 = arith.constant 0 : i32
    return %arg0, %c0_i32 : i32, i32
  }
  func.func @transform_1(%arg0: i32) -> (i32, i32, i32) {
    %c0_i32 = arith.constant 0 : i32
    %c0_i32_0 = arith.constant 0 : i32
    %c0_i32_1 = arith.constant 0 : i32
    %c0_i32_2 = arith.constant 0 : i32
    return %c0_i32, %c0_i32_0, %c0_i32_1 : i32, i32, i32
  }
  func.func @transform_2(%arg0: i32) -> (i32, i32) {
    %c0_i32 = arith.constant 0 : i32
    %c0_i32_0 = arith.constant 0 : i32
    %c0_i32_1 = arith.constant 0 : i32
    return %c0_i32, %c0_i32_0 : i32, i32
  }
  func.func @transform_3(%arg0: i32) -> (i32, i32) {
    %c0_i32 = arith.constant 0 : i32
    %c0_i32_0 = arith.constant 0 : i32
    %c0_i32_1 = arith.constant 0 : i32
    return %c0_i32, %c0_i32_0 : i32, i32
  }
  func.func @transform_4(%arg0: i32) -> (i32, i32) {
    %c0_i32 = arith.constant 0 : i32
    %c0_i32_0 = arith.constant 0 : i32
    %c0_i32_1 = arith.constant 0 : i32
    return %c0_i32, %c0_i32_0 : i32, i32
  }
  func.func @transform_5(%arg0: i32) -> (i32, i32) {
    %c0_i32 = arith.constant 0 : i32
    %c0_i32_0 = arith.constant 0 : i32
    %c0_i32_1 = arith.constant 0 : i32
    return %c0_i32, %c0_i32_0 : i32, i32
  }
  func.func @transform_6(%arg0: i32) -> (i32, i32) {
    %c0_i32 = arith.constant 0 : i32
    %c0_i32_0 = arith.constant 0 : i32
    %c0_i32_1 = arith.constant 0 : i32
    return %c0_i32, %c0_i32_0 : i32, i32
  }
  func.func @transform_7(%arg0: i32) -> (i32, i32) {
    %c0_i32 = arith.constant 0 : i32
    %c0_i32_0 = arith.constant 0 : i32
    return %arg0, %c0_i32 : i32, i32
  }
}

</mosaic_0001>

<bundles_post_ra>
// kernel: cnn_dueling_forward.1
= control target key start
LH: loop header
LB: loop body
LE: loop exit
PB: predicated region body
PF: predicated region fallthrough
CT: control target
= control target key end

     0   :  { %12 = vsyncpa [#allocation3], 0  ;;  %s5904_s0 = inlined_call_operand.vmem [shape: f32[144,54], index: 0, kind: input, shape index: {}]   ;;  %s5905_s1 = inlined_call_operand.hbm [shape: f32[3,54,256], index: 1, kind: input, shape index: {}]   ;;  %s5906_s2 = inlined_call_operand.hbm [shape: f32[1,256], index: 2, kind: input, shape index: {}]   ;;  %s5907_s3 = inlined_call_operand.hbm [shape: f32[1024,640], index: 3, kind: input, shape index: {}]   ;;  %s5908_s4 = inlined_call_operand.hbm [shape: f32[1,640], index: 4, kind: input, shape index: {}]   ;;  %s5909_s5 = inlined_call_operand.hbm [shape: f32[640,128], index: 5, kind: input, shape index: {}]   ;;  %s5910_s6 = inlined_call_operand.hbm [shape: f32[1,128], index: 6, kind: input, shape index: {}]   ;;  %s5911_s7 = inlined_call_operand.vmem [shape: f32[8,128], index: 7, kind: output, shape index: {}]  }
   0x1   :  { %13 = vsyncpa [#allocation5], 0 }
   0x2   :  { %14 = vsyncpa [#allocation8], 0 }
   0x3   :  { %15 = vsyncpa [#allocation11], 0  ;;  %s5305_s24 = smov [#allocation4]   ;;  %s5306_s26 = smov [#allocation7]  }
   0x4   :  { %s36_s25 = sshll.u32 %s5305_s24, 4  ;;  %s58_s27 = sshll.u32 %s5306_s26, 4  ;;  %s37_s25 = int_to_ptr.vmem [resolvable:$true] %s36_s25  ;;  %s59_s27 = int_to_ptr.vmem [resolvable:$true] %s58_s27 }
   0x5   :  { %s5165_s30 = scalar_lea.hbm %s5906_s2, 32 }
   0x6   :  { %p5166_p0 = scmp.ne.s32.totalorder %s5906_s2, %s5165_s30  ;;  %p5169_p1 = scmp.lt.u32.totalorder %s5165_s30, %s5906_s2 }
   0x8   :  { %p5171_p2 = pnand %p5169_p1, %p5166_p0 }
   0xa   :  { %5174 = shalt.err (!%p5171_p2)
}
   0xb   :  { %s5175_s12 = scalar_lea.vmem %s37_s25, 32  ;;  %p5180_p4 = scmp.lt.s32.totalorder %s37_s25, %s37_s25 }
   0xc   :  { %p5176_p3 = scmp.ne.s32.totalorder %s37_s25, %s5175_s12  ;;  %p5181_p5 = scmp.lt.s32.totalorder %s5175_s12, %s5175_s12 }
   0xe   :  { %p5182_p6 = por %p5181_p5, %p5180_p4 }
  0x10   :  { %p5183_p7 = pnand %p5182_p6, %p5176_p3 }
  0x12   :  { %5186 = shalt.err (!%p5183_p7)
}
  0x13   :  { %39 = dma.hbm_to_vmem [thread:$0]  %s5906_s2, 32, %s37_s25, [#allocation5]  }
  0x14   :  { %s5187_s17 = scalar_lea.hbm %s5908_s4, 80 }
  0x15   :  { %p5188_p8 = scmp.ne.s32.totalorder %s5908_s4, %s5187_s17  ;;  %p5191_p9 = scmp.lt.u32.totalorder %s5187_s17, %s5908_s4 }
  0x17   :  { %p5193_p10 = pnand %p5191_p9, %p5188_p8 }
  0x19   :  { %5196 = shalt.err (!%p5193_p10)
}
  0x1a   :  { %s5197_s22 = scalar_lea.vmem %s59_s27, 80  ;;  %s5201_s23 = scalar_lea.vmem %s59_s27, 96 }
  0x1b   :  { %p5198_p11 = scmp.ne.s32.totalorder %s59_s27, %s5197_s22  ;;  %p5202_p12 = scmp.lt.s32.totalorder %s59_s27, %s59_s27 }
  0x1c   :  { %p5203_p13 = scmp.lt.s32.totalorder %s5201_s23, %s5197_s22 }
  0x1e   :  { %p5204_p0 = por %p5203_p13, %p5202_p12 }
  0x20   :  { %p5205_p1 = pnand %p5204_p0, %p5198_p11 }
  0x22   :  { %5208 = shalt.err (!%p5205_p1)
}
  0x23   :  { %61 = dma.hbm_to_vmem [thread:$0]  %s5908_s4, 80, %s59_s27, [#allocation8]  }
  0x24   :  { %s5307_s25 = smov [#allocation2]   ;;  %s5209_s30 = scalar_lea.hbm %s5905_s1, 5376 }
  0x25   :  { %s23_s26 = sshll.u32 %s5307_s25, 4  ;;  %p5210_p2 = scmp.ne.s32.totalorder %s5905_s1, %s5209_s30  ;;  %s24_s26 = int_to_ptr.vmem [resolvable:$true] %s23_s26 }
  0x26   :  { %p5213_p3 = scmp.lt.u32.totalorder %s5209_s30, %s5905_s1 }
  0x28   :  { %p5215_p4 = pnand %p5213_p3, %p5210_p2 }
  0x2a   :  { %5218 = shalt.err (!%p5215_p4)
}
  0x2b   :  { %s5219_s12 = scalar_lea.vmem %s24_s26, 5376  ;;  %p5224_p6 = scmp.lt.s32.totalorder %s24_s26, %s24_s26 }
  0x2c   :  { %p5220_p5 = scmp.ne.s32.totalorder %s24_s26, %s5219_s12  ;;  %p5225_p7 = scmp.lt.s32.totalorder %s5219_s12, %s5219_s12 }
  0x2e   :  { %p5226_p8 = por %p5225_p7, %p5224_p6 }
  0x30   :  { %p5227_p9 = pnand %p5226_p8, %p5220_p5 }
  0x32   :  { %5230 = shalt.err (!%p5227_p9)
}
  0x33   :  { %s5308_s4 = smov 256   ;;  %s5309_s27 = smov 16  }
  0x34   :  { %29 = dma.hbm_to_vmem [thread:$0]  %s5905_s1, 5376, %s24_s26, [#allocation3], %s5308_s4, %s5308_s4, %s5309_s27  }
  0x35   :  { %s5310_s15 = smov [#allocation6]   ;;  %s5231_s19 = scalar_lea.hbm %s5907_s3, 81920 }
  0x36   :  { %s45_s16 = sshll.u32 %s5310_s15, 4  ;;  %p5232_p10 = scmp.ne.s32.totalorder %s5907_s3, %s5231_s19  ;;  %s46_s16 = int_to_ptr.vmem [resolvable:$true] %s45_s16 }
  0x37   :  { %p5235_p11 = scmp.lt.u32.totalorder %s5231_s19, %s5907_s3 }
  0x39   :  { %p5237_p12 = pnand %p5235_p11, %p5232_p10 }
  0x3b   :  { %5240 = shalt.err (!%p5237_p12)
}
  0x3c   :  { %s5241_s2 = scalar_lea.vmem %s46_s16, 81920  ;;  %p5246_p0 = scmp.lt.s32.totalorder %s46_s16, %s46_s16 }
  0x3d   :  { %p5242_p13 = scmp.ne.s32.totalorder %s46_s16, %s5241_s2  ;;  %p5247_p1 = scmp.lt.s32.totalorder %s5241_s2, %s5241_s2 }
  0x3f   :  { %p5248_p2 = por %p5247_p1, %p5246_p0 }
  0x41   :  { %p5249_p3 = pnand %p5248_p2, %p5242_p13 }
  0x43   :  { %5252 = shalt.err (!%p5249_p3)
}
  0x44   :  { %s5311_s1 = smov 640   ;;  %s5312_s24 = smov 40  }
  0x45   :  { %51 = dma.hbm_to_vmem [thread:$0]  %s5907_s3, 81920, %s46_s16, [#allocation5], %s5311_s1, %s5311_s1, %s5312_s24  }
  0x46   :  { %s5313_s28 = smov [#allocation9]   ;;  %s5253_s9 = scalar_lea.hbm %s5909_s5, 10240 }
  0x47   :  { %s67_s29 = sshll.u32 %s5313_s28, 4  ;;  %p5254_p4 = scmp.ne.s32.totalorder %s5909_s5, %s5253_s9  ;;  %s68_s29 = int_to_ptr.vmem [resolvable:$true] %s67_s29 }
  0x48   :  { %p5257_p5 = scmp.lt.u32.totalorder %s5253_s9, %s5909_s5 }
  0x4a   :  { %p5259_p6 = pnand %p5257_p5, %p5254_p4 }
  0x4c   :  { %5262 = shalt.err (!%p5259_p6)
}
  0x4d   :  { %s5263_s27 = scalar_lea.vmem %s68_s29, 10240  ;;  %p5268_p8 = scmp.lt.s32.totalorder %s68_s29, %s68_s29 }
  0x4e   :  { %p5264_p7 = scmp.ne.s32.totalorder %s68_s29, %s5263_s27  ;;  %p5269_p9 = scmp.lt.s32.totalorder %s5263_s27, %s5263_s27 }
  0x50   :  { %p5270_p10 = por %p5269_p9, %p5268_p8 }
  0x52   :  { %p5271_p11 = pnand %p5270_p10, %p5264_p7 }
  0x54   :  { %5274 = shalt.err (!%p5271_p11)
}
  0x55   :  { %s5314_s3 = smov 128   ;;  %s5315_s13 = smov 8  }
  0x56   :  { %73 = dma.hbm_to_vmem [thread:$0]  %s5909_s5, 10240, %s68_s29, [#allocation8], %s5314_s3, %s5314_s3, %s5315_s13  }
  0x57   :  { %s5316_s16 = smov [#allocation10]   ;;  %s5275_s20 = scalar_lea.hbm %s5910_s6, 16 }
  0x58   :  { %s80_s17 = sshll.u32 %s5316_s16, 4  ;;  %p5276_p12 = scmp.ne.s32.totalorder %s5910_s6, %s5275_s20  ;;  %s81_s17 = int_to_ptr.vmem [resolvable:$true] %s80_s17 }
  0x59   :  { %p5279_p13 = scmp.lt.u32.totalorder %s5275_s20, %s5910_s6 }
  0x5b   :  { %p5281_p0 = pnand %p5279_p13, %p5276_p12 }
  0x5d   :  { %5284 = shalt.err (!%p5281_p0)
}
  0x5e   :  { %s5285_s1 = scalar_lea.vmem %s81_s17, 16  ;;  %s5289_s5 = scalar_lea.vmem %s81_s17, 32 }
  0x5f   :  { %p5286_p1 = scmp.ne.s32.totalorder %s81_s17, %s5285_s1  ;;  %p5290_p2 = scmp.lt.s32.totalorder %s81_s17, %s81_s17 }
  0x60   :  { %p5291_p3 = scmp.lt.s32.totalorder %s5289_s5, %s5285_s1 }
  0x62   :  { %p5292_p4 = por %p5291_p3, %p5290_p2 }
  0x64   :  { %p5293_p5 = pnand %p5292_p4, %p5286_p1 }
  0x66   :  { %5296 = shalt.err (!%p5293_p5)
}
  0x67   :  { %83 = dma.hbm_to_vmem [thread:$0]  %s5910_s6, 16, %s81_s17, [#allocation11]  }
  0x68   :  { %5297 = dma.done.wait [#allocation3], 5376  }
  0x69   :  { %5298 = vsyncadd [#allocation3], 4294961920 }
  0x6a   :  { %5299 = dma.done.wait [#allocation5], 81952  }
  0x6b   :  { %5300 = vsyncadd [#allocation5], 4294885344 }
  0x6c   :  { %5301 = dma.done.wait [#allocation8], 10320  }
  0x6d   :  { %5302 = vsyncadd [#allocation8], 4294956976 }
  0x6e   :  { %5303 = dma.done.wait [#allocation11], 16  }
  0x6f   :  { %5304 = vsyncadd [#allocation11], 4294967280  ;;  %v5317_v0 = vmov 0.0   ;;  %v135_v1 = vld [vmem:[#allocation2 + $0x78] sm:$0xff]  ;;  %v137_v2 = vld [vmem:[#allocation2 + $0x88] sm:$0xff]  ;;  %vm197_vm0 = vcmask 1045504  }
  0x70   :  { %268 = vmatprep.mubr.f32.mxu0 %v5317_v0  ;;  %v134_v3 = vld [vmem:[#allocation2 + $0x70] sm:$0xff]  ;;  %v4228_v4 = vpack.c.bf16 %v137_v2, %v135_v1  ;;  %v136_v5 = vld [vmem:[#allocation2 + $0x80] sm:$0xff]  ;;  %v139_v6 = vld [vmem:[#allocation2 + $0x98] sm:$0xff]  ;;  %vm148_vm1 = vcmask 441344   ;;  %vm5319_vm2 = vmmov 0   ;;  %vm3613_vm3 = vcmask 138240  }
  0x71   :  { %v141_v7 = vld [vmem:[#allocation2 + $0xa8] sm:$0xff]  ;;  %v4230_v8 = vpack.c.bf16 %v136_v5, %v134_v3  ;;  %v138_v10 = vld [vmem:[#allocation2 + $0x90] sm:$0xff]  ;;  %v140_v11 = vld [vmem:[#allocation2 + $0xa0] sm:$0xff]  ;;  %v5318_v3 = vmov 0.0|0.0   ;;  %3945 = vmatprep.mubr.msk.f32.mxu1 %vm5319_vm2, %v5317_v0 }
  0x72   :  { %v4232_v9 = vpack.c.bf16 %v141_v7, %v139_v6  ;;  %v143_v12 = vld [vmem:[#allocation2 + $0xb8] sm:$0xff]  ;;  %4229 = vmatprep.subr.bf16.mxu0 %v4228_v4  ;;  %v145_v13 = vld [vmem:[#allocation2 + $0xc8] sm:$0xff]  ;;  %v4234_v14 = vpack.c.bf16 %v140_v11, %v138_v10  ;;  %v142_v16 = vld [vmem:[#allocation2 + $0xb0] sm:$0xff]  ;;  %4328 = vmatprep.subr.bf16.mxu1 %v5318_v3 }
  0x73   :  { %4231 = vmatpush1.bf16.msra.mxu0 %v4230_v8  ;;  %v4236_v15 = vpack.c.bf16 %v145_v13, %v143_v12  ;;  %v144_v17 = vld [vmem:[#allocation2 + $0xc0] sm:$0xff]  ;;  %v147_v19 = vld [vmem:[#allocation2 + $0xd8] sm:$0x3f]  ;;  %v119_v20 = vld [vmem:[#allocation2 + $0x8] sm:$0xff] }
  0x74   :  { %4233 = vmatprep.subr.bf16.mxu0 %v4232_v9  ;;  %v4238_v18 = vpack.c.bf16 %v144_v17, %v142_v16  ;;  %v121_v21 = vld [vmem:[#allocation2 + $0x18] sm:$0xff]  ;;  %v118_v22 = vld [vmem:[#allocation2] sm:$0xff]  ;;  %v120_v23 = vld [vmem:[#allocation2 + $0x10] sm:$0xff] }
  0x75   :  { %v123_v24 = vld [vmem:[#allocation2 + $0x28] sm:$0xff]  ;;  %v125_v25 = vld [vmem:[#allocation2 + $0x38] sm:$0xff]  ;;  %v146_v26 = vld [vmem:[#allocation2 + $0xd0] sm:$0x3f]  ;;  %v4240_v27 = vpack.c.bf16 %v121_v21, %v119_v20  ;;  %v4242_v29 = vpack.c.bf16 %v120_v23, %v118_v22 }
  0x76   :  { %v5438_v28 = vld [vmem:[%s5904_s0 + $0x8] sm:$0xff]  ;;  %v4244_v30 = vpack.c.bf16 %v125_v25, %v123_v24  ;;  %v122_v31 = vld [vmem:[#allocation2 + $0x20] sm:$0xff]  ;;  %v124_v32 = vld [vmem:[#allocation2 + $0x30] sm:$0xff] }
  0x77   :  { %4235 = vmatpush1.bf16.msra.mxu0 %v4234_v14  ;;  %v127_v33 = vld [vmem:[#allocation2 + $0x48] sm:$0xff]  ;;  %v129_v34 = vld [vmem:[#allocation2 + $0x58] sm:$0xff]  ;;  %v5447_v35 = vld [vmem:[%s5904_s0 + $0x10] sm:$0xff]  ;;  %v4246_v36 = vpack.c.bf16 %v124_v32, %v122_v31 }
  0x78   :  { %4237 = vmatprep.subr.bf16.mxu0 %v4236_v15  ;;  %v4248_v37 = vpack.c.bf16 %v129_v34, %v127_v33  ;;  %v126_v38 = vld [vmem:[#allocation2 + $0x40] sm:$0xff]  ;;  %v128_v39 = vld [vmem:[#allocation2 + $0x50] sm:$0xff]  ;;  %v5455_v40 = vld [vmem:[%s5904_s0 + $0x18] sm:$0xff] }
  0x79   :  { %v4250_v41 = vpack.c.bf16 %v128_v39, %v126_v38  ;;  %v131_v42 = vld [vmem:[#allocation2 + $0x68] sm:$0x3f]  ;;  %v555_v44 = vld [vmem:[#allocation2 + $0xf8] sm:$0xff]  ;;  %v5463_v45 = vld [vmem:[%s5904_s0 + $0x20] sm:$0xff] }
  0x7a   :  { %v553_v43 = vld [vmem:[#allocation2 + $0xe8] sm:$0xff]  ;;  %v130_v46 = vld [vmem:[#allocation2 + $0x60] sm:$0x3f]  ;;  %v5481_v49 = vld [vmem:[%s5904_s0 + $0x30] sm:$0xff] }
  0x7b   :  { %4239 = vmatpush1.bf16.msra.mxu0 %v4238_v18  ;;  %v4252_v47 = vpack.c.bf16 %v555_v44, %v553_v43  ;;  %v5472_v48 = vld [vmem:[%s5904_s0 + $0x28] sm:$0xff]  ;;  %v5489_v50 = vld [vmem:[%s5904_s0 + $0x38] sm:$0xff]  ;;  %v5497_v51 = vld [vmem:[%s5904_s0 + $0x40] sm:$0xff] }
  0x7c   :  { %3635 = vmatprep.subr.msk.mxu0 %vm197_vm0, %v147_v19  ;;  %v5505_v52 = vld [vmem:[%s5904_s0 + $0x48] sm:$0xff]  ;;  %v5513_v53 = vld [vmem:[%s5904_s0 + $0x50] sm:$0xff]  ;;  %v5521_v54 = vld [vmem:[%s5904_s0 + $0x58] sm:$0xff] }
  0x7d   :  { %v5529_v55 = vld [vmem:[%s5904_s0 + $0x60] sm:$0xff]  ;;  %v5537_v56 = vld [vmem:[%s5904_s0 + $0x68] sm:$0xff]  ;;  %v5545_v57 = vld [vmem:[%s5904_s0 + $0x70] sm:$0xff] }
  0x7e   :  { %v5553_v58 = vld [vmem:[%s5904_s0 + $0x78] sm:$0xff]  ;;  %v5561_v59 = vld [vmem:[%s5904_s0 + $0x80] sm:$0xff]  ;;  %v554_v61 = vld [vmem:[#allocation2 + $0xf0] sm:$0xff] }
  0x7f   :  { %3636 = vmatpush1.msk.msra.mxu0 %vm197_vm0, %v146_v26  ;;  %v552_v60 = vld [vmem:[#allocation2 + $0xe0] sm:$0xff]  ;;  %v557_v62 = vld [vmem:[#allocation2 + $0x108] sm:$0xff]  ;;  %v559_v63 = vld [vmem:[#allocation2 + $0x118] sm:$0xff] }
  0x80   :  { %3637 = vmatmul.mubr.msk.f32.vlgmr.msra.gmra.mrb[0].mxu0 %vm148_vm1, %v5438_v28  ;;  %4241 = vmatprep.subr.bf16.mxu0 %v4240_v27  ;;  %v102_v1 = vld [vmem:[%s5904_s0] sm:$0xff]  ;;  %v4254_v2 = vpack.c.bf16 %v554_v61, %v552_v60  ;;  %v991_v4 = vld [vmem:[#allocation6 + $0x2a0] sm:$0xff]  ;;  %v4256_v6 = vpack.c.bf16 %v559_v63, %v557_v62  ;;  %v561_v9 = vld [vmem:[#allocation2 + $0x128] sm:$0xff] }
  0x81   :  { %4243 = vmatpush1.bf16.msra.mxu0 %v4242_v29  ;;  %274 = vmatprep.mubr.f32.mxu0 %v5317_v0  ;;  %v996_v5 = vld [vmem:[#allocation6 + $0x2c8] sm:$0xff]  ;;  %v558_v8 = vld [vmem:[#allocation2 + $0x110] sm:$0xff]  ;;  %v1001_v12 = vld [vmem:[#allocation6 + $0x2f0] sm:$0xff] }
  0x82   :  { %4245 = vmatprep.subr.bf16.mxu0 %v4244_v30  ;;  %v556_v7 = vld [vmem:[#allocation2 + $0x100] sm:$0xff]  ;;  %v4329_v10 = vpack.c.bf16 %v996_v5, %v991_v4  ;;  %v563_v11 = vld [vmem:[#allocation2 + $0x138] sm:$0xff]  ;;  %v1006_v13 = vld [vmem:[#allocation6 + $0x318] sm:$0xff] }
  0x83   :  { %v4332_v14 = vpack.c.bf16 %v1006_v13, %v1001_v12  ;;  %v4258_v15 = vpack.c.bf16 %v558_v8, %v556_v7  ;;  %v1011_v16 = vld [vmem:[#allocation6 + $0x340] sm:$0xff]  ;;  %v1016_v17 = vld [vmem:[#allocation6 + $0x368] sm:$0xff]  ;;  %v4260_v18 = vpack.c.bf16 %v563_v11, %v561_v9  ;;  %v565_v23 = vld [vmem:[#allocation2 + $0x148] sm:$0x3f] }
  0x84   :  { %3638 = vmatmul.mubr.msk.f32.gmra.mrb[2].mxu0 %vm148_vm1, %v5447_v35  ;;  %4330 = vmatpush3.bf16.msra.mxu1 %v4329_v10  ;;  %v560_v19 = vld [vmem:[#allocation2 + $0x120] sm:$0xff]  ;;  %v562_v20 = vld [vmem:[#allocation2 + $0x130] sm:$0xff]  ;;  %v4335_v21 = vpack.c.bf16 %v1016_v17, %v1011_v16 }
  0x85   :  { %280 = vmatprep.mubr.f32.mxu0 %v5317_v0  ;;  %4247 = vmatpush1.bf16.msra.mxu0 %v4246_v36  ;;  %v4262_v22 = vpack.c.bf16 %v562_v20, %v560_v19  ;;  %v988_v24 = vld [vmem:[#allocation6 + $0x288] sm:$0xff]  ;;  %v993_v25 = vld [vmem:[#allocation6 + $0x2b0] sm:$0xff]  ;;  %v998_v30 = vld [vmem:[#allocation6 + $0x2d8] sm:$0xff] }
  0x86   :  { %4249 = vmatprep.subr.bf16.mxu0 %v4248_v37  ;;  %4331 = vmatprep.subr.bf16.mxu1 %v5318_v3  ;;  %v564_v26 = vld [vmem:[#allocation2 + $0x140] sm:$0x3f]  ;;  %v4264_v27 = vpack.c.bf16 %v993_v25, %v988_v24  ;;  %v1003_v31 = vld [vmem:[#allocation6 + $0x300] sm:$0xff]  ;;  %v1002_v36 = vld [vmem:[#allocation6 + $0x2f8] sm:$0xff] }
  0x87   :  { %v992_v29 = vld [vmem:[#allocation6 + $0x2a8] sm:$0xff]  ;;  %v4268_v33 = vpack.c.bf16 %v1003_v31, %v998_v30  ;;  %v997_v34 = vld [vmem:[#allocation6 + $0x2d0] sm:$0xff]  ;;  %v1038_v62 = vld [vmem:[#allocation6 + $0x418] sm:$0xff] }
  0x88   :  { %3639 = vmatmul.mubr.msk.f32.gmra.mrb[4].mxu0 %vm148_vm1, %v5455_v40  ;;  %4333 = vmatpush3.bf16.msra.mxu1 %v4332_v14  ;;  %v1008_v37 = vld [vmem:[#allocation6 + $0x328] sm:$0xff]  ;;  %v1013_v38 = vld [vmem:[#allocation6 + $0x350] sm:$0xff]  ;;  %v4270_v39 = vpack.c.bf16 %v1002_v36, %v997_v34  ;;  %v1043_v63 = vld [vmem:[#allocation6 + $0x440] sm:$0xff] }
  0x89   :  { %286 = vmatprep.mubr.f32.mxu0 %v5317_v0  ;;  %4251 = vmatpush1.bf16.msra.mxu0 %v4250_v41  ;;  %v4272_v41 = vpack.c.bf16 %v1013_v38, %v1008_v37  ;;  %v1012_v43 = vld [vmem:[#allocation6 + $0x348] sm:$0xff]  ;;  %v1042_v4 = vld [vmem:[#allocation6 + $0x438] sm:$0xff]  ;;  %v1041_v5 = vld [vmem:[#allocation6 + $0x430] sm:$0xff] }
  0x8a   :  { %3653 = vmatprep.subr.msk.mxu0 %vm197_vm0, %v131_v42  ;;  %4334 = vmatprep.subr.bf16.mxu1 %v5318_v3  ;;  %v1007_v42 = vld [vmem:[#allocation6 + $0x320] sm:$0xff]  ;;  %v1036_v60 = vld [vmem:[#allocation6 + $0x408] sm:$0xff]  ;;  %v1046_v7 = vld [vmem:[#allocation6 + $0x458] sm:$0xff] }
  0x8b   :  { %v4274_v44 = vpack.c.bf16 %v1012_v43, %v1007_v42  ;;  %v4344_v8 = vpack.c.bf16 %v1046_v7, %v1041_v5  ;;  %v1048_v9 = vld [vmem:[#allocation6 + $0x468] sm:$0xff]  ;;  %v1053_v10 = vld [vmem:[#allocation6 + $0x490] sm:$0xff]  ;;  %v1047_v12 = vld [vmem:[#allocation6 + $0x460] sm:$0xff] }
  0x8c   :  { %3640 = vmatmul.mubr.msk.f32.gmra.mrb[6].mxu0 %vm148_vm1, %v5463_v45  ;;  %4336 = vmatpush3.bf16.msra.mxu1 %v4335_v21  ;;  %v4288_v11 = vpack.c.bf16 %v1053_v10, %v1048_v9  ;;  %v1052_v13 = vld [vmem:[#allocation6 + $0x488] sm:$0xff]  ;;  %v1051_v14 = vld [vmem:[#allocation6 + $0x480] sm:$0xff]  ;;  %v1057_v21 = vld [vmem:[#allocation6 + $0x4b0] sm:$0xff] }
  0x8d   :  { %292 = vmatprep.mubr.f32.mxu0 %v5317_v0  ;;  %3654 = vmatpush1.msk.msra.mxu0 %vm197_vm0, %v130_v46  ;;  %v1056_v16 = vld [vmem:[#allocation6 + $0x4a8] sm:$0xff]  ;;  %v1063_v19 = vld [vmem:[#allocation6 + $0x4e0] sm:$0xff]  ;;  %v1066_v25 = vld [vmem:[#allocation6 + $0x4f8] sm:$0xff] }
  0x8e   :  { %4253 = vmatprep.subr.bf16.mxu0 %v4252_v47  ;;  %4337 = vmatprep.subr.bf16.mxu1 %v5318_v3  ;;  %v1017_v47 = vld [vmem:[#allocation6 + $0x370] sm:$0xff]  ;;  %v4347_v17 = vpack.c.bf16 %v1056_v16, %v1051_v14  ;;  %v813_v37 = vld [vmem:[#allocation4] sm:$0x3]  ;;  %v906_v9 = vld [vmem:[#allocation6] sm:$0xff] }
  0x8f   :  { %v912_v31 = vld [vmem:[#allocation6 + $0x30] sm:$0xff]  ;;  %v911_v10 = vld [vmem:[#allocation6 + $0x28] sm:$0xff]  ;;  %v922_v16 = vld [vmem:[#allocation6 + $0x80] sm:$0xff] }
  0x90   :  { %3641 = vmatmul.mubr.msk.f32.gmra.mrb[8].mxu0 %vm148_vm1, %v5472_v48  ;;  %v989_v5 = vld [vmem:[#allocation6 + $0x290] sm:$0xff] }
  0x91   :  { %298 = vmatprep.mubr.f32.mxu0 %v5317_v0  ;;  %v1005_v14 = vld [vmem:[#allocation6 + $0x310] sm:$0xff] }
  0x94   :  { %3642 = vmatmul.mubr.msk.f32.gmra.mrb[10].mxu0 %vm148_vm1, %v5481_v49 }
  0x95   :  { %304 = vmatprep.mubr.f32.mxu0 %v5317_v0 }
  0x98   :  { %3643 = vmatmul.mubr.msk.f32.gmra.mrb[12].mxu0 %vm148_vm1, %v5489_v50 }
  0x99   :  { %310 = vmatprep.mubr.f32.mxu0 %v5317_v0 }
  0x9c   :  { %3644 = vmatmul.mubr.msk.f32.gmra.mrb[14].mxu0 %vm148_vm1, %v5497_v51 }
  0x9d   :  { %316 = vmatprep.mubr.f32.mxu0 %v5317_v0 }
  0xa0   :  { %3645 = vmatmul.mubr.msk.f32.gmra.mrb[16].mxu0 %vm148_vm1, %v5505_v52 }
  0xa1   :  { %322 = vmatprep.mubr.f32.mxu0 %v5317_v0 }
  0xa4   :  { %3646 = vmatmul.mubr.msk.f32.gmra.mrb[18].mxu0 %vm148_vm1, %v5513_v53 }
  0xa5   :  { %328 = vmatprep.mubr.f32.mxu0 %v5317_v0 }
  0xa8   :  { %3647 = vmatmul.mubr.msk.f32.gmra.mrb[20].mxu0 %vm148_vm1, %v5521_v54 }
  0xa9   :  { %334 = vmatprep.mubr.f32.mxu0 %v5317_v0 }
  0xac   :  { %3648 = vmatmul.mubr.msk.f32.gmra.mrb[22].mxu0 %vm148_vm1, %v5529_v55 }
  0xad   :  { %340 = vmatprep.mubr.f32.mxu0 %v5317_v0 }
  0xb0   :  { %3649 = vmatmul.mubr.msk.f32.gmra.mrb[24].mxu0 %vm148_vm1, %v5537_v56 }
  0xb1   :  { %346 = vmatprep.mubr.f32.mxu0 %v5317_v0 }
  0xb4   :  { %3650 = vmatmul.mubr.msk.f32.gmra.mrb[26].mxu0 %vm148_vm1, %v5545_v57 }
  0xb5   :  { %352 = vmatprep.mubr.f32.mxu0 %v5317_v0 }
  0xb8   :  { %3651 = vmatmul.mubr.msk.f32.gmra.mrb[28].mxu0 %vm148_vm1, %v5553_v58 }
  0xb9   :  { %358 = vmatprep.mubr.f32.mxu0 %v5317_v0 }
  0xbc   :  { %3652 = vmatmul.mubr.msk.f32.gmra.mrb[30].mxu0 %vm148_vm1, %v5561_v59 }
  0xbd   :  { %438 = vmatprep.mubr.f32.mxu0 %v5317_v0 }
  0xc0   :  { %3655 = vmatmul.mubr.msk.f32.vlgmr.msra.gmra.mrb[0].mxu0 %vm148_vm1, %v102_v1  ;;  %v4284_v1 = vpack.c.bf16 %v1043_v63, %v1038_v62 }
  0xc1   :  { %4255 = vmatpush1.bf16.msra.mxu0 %v4254_v2  ;;  %444 = vmatprep.mubr.f32.mxu0 %v5317_v0  ;;  %v1037_v2 = vld [vmem:[#allocation6 + $0x410] sm:$0xff] }
  0xc2   :  { %4257 = vmatprep.subr.bf16.mxu0 %v4256_v6  ;;  %v4286_v6 = vpack.c.bf16 %v1042_v4, %v1037_v2 }
  0xc4   :  { %3656 = vmatmul.mubr.msk.f32.gmra.mrb[2].mxu0 %vm148_vm1, %v5438_v28  ;;  %v987_v28 = vld [vmem:[#allocation6 + $0x280] sm:$0xff] }
  0xc5   :  { %450 = vmatprep.mubr.f32.mxu0 %v5317_v0  ;;  %4259 = vmatpush1.bf16.msra.mxu0 %v4258_v15  ;;  %v4266_v32 = vpack.c.bf16 %v992_v29, %v987_v28  ;;  %v4290_v15 = vpack.c.bf16 %v1052_v13, %v1047_v12  ;;  %v995_v28 = vld [vmem:[#allocation6 + $0x2c0] sm:$0xff]  ;;  %v907_v29 = vld [vmem:[#allocation6 + $0x8] sm:$0xff] }
  0xc6   :  { %4261 = vmatprep.subr.bf16.mxu0 %v4260_v18  ;;  %v1058_v18 = vld [vmem:[#allocation6 + $0x4b8] sm:$0xff] }
  0xc7   :  { %v4292_v20 = vpack.c.bf16 %v1063_v19, %v1058_v18 }
  0xc8   :  { %3657 = vmatmul.mubr.msk.f32.gmra.mrb[4].mxu0 %vm148_vm1, %v5447_v35 }
  0xc9   :  { %456 = vmatprep.mubr.f32.mxu0 %v5317_v0  ;;  %4263 = vmatpush1.bf16.msra.mxu0 %v4262_v22  ;;  %v1062_v22 = vld [vmem:[#allocation6 + $0x4d8] sm:$0xff] }
  0xca   :  { %3671 = vmatprep.subr.msk.mxu0 %vm197_vm0, %v565_v23  ;;  %v1061_v23 = vld [vmem:[#allocation6 + $0x4d0] sm:$0xff]  ;;  %v4294_v24 = vpack.c.bf16 %v1062_v22, %v1057_v21  ;;  %v4354_v21 = vpack.c.bf16 %v911_v10, %v906_v9  ;;  %v999_v22 = vld [vmem:[#allocation6 + $0x2e0] sm:$0xff] }
  0xcc   :  { %3658 = vmatmul.mubr.msk.f32.gmra.mrb[6].mxu0 %vm148_vm1, %v5455_v40 }
  0xcd   :  { %462 = vmatprep.mubr.f32.mxu0 %v5317_v0  ;;  %3672 = vmatpush1.msk.msra.mxu0 %vm197_vm0, %v564_v26  ;;  %v4350_v26 = vpack.c.bf16 %v1066_v25, %v1061_v23  ;;  %v1004_v23 = vld [vmem:[#allocation6 + $0x308] sm:$0xff] }
  0xce   :  { %4265 = vmatprep.subr.bf16.mxu0 %v4264_v27  ;;  %v990_v27 = vld [vmem:[#allocation6 + $0x298] sm:$0xff] }
  0xcf   :  { %v4296_v30 = vpack.c.bf16 %v995_v28, %v990_v27 }
  0xd0   :  { %3659 = vmatmul.mubr.msk.f32.gmra.mrb[8].mxu0 %vm148_vm1, %v5463_v45 }
  0xd1   :  { %468 = vmatprep.mubr.f32.mxu0 %v5317_v0 }
  0xd4   :  { %3660 = vmatmul.mubr.msk.f32.gmra.mrb[10].mxu0 %vm148_vm1, %v5472_v48 }
  0xd5   :  { %474 = vmatprep.mubr.f32.mxu0 %v5317_v0 }
  0xd8   :  { %3661 = vmatmul.mubr.msk.f32.gmra.mrb[12].mxu0 %vm148_vm1, %v5481_v49 }
  0xd9   :  { %480 = vmatprep.mubr.f32.mxu0 %v5317_v0 }
  0xdc   :  { %3662 = vmatmul.mubr.msk.f32.gmra.mrb[14].mxu0 %vm148_vm1, %v5489_v50 }
  0xdd   :  { %486 = vmatprep.mubr.f32.mxu0 %v5317_v0 }
  0xe0   :  { %3663 = vmatmul.mubr.msk.f32.gmra.mrb[16].mxu0 %vm148_vm1, %v5497_v51 }
  0xe1   :  { %492 = vmatprep.mubr.f32.mxu0 %v5317_v0 }
  0xe4   :  { %3664 = vmatmul.mubr.msk.f32.gmra.mrb[18].mxu0 %vm148_vm1, %v5505_v52 }
  0xe5   :  { %498 = vmatprep.mubr.f32.mxu0 %v5317_v0 }
  0xe8   :  { %3665 = vmatmul.mubr.msk.f32.gmra.mrb[20].mxu0 %vm148_vm1, %v5513_v53 }
  0xe9   :  { %504 = vmatprep.mubr.f32.mxu0 %v5317_v0 }
  0xec   :  { %3666 = vmatmul.mubr.msk.f32.gmra.mrb[22].mxu0 %vm148_vm1, %v5521_v54 }
  0xed   :  { %510 = vmatprep.mubr.f32.mxu0 %v5317_v0 }
  0xf0   :  { %3667 = vmatmul.mubr.msk.f32.gmra.mrb[24].mxu0 %vm148_vm1, %v5529_v55 }
  0xf1   :  { %516 = vmatprep.mubr.f32.mxu0 %v5317_v0 }
  0xf4   :  { %3668 = vmatmul.mubr.msk.f32.gmra.mrb[26].mxu0 %vm148_vm1, %v5537_v56 }
  0xf5   :  { %522 = vmatprep.mubr.f32.mxu0 %v5317_v0 }
  0xf8   :  { %3669 = vmatmul.mubr.msk.f32.gmra.mrb[28].mxu0 %vm148_vm1, %v5545_v57 }
  0xf9   :  { %528 = vmatprep.mubr.f32.mxu0 %v5317_v0 }
  0xfc   :  { %3670 = vmatmul.mubr.msk.f32.gmra.mrb[30].mxu0 %vm148_vm1, %v5553_v58 }
  0xfd   :  { %684 = vmatprep.mubr.f32.mxu0 %v5317_v0 }
 0x100   :  { %3673 = vmatmul.mubr.msk.f32.vlgmr.msra.gmra.mrb[0].mxu0 %vm148_vm1, %v5447_v35  ;;  %v550_v35 = vld [vmem:[%s5904_s0 + $0x88] sm:$0xff] }
 0x101   :  { %690 = vmatprep.mubr.f32.mxu0 %v5317_v0  ;;  %4267 = vmatpush1.bf16.msra.mxu0 %v4266_v32  ;;  %v4352_v32 = vpack.c.bf16 %v912_v31, %v907_v29  ;;  %v916_v29 = vld [vmem:[#allocation6 + $0x50] sm:$0xff]  ;;  %v1010_v31 = vld [vmem:[#allocation6 + $0x338] sm:$0xff] }
 0x102   :  { %4269 = vmatprep.subr.bf16.mxu0 %v4268_v33  ;;  %v815_v33 = vlaneseq }
 0x104   :  { %3674 = vmatmul.mubr.msk.f32.gmra.mrb[2].mxu0 %vm148_vm1, %v5455_v40  ;;  %v1018_v40 = vld [vmem:[#allocation6 + $0x378] sm:$0xff]  ;;  %v5678_v34 = vshrl.u32 %v815_v33, 7 }
 0x105   :  { %696 = vmatprep.mubr.f32.mxu0 %v5317_v0  ;;  %4271 = vmatpush1.bf16.msra.mxu0 %v4270_v39 }
 0x106   :  { %4273 = vmatprep.subr.bf16.mxu0 %v4272_v41  ;;  %v817_v36 = vsub.s32 0, %v5678_v34  ;;  %v821_v38 = vsub.s32 1, %v5678_v34 }
 0x108   :  { %3675 = vmatmul.mubr.msk.f32.gmra.mrb[4].mxu0 %vm148_vm1, %v5463_v45  ;;  %v1023_v45 = vld [vmem:[#allocation6 + $0x3a0] sm:$0xff]  ;;  %v5684_v39 = vrot.slane %v813_v37, %v817_v36  ;;  %v5688_v41 = vrot.slane %v813_v37, %v821_v38 }
 0x109   :  { %702 = vmatprep.mubr.f32.mxu0 %v5317_v0  ;;  %4275 = vmatpush1.bf16.msra.mxu0 %v4274_v44  ;;  %v4276_v46 = vpack.c.bf16 %v1023_v45, %v1018_v40  ;;  %v1015_v37 = vld [vmem:[#allocation6 + $0x360] sm:$0xff] }
 0x10b   :  { %4277 = vmatprep.subr.bf16.mxu0 %v4276_v46 }
 0x10c   :  { %3676 = vmatmul.mubr.msk.f32.gmra.mrb[6].mxu0 %vm148_vm1, %v5472_v48  ;;  %v1022_v48 = vld [vmem:[#allocation6 + $0x398] sm:$0xff] }
 0x10d   :  { %708 = vmatprep.mubr.f32.mxu0 %v5317_v0 }
 0x110   :  { %3677 = vmatmul.mubr.msk.f32.gmra.mrb[8].mxu0 %vm148_vm1, %v5481_v49  ;;  %v1021_v49 = vld [vmem:[#allocation6 + $0x390] sm:$0xff] }
 0x111   :  { %714 = vmatprep.mubr.f32.mxu0 %v5317_v0 }
 0x114   :  { %3678 = vmatmul.mubr.msk.f32.gmra.mrb[10].mxu0 %vm148_vm1, %v5489_v50  ;;  %v4278_v50 = vpack.c.bf16 %v1022_v48, %v1017_v47 }
 0x115   :  { %720 = vmatprep.mubr.f32.mxu0 %v5317_v0 }
 0x116   :  { %4279 = vmatpush1.bf16.msra.mxu0 %v4278_v50 }
 0x118   :  { %3679 = vmatmul.mubr.msk.f32.gmra.mrb[12].mxu0 %vm148_vm1, %v5497_v51  ;;  %v1026_v51 = vld [vmem:[#allocation6 + $0x3b8] sm:$0xff] }
 0x119   :  { %726 = vmatprep.mubr.f32.mxu0 %v5317_v0 }
 0x11c   :  { %3680 = vmatmul.mubr.msk.f32.gmra.mrb[14].mxu0 %vm148_vm1, %v5505_v52  ;;  %v4338_v52 = vpack.c.bf16 %v1026_v51, %v1021_v49 }
 0x11d   :  { %732 = vmatprep.mubr.f32.mxu0 %v5317_v0 }
 0x11e   :  { %4339 = vmatpush3.bf16.msra.mxu1 %v4338_v52 }
 0x11f   :  { %4340 = vmatprep.subr.bf16.mxu1 %v5318_v3 }
 0x120   :  { %3681 = vmatmul.mubr.msk.f32.gmra.mrb[16].mxu0 %vm148_vm1, %v5513_v53  ;;  %v1028_v53 = vld [vmem:[#allocation6 + $0x3c8] sm:$0xff] }
 0x121   :  { %738 = vmatprep.mubr.f32.mxu0 %v5317_v0 }
 0x124   :  { %3682 = vmatmul.mubr.msk.f32.gmra.mrb[18].mxu0 %vm148_vm1, %v5521_v54  ;;  %v1033_v54 = vld [vmem:[#allocation6 + $0x3f0] sm:$0xff] }
 0x125   :  { %744 = vmatprep.mubr.f32.mxu0 %v5317_v0 }
 0x128   :  { %3683 = vmatmul.mubr.msk.f32.gmra.mrb[20].mxu0 %vm148_vm1, %v5529_v55  ;;  %v4280_v55 = vpack.c.bf16 %v1033_v54, %v1028_v53 }
 0x129   :  { %750 = vmatprep.mubr.f32.mxu0 %v5317_v0 }
 0x12a   :  { %4281 = vmatprep.subr.bf16.mxu0 %v4280_v55 }
 0x12c   :  { %3684 = vmatmul.mubr.msk.f32.gmra.mrb[22].mxu0 %vm148_vm1, %v5537_v56  ;;  %v1027_v56 = vld [vmem:[#allocation6 + $0x3c0] sm:$0xff] }
 0x12d   :  { %756 = vmatprep.mubr.f32.mxu0 %v5317_v0 }
 0x130   :  { %3685 = vmatmul.mubr.msk.f32.gmra.mrb[24].mxu0 %vm148_vm1, %v5545_v57  ;;  %v1032_v57 = vld [vmem:[#allocation6 + $0x3e8] sm:$0xff] }
 0x131   :  { %762 = vmatprep.mubr.f32.mxu0 %v5317_v0 }
 0x134   :  { %3686 = vmatmul.mubr.msk.f32.gmra.mrb[26].mxu0 %vm148_vm1, %v5553_v58  ;;  %v1031_v58 = vld [vmem:[#allocation6 + $0x3e0] sm:$0xff] }
 0x135   :  { %768 = vmatprep.mubr.f32.mxu0 %v5317_v0  ;;  %v4341_v61 = vpack.c.bf16 %v1036_v60, %v1031_v58 }
 0x137   :  { %4342 = vmatpush3.bf16.msra.mxu1 %v4341_v61 }
 0x138   :  { %3687 = vmatmul.mubr.msk.f32.gmra.mrb[28].mxu0 %vm148_vm1, %v5561_v59  ;;  %v4282_v59 = vpack.c.bf16 %v1032_v57, %v1027_v56  ;;  %4343 = vmatprep.subr.bf16.mxu1 %v5318_v3 }
 0x139   :  { %774 = vmatprep.mubr.f32.mxu0 %v5317_v0 }
 0x13a   :  { %4283 = vmatpush1.bf16.msra.mxu0 %v4282_v59 }
 0x13b   :  { %4285 = vmatprep.subr.bf16.mxu0 %v4284_v1  ;;  %4345 = vmatpush3.bf16.msra.mxu1 %v4344_v8 }
 0x13c   :  { %3688 = vmatmul.mubr.msk.f32.gmra.mrb[30].mxu0 %vm148_vm1, %v550_v35  ;;  %4346 = vmatprep.subr.bf16.mxu1 %v5318_v3 }
 0x13d   :  { %1131 = vmatprep.mubr.f32.mxu0 %v5317_v0 }
 0x13e   :  { %4287 = vmatpush1.bf16.msra.mxu0 %v4286_v6  ;;  %v994_v6 = vld [vmem:[#allocation6 + $0x2b8] sm:$0xff] }
 0x13f   :  { %4289 = vmatprep.subr.bf16.mxu0 %v4288_v11  ;;  %4348 = vmatpush3.bf16.msra.mxu1 %v4347_v17  ;;  %v1000_v11 = vld [vmem:[#allocation6 + $0x2e8] sm:$0xff] }
 0x140   :  { %4349 = vmatprep.subr.bf16.mxu1 %v5318_v3  ;;  %v4300_v27 = vpack.c.bf16 %v1005_v14, %v1000_v11  ;;  %v1030_v14 = vld [vmem:[#allocation6 + $0x3d8] sm:$0xff] }
 0x142   :  { %4291 = vmatpush1.bf16.msra.mxu0 %v4290_v15  ;;  %v917_v15 = vld [vmem:[#allocation6 + $0x58] sm:$0xff] }
 0x143   :  { %4293 = vmatprep.subr.bf16.mxu0 %v4292_v20  ;;  %4351 = vmatpush3.bf16.msra.mxu1 %v4350_v26  ;;  %v4298_v20 = vpack.c.bf16 %v994_v6, %v989_v5  ;;  %v4356_v28 = vpack.c.bf16 %v922_v16, %v917_v15  ;;  %v1019_v5 = vld [vmem:[#allocation6 + $0x380] sm:$0xff]  ;;  %v1024_v6 = vld [vmem:[#allocation6 + $0x3a8] sm:$0xff] }
 0x144   :  { %4353 = vmatprep.subr.bf16.mxu1 %v4352_v32 }
 0x146   :  { %4295 = vmatpush1.bf16.msra.mxu0 %v4294_v24 }
 0x147   :  { %4297 = vmatprep.subr.bf16.mxu0 %v4296_v30  ;;  %v921_v30 = vld [vmem:[#allocation6 + $0x78] sm:$0xff] }
 0x1d3   :  { %v686_v42 = vpop.f32.mrb[0].mxu0 }
 0x1d4   :  { %v825_v43 = vadd.f32 %v5684_v39, %v686_v42  ;;  %v688_v44 = vpop.f32.mrb[1].mxu0  ;;  %v927_v42 = vld [vmem:[#allocation6 + $0xa8] sm:$0xff] }
 0x1d5   :  { %v826_v35 = vadd.f32 %v5688_v41, %v688_v44 }
 0x1d6   :  { %v857_v40 = vmax.f32 %v825_v43, 0.0  ;;  %v932_v43 = vld [vmem:[#allocation6 + $0xd0] sm:$0xff] }
 0x1d7   :  { %v858_v45 = vmax.f32 %v826_v35, 0.0  ;;  %v692_v46 = vpop.f32.mrb[2].mxu0 }
 0x1d8   :  { %v827_v47 = vadd.f32 %v5684_v39, %v692_v46  ;;  %v694_v48 = vpop.f32.mrb[3].mxu0  ;;  %v4358_v46 = vpack.c.bf16 %v921_v30, %v916_v29 }
 0x1d9   :  { %v889_v49 = vmax.f32 %v857_v40, %v858_v45  ;;  %v828_v50 = vadd.f32 %v5688_v41, %v694_v48  ;;  %v4302_v45 = vpack.c.bf16 %v1004_v23, %v999_v22  ;;  %v1014_v48 = vld [vmem:[#allocation6 + $0x358] sm:$0xff]  ;;  %v4310_v23 = vpack.c.bf16 %v1024_v6, %v1019_v5 }
 0x1da   :  { %v859_v51 = vmax.f32 %v827_v47, 0.0  ;;  %v1009_v47 = vld [vmem:[#allocation6 + $0x330] sm:$0xff] }
 0x1db   :  { %v860_v52 = vmax.f32 %v828_v50, 0.0  ;;  %v698_v53 = vpop.f32.mrb[4].mxu0 }
 0x1dc   :  { %v829_v54 = vadd.f32 %v5684_v39, %v698_v53  ;;  %v700_v55 = vpop.f32.mrb[5].mxu0  ;;  %v926_v53 = vld [vmem:[#allocation6 + $0xa0] sm:$0xff] }
 0x1dd   :  { %v890_v56 = vmax.f32 %v859_v51, %v860_v52  ;;  %v830_v57 = vadd.f32 %v5688_v41, %v700_v55  ;;  %v4304_v51 = vpack.c.bf16 %v1015_v37, %v1010_v31  ;;  %v4360_v52 = vpack.c.bf16 %v932_v43, %v927_v42  ;;  %v1020_v55 = vld [vmem:[#allocation6 + $0x388] sm:$0xff] }
 0x1de   :  { %v861_v58 = vmax.f32 %v829_v54, 0.0  ;;  %v931_v54 = vld [vmem:[#allocation6 + $0xc8] sm:$0xff] }
 0x1df   :  { %v5696_v59 = vmax.f32 %v889_v49, %v890_v56  ;;  %v862_v60 = vmax.f32 %v830_v57, 0.0  ;;  %v704_v61 = vpop.f32.mrb[6].mxu0  ;;  %v1040_v37 = vld [vmem:[#allocation6 + $0x428] sm:$0xff] }
 0x1e0   :  { %v831_v62 = vadd.f32 %v5684_v39, %v704_v61  ;;  %v706_v63 = vpop.f32.mrb[7].mxu0  ;;  %v942_v61 = vld [vmem:[#allocation6 + $0x120] sm:$0xff] }
 0x1e1   :  { %v891_v1 = vmax.f32 %v861_v58, %v862_v60  ;;  %v832_v2 = vadd.f32 %v5688_v41, %v706_v63  ;;  %v1025_v58 = vld [vmem:[#allocation6 + $0x3b0] sm:$0xff]  ;;  %v937_v60 = vld [vmem:[#allocation6 + $0xf8] sm:$0xff] }
 0x1e2   :  { %v863_v4 = vmax.f32 %v831_v62, 0.0  ;;  %v4308_v10 = vpack.c.bf16 %v1025_v58, %v1020_v55  ;;  %v4364_v11 = vpack.c.bf16 %v942_v61, %v937_v60  ;;  %v961_v58 = vld [vmem:[#allocation6 + $0x1b8] sm:$0xff] }
 0x1e3   :  { %v864_v7 = vmax.f32 %v832_v2, 0.0  ;;  %v710_v8 = vpop.f32.mrb[8].mxu0  ;;  %v4306_v2 = vpack.c.bf16 %v1014_v48, %v1009_v47  ;;  %v1050_v60 = vld [vmem:[#allocation6 + $0x478] sm:$0xff] }
 0x1e4   :  { %v833_v12 = vadd.f32 %v5684_v39, %v710_v8  ;;  %v712_v13 = vpop.f32.mrb[9].mxu0 }
 0x1e5   :  { %v892_v17 = vmax.f32 %v863_v4, %v864_v7  ;;  %v834_v18 = vadd.f32 %v5688_v41, %v712_v13  ;;  %v4362_v4 = vpack.c.bf16 %v931_v54, %v926_v53  ;;  %v941_v13 = vld [vmem:[#allocation6 + $0x118] sm:$0xff] }
 0x1e6   :  { %v865_v19 = vmax.f32 %v833_v12, 0.0  ;;  %v936_v12 = vld [vmem:[#allocation6 + $0xf0] sm:$0xff] }
 0x1e7   :  { %v5702_v24 = vmax.f32 %v891_v1, %v892_v17  ;;  %v866_v25 = vmax.f32 %v834_v18, 0.0  ;;  %v716_v26 = vpop.f32.mrb[10].mxu0  ;;  %v1035_v17 = vld [vmem:[#allocation6 + $0x400] sm:$0xff]  ;;  %v947_v18 = vld [vmem:[#allocation6 + $0x148] sm:$0xff] }
 0x1e8   :  { %v835_v32 = vadd.f32 %v5684_v39, %v716_v26  ;;  %v718_v33 = vpop.f32.mrb[11].mxu0  ;;  %v1029_v26 = vld [vmem:[#allocation6 + $0x3d0] sm:$0xff]  ;;  %v4312_v30 = vpack.c.bf16 %v1035_v17, %v1030_v14  ;;  %v971_v17 = vld [vmem:[#allocation6 + $0x208] sm:$0xff] }
 0x1e9   :  { %v893_v44 = vmax.f32 %v865_v19, %v866_v25  ;;  %v836_v35 = vadd.f32 %v5688_v41, %v718_v33  ;;  %1132 = vmatmul.mubr.f32.vlgmr.msra.gmra.mrb[32].mxu0 %v5702_v24  ;;  %3946 = vmatmul.mubr.f32.vlgmr.msra.gmra.mrb[0].mxu1 %v5702_v24  ;;  %v952_v19 = vld [vmem:[#allocation6 + $0x170] sm:$0xff]  ;;  %v4366_v25 = vpack.c.bf16 %v941_v13, %v936_v12  ;;  %v951_v33 = vld [vmem:[#allocation6 + $0x168] sm:$0xff] }
 0x1ea   :  { %v867_v40 = vmax.f32 %v835_v32, 0.0  ;;  %4299 = vmatpush1.bf16.msra.mxu0 %v4298_v20  ;;  %4355 = vmatpush1.bf16.msra.mxu1 %v4354_v21  ;;  %v4368_v31 = vpack.c.bf16 %v952_v19, %v947_v18  ;;  %v946_v32 = vld [vmem:[#allocation6 + $0x140] sm:$0xff]  ;;  %v1060_v18 = vld [vmem:[#allocation6 + $0x4c8] sm:$0xff] }
 0x1eb   :  { %v868_v49 = vmax.f32 %v836_v35, 0.0  ;;  %v722_v50 = vpop.f32.mrb[12].mxu0  ;;  %4301 = vmatprep.subr.bf16.mxu0 %v4300_v27  ;;  %4357 = vmatprep.subr.bf16.mxu1 %v4356_v28  ;;  %v1034_v27 = vld [vmem:[#allocation6 + $0x3f8] sm:$0xff] }
 0x1ec   :  { %v837_v56 = vadd.f32 %v5684_v39, %v722_v50  ;;  %v724_v57 = vpop.f32.mrb[13].mxu0  ;;  %1202 = vmatprep.mubr.f32.mxu0 %v5317_v0  ;;  %1343 = vmatprep.mubr.f32.mxu1 %v5317_v0  ;;  %v957_v35 = vld [vmem:[#allocation6 + $0x198] sm:$0xff]  ;;  %v4314_v48 = vpack.c.bf16 %v1034_v27, %v1029_v26  ;;  %v1039_v50 = vld [vmem:[#allocation6 + $0x420] sm:$0xff] }
 0x1ed   :  { %v894_v62 = vmax.f32 %v867_v40, %v868_v49  ;;  %v838_v63 = vadd.f32 %v5688_v41, %v724_v57  ;;  %v962_v40 = vld [vmem:[#allocation6 + $0x1c0] sm:$0xff]  ;;  %v4370_v49 = vpack.c.bf16 %v951_v33, %v946_v32  ;;  %v956_v57 = vld [vmem:[#allocation6 + $0x190] sm:$0xff] }
 0x1ee   :  { %v869_v1 = vmax.f32 %v837_v56, 0.0  ;;  %4303 = vmatpush1.bf16.msra.mxu0 %v4302_v45  ;;  %4359 = vmatpush1.bf16.msra.mxu1 %v4358_v46  ;;  %v4372_v56 = vpack.c.bf16 %v962_v40, %v957_v35  ;;  %v981_v35 = vld [vmem:[#allocation6 + $0x258] sm:$0xff] }
 0x1ef   :  { %v5712_v7 = vmax.f32 %v893_v44, %v894_v62  ;;  %v870_v8 = vmax.f32 %v838_v63, 0.0  ;;  %v728_v9 = vpop.f32.mrb[14].mxu0  ;;  %4305 = vmatprep.subr.bf16.mxu0 %v4304_v51  ;;  %4361 = vmatprep.subr.bf16.mxu1 %v4360_v52  ;;  %v1045_v44 = vld [vmem:[#allocation6 + $0x450] sm:$0xff]  ;;  %v1044_v51 = vld [vmem:[#allocation6 + $0x448] sm:$0xff]  ;;  %v1055_v63 = vld [vmem:[#allocation6 + $0x4a0] sm:$0xff] }
 0x1f0   :  { %v839_v15 = vadd.f32 %v5684_v39, %v728_v9  ;;  %v730_v16 = vpop.f32.mrb[15].mxu0  ;;  %v4316_v55 = vpack.c.bf16 %v1045_v44, %v1040_v37  ;;  %v4374_v9 = vpack.c.bf16 %v961_v58, %v956_v57  ;;  %v4320_v14 = vpack.c.bf16 %v1055_v63, %v1050_v60  ;;  %v976_v44 = vld [vmem:[#allocation6 + $0x230] sm:$0xff]  ;;  %v913_v58 = vld [vmem:[#allocation6 + $0x38] sm:$0xff]  ;;  %v1496_v60 = vld [vmem:[#allocation6 + $0x520] sm:$0xff] }
 0x1f1   :  { %v895_v20 = vmax.f32 %v869_v1, %v870_v8  ;;  %v840_v21 = vadd.f32 %v5688_v41, %v730_v16  ;;  %v967_v1 = vld [vmem:[#allocation6 + $0x1e8] sm:$0xff]  ;;  %v4318_v8 = vpack.c.bf16 %v1044_v51, %v1039_v50  ;;  %v966_v16 = vld [vmem:[#allocation6 + $0x1e0] sm:$0xff] }
 0x1f2   :  { %v871_v22 = vmax.f32 %v839_v15, 0.0  ;;  %4307 = vmatpush1.bf16.msra.mxu0 %v4306_v2  ;;  %4363 = vmatpush1.bf16.msra.mxu1 %v4362_v4  ;;  %v972_v2 = vld [vmem:[#allocation6 + $0x210] sm:$0xff] }
 0x1f3   :  { %v872_v28 = vmax.f32 %v840_v21, 0.0  ;;  %v734_v29 = vpop.f32.mrb[16].mxu0  ;;  %4309 = vmatprep.subr.bf16.mxu0 %v4308_v10  ;;  %4365 = vmatprep.subr.bf16.mxu1 %v4364_v11  ;;  %v1049_v10 = vld [vmem:[#allocation6 + $0x470] sm:$0xff]  ;;  %v1054_v11 = vld [vmem:[#allocation6 + $0x498] sm:$0xff]  ;;  %v4376_v15 = vpack.c.bf16 %v972_v2, %v967_v1  ;;  %v919_v1 = vld [vmem:[#allocation6 + $0x68] sm:$0xff] }
 0x1f4   :  { %v841_v42 = vadd.f32 %v5684_v39, %v734_v29  ;;  %v736_v43 = vpop.f32.mrb[17].mxu0  ;;  %v1065_v21 = vld [vmem:[#allocation6 + $0x4f0] sm:$0xff]  ;;  %v4378_v29 = vpack.c.bf16 %v971_v17, %v966_v16  ;;  %v1511_v17 = vld [vmem:[#allocation6 + $0x598] sm:$0xff] }
 0x1f5   :  { %v896_v45 = vmax.f32 %v871_v22, %v872_v28  ;;  %v842_v46 = vadd.f32 %v5688_v41, %v736_v43  ;;  %v977_v22 = vld [vmem:[#allocation6 + $0x238] sm:$0xff]  ;;  %v4322_v28 = vpack.c.bf16 %v1054_v11, %v1049_v10  ;;  %v4324_v37 = vpack.c.bf16 %v1065_v21, %v1060_v18  ;;  %v1064_v43 = vld [vmem:[#allocation6 + $0x4e8] sm:$0xff]  ;;  %v924_v2 = vld [vmem:[#allocation6 + $0x90] sm:$0xff] }
 0x1f6   :  { %v873_v47 = vmax.f32 %v841_v42, 0.0  ;;  %4311 = vmatpush1.bf16.msra.mxu0 %v4310_v23  ;;  %4367 = vmatpush1.bf16.msra.mxu1 %v4366_v25  ;;  %v982_v23 = vld [vmem:[#allocation6 + $0x260] sm:$0xff]  ;;  %v1506_v16 = vld [vmem:[#allocation6 + $0x570] sm:$0xff] }
 0x1f7   :  { %v5718_v52 = vmax.f32 %v895_v20, %v896_v45  ;;  %v874_v53 = vmax.f32 %v842_v46, 0.0  ;;  %v740_v54 = vpop.f32.mrb[18].mxu0  ;;  %4313 = vmatprep.subr.bf16.mxu0 %v4312_v30  ;;  %4369 = vmatprep.subr.bf16.mxu1 %v4368_v31  ;;  %v1059_v30 = vld [vmem:[#allocation6 + $0x4c0] sm:$0xff]  ;;  %v4380_v42 = vpack.c.bf16 %v982_v23, %v977_v22  ;;  %v909_v46 = vld [vmem:[#allocation6 + $0x18] sm:$0xff] }
 0x1f8   :  { %v843_v61 = vadd.f32 %v5684_v39, %v740_v54  ;;  %v742_v62 = vpop.f32.mrb[19].mxu0  ;;  %v4326_v51 = vpack.c.bf16 %v1064_v43, %v1059_v30  ;;  %v908_v54 = vld [vmem:[#allocation6 + $0x10] sm:$0xff]  ;;  %v918_v10 = vld [vmem:[#allocation6 + $0x60] sm:$0xff] }
 0x1f9   :  { %v897_v4 = vmax.f32 %v873_v47, %v874_v53  ;;  %v844_v5 = vadd.f32 %v5688_v41, %v742_v62  ;;  %v914_v47 = vld [vmem:[#allocation6 + $0x40] sm:$0xff]  ;;  %v4382_v53 = vpack.c.bf16 %v981_v35, %v976_v44  ;;  %v939_v44 = vld [vmem:[#allocation6 + $0x108] sm:$0xff]  ;;  %v944_v35 = vld [vmem:[#allocation6 + $0x130] sm:$0xff] }
 0x1fa   :  { %v875_v6 = vmax.f32 %v843_v61, 0.0  ;;  %4315 = vmatpush1.bf16.msra.mxu0 %v4314_v48  ;;  %4371 = vmatpush1.bf16.msra.mxu1 %v4370_v49  ;;  %v4384_v57 = vpack.c.bf16 %v914_v47, %v909_v46  ;;  %v1501_v61 = vld [vmem:[#allocation6 + $0x548] sm:$0xff]  ;;  %v934_v21 = vld [vmem:[#allocation6 + $0xe0] sm:$0xff] }
 0x1fb   :  { %v876_v12 = vmax.f32 %v844_v5, 0.0  ;;  %v746_v13 = vpop.f32.mrb[20].mxu0  ;;  %4317 = vmatprep.subr.bf16.mxu0 %v4316_v55  ;;  %4373 = vmatprep.subr.bf16.mxu1 %v4372_v56 }
 0x1fc   :  { %v845_v19 = vadd.f32 %v5684_v39, %v746_v13  ;;  %v748_v20 = vpop.f32.mrb[21].mxu0 }
 0x1fd   :  { %v898_v25 = vmax.f32 %v875_v6, %v876_v12  ;;  %v846_v26 = vadd.f32 %v5688_v41, %v748_v20  ;;  %v929_v20 = vld [vmem:[#allocation6 + $0xb8] sm:$0xff] }
 0x1fe   :  { %v877_v27 = vmax.f32 %v845_v19, 0.0  ;;  %4319 = vmatpush1.bf16.msra.mxu0 %v4318_v8  ;;  %4375 = vmatpush1.bf16.msra.mxu1 %v4374_v9  ;;  %v4386_v8 = vpack.c.bf16 %v913_v58, %v908_v54  ;;  %v4505_v9 = vpack.c.bf16 %v1501_v61, %v1496_v60  ;;  %v4396_v54 = vpack.c.bf16 %v944_v35, %v939_v44  ;;  %v949_v61 = vld [vmem:[#allocation6 + $0x158] sm:$0xff]  ;;  %v978_v44 = vld [vmem:[#allocation6 + $0x240] sm:$0xff] }
 0x1ff   :  { %v5724_v31 = vmax.f32 %v897_v4, %v898_v25  ;;  %v878_v32 = vmax.f32 %v846_v26, 0.0  ;;  %v752_v33 = vpop.f32.mrb[22].mxu0  ;;  %4321 = vmatprep.subr.bf16.mxu0 %v4320_v14  ;;  %4377 = vmatprep.subr.bf16.mxu1 %v4376_v15  ;;  %v4388_v14 = vpack.c.bf16 %v924_v2, %v919_v1  ;;  %v923_v15 = vld [vmem:[#allocation6 + $0x88] sm:$0xff] }
 0x200   :  { %v847_v40 = vadd.f32 %v5684_v39, %v752_v33  ;;  %v754_v45 = vpop.f32.mrb[23].mxu0  ;;  %v4390_v26 = vpack.c.bf16 %v923_v15, %v918_v10  ;;  %v933_v33 = vld [vmem:[#allocation6 + $0xd8] sm:$0xff] }
 0x201   :  { %v899_v48 = vmax.f32 %v877_v27, %v878_v32  ;;  %v848_v49 = vadd.f32 %v5688_v41, %v754_v45  ;;  %v4508_v27 = vpack.c.bf16 %v1511_v17, %v1506_v16  ;;  %v4392_v32 = vpack.c.bf16 %v934_v21, %v929_v20  ;;  %v953_v10 = vld [vmem:[#allocation6 + $0x178] sm:$0xff]  ;;  %v958_v17 = vld [vmem:[#allocation6 + $0x1a0] sm:$0xff]  ;;  %v963_v20 = vld [vmem:[#allocation6 + $0x1c8] sm:$0xff] }
 0x202   :  { %v879_v50 = vmax.f32 %v847_v40, 0.0  ;;  %4323 = vmatpush1.bf16.msra.mxu0 %v4322_v28  ;;  %4379 = vmatpush1.bf16.msra.mxu1 %v4378_v29  ;;  %v928_v28 = vld [vmem:[#allocation6 + $0xb0] sm:$0xff] }
 0x203   :  { %v880_v55 = vmax.f32 %v848_v49, 0.0  ;;  %v758_v56 = vpop.f32.mrb[24].mxu0  ;;  %4325 = vmatprep.subr.bf16.mxu0 %v4324_v37  ;;  %4381 = vmatprep.subr.bf16.mxu1 %v4380_v42  ;;  %v1516_v37 = vld [vmem:[#allocation6 + $0x5c0] sm:$0xff]  ;;  %v1521_v42 = vld [vmem:[#allocation6 + $0x5e8] sm:$0xff]  ;;  %v4394_v47 = vpack.c.bf16 %v933_v33, %v928_v28  ;;  %v1546_v21 = vld [vmem:[#allocation6 + $0x6b0] sm:$0xff] }
 0x204   :  { %v849_v62 = vadd.f32 %v5684_v39, %v758_v56  ;;  %v760_v63 = vpop.f32.mrb[25].mxu0  ;;  %v938_v49 = vld [vmem:[#allocation6 + $0x100] sm:$0xff]  ;;  %v1526_v56 = vld [vmem:[#allocation6 + $0x610] sm:$0xff]  ;;  %v1561_v33 = vld [vmem:[#allocation6 + $0x728] sm:$0xff] }
 0x205   :  { %v900_v4 = vmax.f32 %v879_v50, %v880_v55  ;;  %v850_v5 = vadd.f32 %v5688_v41, %v760_v63  ;;  %v943_v55 = vld [vmem:[#allocation6 + $0x128] sm:$0xff]  ;;  %v968_v28 = vld [vmem:[#allocation6 + $0x1f0] sm:$0xff] }
 0x206   :  { %v881_v6 = vmax.f32 %v849_v62, 0.0  ;;  %4327 = vmatpush1.bf16.msra.mxu0 %v4326_v51  ;;  %4383 = vmatpush1.bf16.msra.mxu1 %v4382_v53  ;;  %v954_v62 = vld [vmem:[#allocation6 + $0x180] sm:$0xff] }
 0x207   :  { %v5730_v11 = vmax.f32 %v899_v48, %v900_v4  ;;  %v882_v12 = vmax.f32 %v850_v5, 0.0  ;;  %v764_v13 = vpop.f32.mrb[26].mxu0  ;;  %4385 = vmatprep.subr.bf16.mxu1 %v4384_v57  ;;  %4504 = vmatprep.subr.bf16.mxu0 %v5318_v3  ;;  %v4511_v48 = vpack.c.bf16 %v1521_v42, %v1516_v37  ;;  %v1531_v57 = vld [vmem:[#allocation6 + $0x638] sm:$0xff]  ;;  %v4398_v4 = vpack.c.bf16 %v943_v55, %v938_v49  ;;  %v979_v37 = vld [vmem:[#allocation6 + $0x248] sm:$0xff]  ;;  %v984_v42 = vld [vmem:[#allocation6 + $0x270] sm:$0xff] }
 0x208   :  { %v851_v18 = vadd.f32 %v5684_v39, %v764_v13  ;;  %v766_v19 = vpop.f32.mrb[27].mxu0  ;;  %v4514_v5 = vpack.c.bf16 %v1531_v57, %v1526_v56  ;;  %v959_v13 = vld [vmem:[#allocation6 + $0x1a8] sm:$0xff]  ;;  %v4412_v35 = vpack.c.bf16 %v984_v42, %v979_v37  ;;  %v910_v49 = vld [vmem:[#allocation6 + $0x20] sm:$0xff]  ;;  %v920_v57 = vld [vmem:[#allocation6 + $0x70] sm:$0xff] }
 0x209   :  { %v901_v22 = vmax.f32 %v881_v6, %v882_v12  ;;  %v852_v23 = vadd.f32 %v5688_v41, %v766_v19  ;;  %1203 = vmatmul.mubr.f32.vlgmr.msra.gmra.mrb[34].mxu0 %v5702_v24  ;;  %1344 = vmatmul.mubr.f32.vlgmr.msra.gmra.mrb[2].mxu1 %v5696_v59  ;;  %v948_v6 = vld [vmem:[#allocation6 + $0x150] sm:$0xff]  ;;  %v1536_v12 = vld [vmem:[#allocation6 + $0x660] sm:$0xff] }
 0x20a   :  { %v883_v25 = vmax.f32 %v851_v18, 0.0  ;;  %4387 = vmatpush1.bf16.msra.mxu1 %v4386_v8  ;;  %4506 = vmatpush3.bf16.msra.mxu0 %v4505_v9  ;;  %v4400_v9 = vpack.c.bf16 %v954_v62, %v949_v61  ;;  %v1809_v61 = vld [vmem:[#allocation6 + $0x818] sm:$0xff]  ;;  %v980_v42 = vld [vmem:[#allocation6 + $0x250] sm:$0xff] }
 0x20b   :  { %v884_v29 = vmax.f32 %v852_v23, 0.0  ;;  %v770_v30 = vpop.f32.mrb[28].mxu0  ;;  %4389 = vmatprep.subr.bf16.mxu1 %v4388_v14  ;;  %4507 = vmatprep.subr.bf16.mxu0 %v5318_v3  ;;  %v964_v14 = vld [vmem:[#allocation6 + $0x1d0] sm:$0xff]  ;;  %v969_v23 = vld [vmem:[#allocation6 + $0x1f8] sm:$0xff] }
 0x20c   :  { %v853_v43 = vadd.f32 %v5684_v39, %v770_v30  ;;  %v772_v24 = vpop.f32.mrb[29].mxu0  ;;  %1414 = vmatprep.mubr.f32.mxu1 %v5317_v0  ;;  %4015 = vmatprep.mubr.msk.f32.mxu0 %vm5319_vm2, %v5317_v0  ;;  %v4404_v19 = vpack.c.bf16 %v964_v14, %v959_v13  ;;  %v973_v30 = vld [vmem:[#allocation6 + $0x218] sm:$0xff] }
 0x20d   :  { %v902_v40 = vmax.f32 %v883_v25, %v884_v29  ;;  %v854_v45 = vadd.f32 %v5688_v41, %v772_v24  ;;  %v974_v25 = vld [vmem:[#allocation6 + $0x220] sm:$0xff] }
 0x20e   :  { %v885_v46 = vmax.f32 %v853_v43, 0.0  ;;  %4391 = vmatpush1.bf16.msra.mxu1 %v4390_v26  ;;  %4509 = vmatpush3.bf16.msra.mxu0 %v4508_v27  ;;  %v4406_v26 = vpack.c.bf16 %v963_v20, %v958_v17  ;;  %v4408_v29 = vpack.c.bf16 %v974_v25, %v969_v23  ;;  %v4410_v43 = vpack.c.bf16 %v973_v30, %v968_v28  ;;  %v1839_v17 = vld [vmem:[#allocation6 + $0x908] sm:$0xff]  ;;  %v1844_v23 = vld [vmem:[#allocation6 + $0x930] sm:$0xff]  ;;  %v1849_v25 = vld [vmem:[#allocation6 + $0x958] sm:$0xff] }
 0x20f   :  { %v5743_v50 = vmax.f32 %v901_v22, %v902_v40  ;;  %v886_v51 = vmax.f32 %v854_v45, 0.0  ;;  %v776_v53 = vpop.f32.mrb[30].mxu0  ;;  %4393 = vmatprep.subr.bf16.mxu1 %v4392_v32  ;;  %4510 = vmatprep.subr.bf16.mxu0 %v5318_v3  ;;  %v1551_v22 = vld [vmem:[#allocation6 + $0x6d8] sm:$0xff]  ;;  %v1556_v32 = vld [vmem:[#allocation6 + $0x700] sm:$0xff]  ;;  %v983_v40 = vld [vmem:[#allocation6 + $0x268] sm:$0xff] }
 0x210   :  { %v855_v58 = vadd.f32 %v5684_v39, %v776_v53  ;;  %v778_v60 = vpop.f32.mrb[31].mxu0  ;;  %v1541_v39 = vld [vmem:[#allocation6 + $0x688] sm:$0xff]  ;;  %v4520_v27 = vpack.c.bf16 %v1551_v22, %v1546_v21  ;;  %v4523_v24 = vpack.c.bf16 %v1561_v33, %v1556_v32  ;;  %v1566_v45 = vld [vmem:[#allocation6 + $0x750] sm:$0xff]  ;;  %v1794_v53 = vld [vmem:[#allocation6 + $0x7a0] sm:$0xff] }
 0x211   :  { %v903_v63 = vmax.f32 %v885_v46, %v886_v51  ;;  %v856_v1 = vadd.f32 %v5688_v41, %v778_v60  ;;  %v4402_v41 = vpack.c.bf16 %v953_v10, %v948_v6  ;;  %v4517_v16 = vpack.c.bf16 %v1541_v39, %v1536_v12  ;;  %v1571_v46 = vld [vmem:[#allocation6 + $0x778] sm:$0xff]  ;;  %v915_v51 = vld [vmem:[#allocation6 + $0x48] sm:$0xff]  ;;  %v1804_v60 = vld [vmem:[#allocation6 + $0x7f0] sm:$0xff] }
 0x212   :  { %v887_v2 = vmax.f32 %v855_v58, 0.0  ;;  %4395 = vmatpush1.bf16.msra.mxu1 %v4394_v47  ;;  %4512 = vmatpush3.bf16.msra.mxu0 %v4511_v48  ;;  %v4414_v47 = vpack.c.bf16 %v983_v40, %v978_v44  ;;  %v4526_v48 = vpack.c.bf16 %v1571_v46, %v1566_v45  ;;  %v4417_v55 = vpack.c.bf16 %v915_v51, %v910_v49  ;;  %v925_v58 = vld [vmem:[#allocation6 + $0x98] sm:$0xff]  ;;  %v1824_v12 = vld [vmem:[#allocation6 + $0x890] sm:$0xff]  ;;  %v970_v28 = vld [vmem:[#allocation6 + $0x200] sm:$0xff] }
 0x213   :  { %v888_v8 = vmax.f32 %v856_v1, 0.0  ;;  %4397 = vmatprep.subr.bf16.mxu1 %v4396_v54  ;;  %4513 = vmatprep.subr.bf16.mxu0 %v5318_v3  ;;  %v1799_v54 = vld [vmem:[#allocation6 + $0x7c8] sm:$0xff]  ;;  %v4420_v62 = vpack.c.bf16 %v925_v58, %v920_v57  ;;  %v930_v1 = vld [vmem:[#allocation6 + $0xc0] sm:$0xff]  ;;  %v945_v10 = vld [vmem:[#allocation6 + $0x138] sm:$0xff] }
 0x214   :  { %v4593_v56 = vpack.c.bf16 %v1799_v54, %v1794_v53  ;;  %v1829_v39 = vld [vmem:[#allocation6 + $0x8b8] sm:$0xff]  ;;  %v960_v21 = vld [vmem:[#allocation6 + $0x1b0] sm:$0xff]  ;;  %v1854_v30 = vld [vmem:[#allocation6 + $0x980] sm:$0xff] }
 0x215   :  { %v904_v15 = vmax.f32 %v887_v2, %v888_v8  ;;  %v935_v2 = vld [vmem:[#allocation6 + $0xe8] sm:$0xff]  ;;  %v4602_v14 = vpack.c.bf16 %v1829_v39, %v1824_v12  ;;  %v965_v22 = vld [vmem:[#allocation6 + $0x1d8] sm:$0xff]  ;;  %v1498_v40 = vld [vmem:[#allocation6 + $0x530] sm:$0xff] }
 0x216   :  { %4399 = vmatpush1.bf16.msra.mxu1 %v4398_v4  ;;  %4515 = vmatpush3.bf16.msra.mxu0 %v4514_v5  ;;  %v1814_v4 = vld [vmem:[#allocation6 + $0x840] sm:$0xff]  ;;  %v1819_v5 = vld [vmem:[#allocation6 + $0x868] sm:$0xff]  ;;  %v4423_v6 = vpack.c.bf16 %v935_v2, %v930_v1  ;;  %v1869_v44 = vld [vmem:[#allocation6 + $0x9f8] sm:$0xff] }
 0x217   :  { %v5749_v18 = vmax.f32 %v903_v63, %v904_v15  ;;  %4401 = vmatprep.subr.bf16.mxu1 %v4400_v9  ;;  %4516 = vmatprep.subr.bf16.mxu0 %v5318_v3  ;;  %v4596_v63 = vpack.c.bf16 %v1809_v61, %v1804_v60  ;;  %v4599_v8 = vpack.c.bf16 %v1819_v5, %v1814_v4  ;;  %v940_v9 = vld [vmem:[#allocation6 + $0x110] sm:$0xff]  ;;  %v950_v15 = vld [vmem:[#allocation6 + $0x160] sm:$0xff]  ;;  %v1859_v32 = vld [vmem:[#allocation6 + $0x9a8] sm:$0xff] }
 0x218   :  { %v4426_v13 = vpack.c.bf16 %v945_v10, %v940_v9  ;;  %v4611_v37 = vpack.c.bf16 %v1859_v32, %v1854_v30  ;;  %v1497_v49 = vld [vmem:[#allocation6 + $0x528] sm:$0xff]  ;;  %v2092_v51 = vld [vmem:[#allocation6 + $0xa20] sm:$0xff]  ;;  %v1503_v54 = vld [vmem:[#allocation6 + $0x558] sm:$0xff] }
 0x219   :  { %v2097_v53 = vld [vmem:[#allocation6 + $0xa48] sm:$0xff]  ;;  %v1502_v58 = vld [vmem:[#allocation6 + $0x550] sm:$0xff]  ;;  %v1507_v61 = vld [vmem:[#allocation6 + $0x578] sm:$0xff] }
 0x21a   :  { %4403 = vmatpush1.bf16.msra.mxu1 %v4402_v41  ;;  %4518 = vmatpush3.bf16.msra.mxu0 %v4517_v16  ;;  %v955_v41 = vld [vmem:[#allocation6 + $0x188] sm:$0xff]  ;;  %v1834_v16 = vld [vmem:[#allocation6 + $0x8e0] sm:$0xff]  ;;  %v4681_v57 = vpack.c.bf16 %v2097_v53, %v2092_v51  ;;  %v1518_v2 = vld [vmem:[#allocation6 + $0x5d0] sm:$0xff]  ;;  %v4446_v4 = vpack.c.bf16 %v1507_v61, %v1502_v58 }
 0x21b   :  { %4405 = vmatprep.subr.bf16.mxu1 %v4404_v19  ;;  %4519 = vmatprep.subr.bf16.mxu0 %v5318_v3  ;;  %v4429_v19 = vpack.c.bf16 %v955_v41, %v950_v15  ;;  %v4605_v20 = vpack.c.bf16 %v1839_v17, %v1834_v16  ;;  %v1513_v1 = vld [vmem:[#allocation6 + $0x5a8] sm:$0xff]  ;;  %v2112_v10 = vld [vmem:[#allocation6 + $0xac0] sm:$0xff]  ;;  %v1523_v39 = vld [vmem:[#allocation6 + $0x5f8] sm:$0xff] }
 0x21c   :  { %v1517_v9 = vld [vmem:[#allocation6 + $0x5c8] sm:$0xff]  ;;  %v1522_v15 = vld [vmem:[#allocation6 + $0x5f0] sm:$0xff]  ;;  %v1527_v16 = vld [vmem:[#allocation6 + $0x618] sm:$0xff] }
 0x21d   :  { %v2117_v12 = vld [vmem:[#allocation6 + $0xae8] sm:$0xff]  ;;  %v2122_v17 = vld [vmem:[#allocation6 + $0xb10] sm:$0xff]  ;;  %v1543_v30 = vld [vmem:[#allocation6 + $0x698] sm:$0xff] }
 0x21e   :  { %4407 = vmatpush1.bf16.msra.mxu1 %v4406_v26  ;;  %4521 = vmatpush3.bf16.msra.mxu0 %v4520_v27  ;;  %v4432_v26 = vpack.c.bf16 %v965_v22, %v960_v21  ;;  %v4608_v27 = vpack.c.bf16 %v1849_v25, %v1844_v23  ;;  %v1538_v21 = vld [vmem:[#allocation6 + $0x670] sm:$0xff]  ;;  %v4454_v22 = vpack.c.bf16 %v1527_v16, %v1522_v15  ;;  %v1532_v25 = vld [vmem:[#allocation6 + $0x640] sm:$0xff]  ;;  %v1557_v51 = vld [vmem:[#allocation6 + $0x708] sm:$0xff] }
 0x21f   :  { %4409 = vmatprep.subr.bf16.mxu1 %v4408_v29  ;;  %4522 = vmatprep.subr.bf16.mxu0 %v5318_v3  ;;  %v975_v29 = vld [vmem:[#allocation6 + $0x228] sm:$0xff]  ;;  %v1548_v32 = vld [vmem:[#allocation6 + $0x6c0] sm:$0xff] }
 0x220   :  { %v4435_v33 = vpack.c.bf16 %v975_v29, %v970_v28  ;;  %v2132_v28 = vld [vmem:[#allocation6 + $0xb60] sm:$0xff]  ;;  %v2137_v29 = vld [vmem:[#allocation6 + $0xb88] sm:$0xff] }
 0x221   :  { %v2152_v53 = vld [vmem:[#allocation6 + $0xc00] sm:$0xff] }
 0x222   :  { %4411 = vmatpush1.bf16.msra.mxu1 %v4410_v43  ;;  %4524 = vmatpush3.bf16.msra.mxu0 %v4523_v24  ;;  %v985_v43 = vld [vmem:[#allocation6 + $0x278] sm:$0xff]  ;;  %v1864_v24 = vld [vmem:[#allocation6 + $0x9d0] sm:$0xff] }
 0x223   :  { %4413 = vmatprep.subr.bf16.mxu1 %v4412_v35  ;;  %4525 = vmatprep.subr.bf16.mxu0 %v5318_v3  ;;  %v1493_v35 = vld [vmem:[#allocation6 + $0x508] sm:$0xff]  ;;  %v4438_v45 = vpack.c.bf16 %v985_v43, %v980_v42  ;;  %v4614_v46 = vpack.c.bf16 %v1869_v44, %v1864_v24  ;;  %v1542_v42 = vld [vmem:[#allocation6 + $0x690] sm:$0xff]  ;;  %v4460_v43 = vpack.c.bf16 %v1548_v32, %v1543_v30  ;;  %v1547_v24 = vld [vmem:[#allocation6 + $0x6b8] sm:$0xff] }
 0x224   :  { %v2142_v44 = vld [vmem:[#allocation6 + $0xbb0] sm:$0xff]  ;;  %v2415_v30 = vld [vmem:[#allocation6 + $0xd68] sm:$0xff] }
 0x225   :  { %v1525_v32 = vld [vmem:[#allocation6 + $0x608] sm:$0xff] }
 0x226   :  { %4415 = vmatpush1.bf16.msra.mxu1 %v4414_v47  ;;  %4527 = vmatpush3.bf16.msra.mxu0 %v4526_v48  ;;  %v1492_v47 = vld [vmem:[#allocation6 + $0x500] sm:$0xff]  ;;  %v4440_v48 = vpack.c.bf16 %v1498_v40, %v1493_v35  ;;  %v2147_v35 = vld [vmem:[#allocation6 + $0xbd8] sm:$0xff]  ;;  %v1553_v40 = vld [vmem:[#allocation6 + $0x6e8] sm:$0xff] }
 0x227   :  { %4416 = vmatprep.subr.bf16.mxu1 %v5318_v3  ;;  %4592 = vmatprep.subr.bf16.mxu0 %v5318_v3 }
 0x229   :  { %1415 = vmatmul.mubr.f32.vlgmr.msra.gmra.mrb[4].mxu1 %v5696_v59  ;;  %4016 = vmatmul.mubr.f32.vlgmr.msra.gmra.mrb[36].mxu0 %v5712_v7 }
 0x22a   :  { %4418 = vmatpush3.bf16.msra.mxu1 %v4417_v55  ;;  %4594 = vmatpush3.bf16.msra.mxu0 %v4593_v56  ;;  %v1508_v55 = vld [vmem:[#allocation6 + $0x580] sm:$0xff]  ;;  %v4442_v56 = vpack.c.bf16 %v1497_v49, %v1492_v47  ;;  %v4696_v47 = vpack.c.bf16 %v2147_v35, %v2142_v44  ;;  %v1529_v44 = vld [vmem:[#allocation6 + $0x628] sm:$0xff]  ;;  %v2420_v35 = vld [vmem:[#allocation6 + $0xd90] sm:$0xff] }
 0x22b   :  { %4419 = vmatprep.subr.bf16.mxu1 %v5318_v3  ;;  %4595 = vmatprep.subr.bf16.mxu0 %v5318_v3  ;;  %v4444_v60 = vpack.c.bf16 %v1508_v55, %v1503_v54  ;;  %v2157_v54 = vld [vmem:[#allocation6 + $0xc28] sm:$0xff]  ;;  %v1563_v55 = vld [vmem:[#allocation6 + $0x738] sm:$0xff] }
 0x22c   :  { %3980 = vmatprep.mubr.msk.f32.mxu1 %vm5319_vm2, %v5317_v0  ;;  %4050 = vmatprep.mubr.msk.f32.mxu0 %vm5319_vm2, %v5317_v0  ;;  %v4699_v58 = vpack.c.bf16 %v2157_v54, %v2152_v53  ;;  %v1539_v53 = vld [vmem:[#allocation6 + $0x678] sm:$0xff]  ;;  %v2430_v54 = vld [vmem:[#allocation6 + $0xde0] sm:$0xff] }
 0x22e   :  { %4421 = vmatpush3.bf16.msra.mxu1 %v4420_v62  ;;  %4597 = vmatpush3.bf16.msra.mxu0 %v4596_v63  ;;  %v2102_v62 = vld [vmem:[#allocation6 + $0xa70] sm:$0xff]  ;;  %v2107_v63 = vld [vmem:[#allocation6 + $0xa98] sm:$0xff] }
 0x22f   :  { %4422 = vmatprep.subr.bf16.mxu1 %v5318_v3  ;;  %4598 = vmatprep.subr.bf16.mxu0 %v5318_v3  ;;  %v4684_v5 = vpack.c.bf16 %v2107_v63, %v2102_v62  ;;  %v1567_v62 = vld [vmem:[#allocation6 + $0x758] sm:$0xff]  ;;  %v2162_v63 = vld [vmem:[#allocation6 + $0xc50] sm:$0xff] }
 0x232   :  { %4424 = vmatpush3.bf16.msra.mxu1 %v4423_v6  ;;  %4600 = vmatpush3.bf16.msra.mxu0 %v4599_v8  ;;  %v1512_v6 = vld [vmem:[#allocation6 + $0x5a0] sm:$0xff]  ;;  %v4448_v8 = vpack.c.bf16 %v1518_v2, %v1513_v1  ;;  %v2167_v1 = vld [vmem:[#allocation6 + $0xc78] sm:$0xff] }
 0x233   :  { %4425 = vmatprep.subr.bf16.mxu1 %v5318_v3  ;;  %4601 = vmatprep.subr.bf16.mxu0 %v5318_v3  ;;  %v1495_v2 = vld [vmem:[#allocation6 + $0x518] sm:$0xff] }
 0x236   :  { %4427 = vmatpush3.bf16.msra.mxu1 %v4426_v13  ;;  %4603 = vmatpush3.bf16.msra.mxu0 %v4602_v14  ;;  %v1528_v13 = vld [vmem:[#allocation6 + $0x620] sm:$0xff]  ;;  %v4687_v14 = vpack.c.bf16 %v2117_v12, %v2112_v10  ;;  %v1499_v10 = vld [vmem:[#allocation6 + $0x538] sm:$0xff] }
 0x237   :  { %4428 = vmatprep.subr.bf16.mxu1 %v5318_v3  ;;  %4604 = vmatprep.subr.bf16.mxu0 %v5318_v3  ;;  %v4452_v41 = vpack.c.bf16 %v1528_v13, %v1523_v39  ;;  %v2390_v12 = vld [vmem:[#allocation6 + $0xca0] sm:$0xff]  ;;  %v2395_v39 = vld [vmem:[#allocation6 + $0xcc8] sm:$0xff] }
 0x238   :  { %v1505_v13 = vld [vmem:[#allocation6 + $0x568] sm:$0xff]  ;;  %v4769_v15 = vpack.c.bf16 %v2395_v39, %v2390_v12  ;;  %v1559_v12 = vld [vmem:[#allocation6 + $0x718] sm:$0xff]  ;;  %v2450_v39 = vld [vmem:[#allocation6 + $0xe80] sm:$0xff] }
 0x23a   :  { %4430 = vmatpush3.bf16.msra.mxu1 %v4429_v19  ;;  %4606 = vmatpush3.bf16.msra.mxu0 %v4605_v20  ;;  %v2127_v19 = vld [vmem:[#allocation6 + $0xb38] sm:$0xff]  ;;  %v1533_v20 = vld [vmem:[#allocation6 + $0x648] sm:$0xff] }
 0x23b   :  { %4431 = vmatprep.subr.bf16.mxu1 %v5318_v3  ;;  %4607 = vmatprep.subr.bf16.mxu0 %v5318_v3  ;;  %v4690_v23 = vpack.c.bf16 %v2127_v19, %v2122_v17  ;;  %v1509_v17 = vld [vmem:[#allocation6 + $0x588] sm:$0xff]  ;;  %v2400_v19 = vld [vmem:[#allocation6 + $0xcf0] sm:$0xff] }
 0x23e   :  { %4433 = vmatpush3.bf16.msra.mxu1 %v4432_v26  ;;  %4609 = vmatpush3.bf16.msra.mxu0 %v4608_v27  ;;  %v4456_v26 = vpack.c.bf16 %v1538_v21, %v1533_v20  ;;  %v1537_v27 = vld [vmem:[#allocation6 + $0x668] sm:$0xff]  ;;  %v2405_v20 = vld [vmem:[#allocation6 + $0xd18] sm:$0xff] }
 0x23f   :  { %4434 = vmatprep.subr.bf16.mxu1 %v5318_v3  ;;  %4610 = vmatprep.subr.bf16.mxu0 %v5318_v3  ;;  %v1515_v21 = vld [vmem:[#allocation6 + $0x5b8] sm:$0xff] }
 0x242   :  { %4436 = vmatpush3.bf16.msra.mxu1 %v4435_v33  ;;  %4612 = vmatpush3.bf16.msra.mxu0 %v4611_v37  ;;  %v4458_v33 = vpack.c.bf16 %v1537_v27, %v1532_v25  ;;  %v4693_v37 = vpack.c.bf16 %v2137_v29, %v2132_v28  ;;  %v4772_v25 = vpack.c.bf16 %v2405_v20, %v2400_v19  ;;  %v1519_v28 = vld [vmem:[#allocation6 + $0x5d8] sm:$0xff]  ;;  %v2410_v29 = vld [vmem:[#allocation6 + $0xd40] sm:$0xff]  ;;  %v1569_v19 = vld [vmem:[#allocation6 + $0x768] sm:$0xff] }
 0x243   :  { %4437 = vmatprep.subr.bf16.mxu1 %v5318_v3  ;;  %4613 = vmatprep.subr.bf16.mxu0 %v5318_v3  ;;  %v2460_v20 = vld [vmem:[#allocation6 + $0xed0] sm:$0xff] }
 0x246   :  { %4439 = vmatpush3.bf16.msra.mxu1 %v4438_v45  ;;  %4615 = vmatpush3.bf16.msra.mxu0 %v4614_v46  ;;  %v1558_v45 = vld [vmem:[#allocation6 + $0x710] sm:$0xff]  ;;  %v4462_v46 = vpack.c.bf16 %v1547_v24, %v1542_v42  ;;  %v4775_v42 = vpack.c.bf16 %v2415_v30, %v2410_v29  ;;  %v1795_v29 = vld [vmem:[#allocation6 + $0x7a8] sm:$0xff]  ;;  %v2688_v30 = vld [vmem:[#allocation6 + $0xf20] sm:$0xff] }
 0x247   :  { %4441 = vmatprep.subr.bf16.mxu1 %v4440_v48  ;;  %4680 = vmatprep.subr.bf16.mxu0 %v5318_v3  ;;  %v1552_v48 = vld [vmem:[#allocation6 + $0x6e0] sm:$0xff]  ;;  %v4464_v49 = vpack.c.bf16 %v1558_v45, %v1553_v40  ;;  %v2425_v40 = vld [vmem:[#allocation6 + $0xdb8] sm:$0xff] }
 0x248   :  { %v1535_v45 = vld [vmem:[#allocation6 + $0x658] sm:$0xff] }
 0x249   :  { %3981 = vmatmul.mubr.f32.vlgmr.msra.gmra.mrb[6].mxu1 %v5696_v59  ;;  %4051 = vmatmul.mubr.f32.vlgmr.msra.gmra.mrb[38].mxu0 %v5718_v52  ;;  %v4450_v59 = vpack.c.bf16 %v1517_v9, %v1512_v6  ;;  %v4702_v6 = vpack.c.bf16 %v2167_v1, %v2162_v63  ;;  %v1549_v63 = vld [vmem:[#allocation6 + $0x6c8] sm:$0xff]  ;;  %v2440_v1 = vld [vmem:[#allocation6 + $0xe30] sm:$0xff] }
 0x24a   :  { %4443 = vmatpush1.bf16.msra.mxu1 %v4442_v56  ;;  %4682 = vmatpush3.bf16.msra.mxu0 %v4681_v57  ;;  %v1568_v56 = vld [vmem:[#allocation6 + $0x760] sm:$0xff]  ;;  %v4466_v57 = vpack.c.bf16 %v1557_v51, %v1552_v48  ;;  %v4778_v48 = vpack.c.bf16 %v2425_v40, %v2420_v35  ;;  %v1805_v35 = vld [vmem:[#allocation6 + $0x7f8] sm:$0xff]  ;;  %v2698_v40 = vld [vmem:[#allocation6 + $0xf70] sm:$0xff] }
 0x24b   :  { %4445 = vmatprep.subr.bf16.mxu1 %v4444_v60  ;;  %4683 = vmatprep.subr.bf16.mxu0 %v5318_v3  ;;  %v1562_v60 = vld [vmem:[#allocation6 + $0x730] sm:$0xff]  ;;  %v4468_v61 = vpack.c.bf16 %v1568_v56, %v1563_v55  ;;  %v2435_v55 = vld [vmem:[#allocation6 + $0xe08] sm:$0xff] }
 0x24c   :  { %1636 = vmatprep.mubr.f32.mxu1 %v5317_v0  ;;  %4085 = vmatprep.mubr.msk.f32.mxu0 %vm5319_vm2, %v5317_v0  ;;  %v1545_v56 = vld [vmem:[#allocation6 + $0x6a8] sm:$0xff] }
 0x24e   :  { %4447 = vmatpush1.bf16.msra.mxu1 %v4446_v4  ;;  %4685 = vmatpush3.bf16.msra.mxu0 %v4684_v5  ;;  %v1500_v4 = vld [vmem:[#allocation6 + $0x540] sm:$0xff]  ;;  %v4470_v5 = vpack.c.bf16 %v1567_v62, %v1562_v60  ;;  %v4781_v60 = vpack.c.bf16 %v2435_v55, %v2430_v54  ;;  %v1815_v54 = vld [vmem:[#allocation6 + $0x848] sm:$0xff] }
 0x24f   :  { %4449 = vmatprep.subr.bf16.mxu1 %v4448_v8  ;;  %4686 = vmatprep.subr.bf16.mxu0 %v5318_v3  ;;  %v1494_v8 = vld [vmem:[#allocation6 + $0x510] sm:$0xff]  ;;  %v4472_v9 = vpack.c.bf16 %v1500_v4, %v1495_v2  ;;  %v2445_v2 = vld [vmem:[#allocation6 + $0xe58] sm:$0xff]  ;;  %v2708_v55 = vld [vmem:[#allocation6 + $0xfc0] sm:$0xff] }
 0x250   :  { %v1555_v4 = vld [vmem:[#allocation6 + $0x6f8] sm:$0xff] }
 0x252   :  { %4451 = vmatpush1.bf16.msra.mxu1 %v4450_v59  ;;  %4688 = vmatpush3.bf16.msra.mxu0 %v4687_v14  ;;  %v1510_v59 = vld [vmem:[#allocation6 + $0x590] sm:$0xff]  ;;  %v4474_v14 = vpack.c.bf16 %v1499_v10, %v1494_v8  ;;  %v4784_v8 = vpack.c.bf16 %v2445_v2, %v2440_v1  ;;  %v2723_v2 = vld [vmem:[#allocation6 + $0x1038] sm:$0xff] }
 0x253   :  { %4453 = vmatprep.subr.bf16.mxu1 %v4452_v41  ;;  %4689 = vmatprep.subr.bf16.mxu0 %v5318_v3  ;;  %v1504_v41 = vld [vmem:[#allocation6 + $0x560] sm:$0xff]  ;;  %v4476_v16 = vpack.c.bf16 %v1510_v59, %v1505_v13  ;;  %v2455_v13 = vld [vmem:[#allocation6 + $0xea8] sm:$0xff]  ;;  %v2718_v1 = vld [vmem:[#allocation6 + $0x1010] sm:$0xff] }
 0x254   :  { %v1565_v59 = vld [vmem:[#allocation6 + $0x748] sm:$0xff] }
 0x256   :  { %4455 = vmatpush1.bf16.msra.mxu1 %v4454_v22  ;;  %4691 = vmatpush3.bf16.msra.mxu0 %v4690_v23  ;;  %v1520_v22 = vld [vmem:[#allocation6 + $0x5e0] sm:$0xff]  ;;  %v4478_v23 = vpack.c.bf16 %v1509_v17, %v1504_v41  ;;  %v4787_v41 = vpack.c.bf16 %v2455_v13, %v2450_v39  ;;  %v2733_v13 = vld [vmem:[#allocation6 + $0x1088] sm:$0xff] }
 0x257   :  { %4457 = vmatprep.subr.bf16.mxu1 %v4456_v26  ;;  %4692 = vmatprep.subr.bf16.mxu0 %v5318_v3  ;;  %v1514_v26 = vld [vmem:[#allocation6 + $0x5b0] sm:$0xff]  ;;  %v4480_v27 = vpack.c.bf16 %v1520_v22, %v1515_v21  ;;  %v2465_v21 = vld [vmem:[#allocation6 + $0xef8] sm:$0xff]  ;;  %v1791_v22 = vld [vmem:[#allocation6 + $0x788] sm:$0xff] }
 0x258   :  { %v2728_v39 = vld [vmem:[#allocation6 + $0x1060] sm:$0xff] }
 0x25a   :  { %4459 = vmatpush1.bf16.msra.mxu1 %v4458_v33  ;;  %4694 = vmatpush3.bf16.msra.mxu0 %v4693_v37  ;;  %v1530_v33 = vld [vmem:[#allocation6 + $0x630] sm:$0xff]  ;;  %v4482_v37 = vpack.c.bf16 %v1519_v28, %v1514_v26  ;;  %v4790_v26 = vpack.c.bf16 %v2465_v21, %v2460_v20  ;;  %v2743_v21 = vld [vmem:[#allocation6 + $0x10d8] sm:$0xff] }
 0x25b   :  { %4461 = vmatprep.subr.bf16.mxu1 %v4460_v43  ;;  %4695 = vmatprep.subr.bf16.mxu0 %v5318_v3  ;;  %v1524_v43 = vld [vmem:[#allocation6 + $0x600] sm:$0xff]  ;;  %v4484_v24 = vpack.c.bf16 %v1530_v33, %v1525_v32  ;;  %v2693_v32 = vld [vmem:[#allocation6 + $0xf48] sm:$0xff]  ;;  %v1801_v33 = vld [vmem:[#allocation6 + $0x7d8] sm:$0xff] }
 0x25c   :  { %v2738_v20 = vld [vmem:[#allocation6 + $0x10b0] sm:$0xff] }
 0x25e   :  { %4463 = vmatpush1.bf16.msra.mxu1 %v4462_v46  ;;  %4697 = vmatpush3.bf16.msra.mxu0 %v4696_v47  ;;  %v1540_v46 = vld [vmem:[#allocation6 + $0x680] sm:$0xff]  ;;  %v4486_v47 = vpack.c.bf16 %v1529_v44, %v1524_v43  ;;  %v4857_v43 = vpack.c.bf16 %v2693_v32, %v2688_v30  ;;  %v2753_v32 = vld [vmem:[#allocation6 + $0x1128] sm:$0xff] }
 0x25f   :  { %4465 = vmatprep.subr.bf16.mxu1 %v4464_v49  ;;  %4698 = vmatprep.subr.bf16.mxu0 %v5318_v3  ;;  %v1534_v49 = vld [vmem:[#allocation6 + $0x650] sm:$0xff]  ;;  %v4488_v51 = vpack.c.bf16 %v1540_v46, %v1535_v45  ;;  %v2703_v45 = vld [vmem:[#allocation6 + $0xf98] sm:$0xff]  ;;  %v1811_v46 = vld [vmem:[#allocation6 + $0x828] sm:$0xff] }
 0x260   :  { %v2748_v30 = vld [vmem:[#allocation6 + $0x1100] sm:$0xff] }
 0x262   :  { %4467 = vmatpush1.bf16.msra.mxu1 %v4466_v57  ;;  %4700 = vmatpush3.bf16.msra.mxu0 %v4699_v58  ;;  %v1550_v57 = vld [vmem:[#allocation6 + $0x6d0] sm:$0xff]  ;;  %v4490_v58 = vpack.c.bf16 %v1539_v53, %v1534_v49  ;;  %v4860_v49 = vpack.c.bf16 %v2703_v45, %v2698_v40  ;;  %v2763_v45 = vld [vmem:[#allocation6 + $0x1178] sm:$0xff] }
 0x263   :  { %4469 = vmatprep.subr.bf16.mxu1 %v4468_v61  ;;  %4701 = vmatprep.subr.bf16.mxu0 %v5318_v3  ;;  %v1544_v61 = vld [vmem:[#allocation6 + $0x6a0] sm:$0xff]  ;;  %v4492_v62 = vpack.c.bf16 %v1550_v57, %v1545_v56  ;;  %v2713_v56 = vld [vmem:[#allocation6 + $0xfe8] sm:$0xff]  ;;  %v1821_v57 = vld [vmem:[#allocation6 + $0x878] sm:$0xff] }
 0x264   :  { %v2758_v40 = vld [vmem:[#allocation6 + $0x1150] sm:$0xff] }
 0x266   :  { %4471 = vmatpush1.bf16.msra.mxu1 %v4470_v5  ;;  %4703 = vmatpush3.bf16.msra.mxu0 %v4702_v6  ;;  %v1560_v5 = vld [vmem:[#allocation6 + $0x720] sm:$0xff]  ;;  %v4494_v6 = vpack.c.bf16 %v1549_v63, %v1544_v61  ;;  %v1820_v61 = vld [vmem:[#allocation6 + $0x870] sm:$0xff]  ;;  %v1825_v63 = vld [vmem:[#allocation6 + $0x898] sm:$0xff] }
 0x267   :  { %4473 = vmatprep.subr.bf16.mxu1 %v4472_v9  ;;  %4768 = vmatprep.subr.bf16.mxu0 %v5318_v3  ;;  %v1554_v9 = vld [vmem:[#allocation6 + $0x6f0] sm:$0xff]  ;;  %v4496_v10 = vpack.c.bf16 %v1560_v5, %v1555_v4  ;;  %v1831_v4 = vld [vmem:[#allocation6 + $0x8c8] sm:$0xff] }
 0x268   :  { %v1836_v5 = vld [vmem:[#allocation6 + $0x8f0] sm:$0xff] }
 0x269   :  { %1637 = vmatmul.mubr.f32.vlgmr.msra.gmra.mrb[2].mxu1 %v5712_v7  ;;  %4086 = vmatmul.mubr.f32.vlgmr.msra.gmra.mrb[40].mxu0 %v5724_v31 }
 0x26a   :  { %4475 = vmatpush1.bf16.msra.mxu1 %v4474_v14  ;;  %4770 = vmatpush3.bf16.msra.mxu0 %v4769_v15  ;;  %v1570_v14 = vld [vmem:[#allocation6 + $0x770] sm:$0xff]  ;;  %v4498_v15 = vpack.c.bf16 %v1559_v12, %v1554_v9  ;;  %v1830_v9 = vld [vmem:[#allocation6 + $0x8c0] sm:$0xff]  ;;  %v1835_v12 = vld [vmem:[#allocation6 + $0x8e8] sm:$0xff] }
 0x26b   :  { %4477 = vmatprep.subr.bf16.mxu1 %v4476_v16  ;;  %4771 = vmatprep.subr.bf16.mxu0 %v5318_v3  ;;  %v1564_v16 = vld [vmem:[#allocation6 + $0x740] sm:$0xff]  ;;  %v4500_v17 = vpack.c.bf16 %v1570_v14, %v1565_v59  ;;  %v1841_v59 = vld [vmem:[#allocation6 + $0x918] sm:$0xff] }
 0x26c   :  { %1707 = vmatprep.mubr.f32.mxu1 %v5317_v0  ;;  %4120 = vmatprep.mubr.msk.f32.mxu0 %vm5319_vm2, %v5317_v0  ;;  %v1846_v14 = vld [vmem:[#allocation6 + $0x940] sm:$0xff] }
 0x26e   :  { %4479 = vmatpush1.bf16.msra.mxu1 %v4478_v23  ;;  %4773 = vmatpush3.bf16.msra.mxu0 %v4772_v25  ;;  %v1796_v23 = vld [vmem:[#allocation6 + $0x7b0] sm:$0xff]  ;;  %v4502_v25 = vpack.c.bf16 %v1569_v19, %v1564_v16  ;;  %v1845_v19 = vld [vmem:[#allocation6 + $0x938] sm:$0xff] }
 0x26f   :  { %4481 = vmatprep.subr.bf16.mxu1 %v4480_v27  ;;  %4774 = vmatprep.subr.bf16.mxu0 %v5318_v3  ;;  %v1790_v27 = vld [vmem:[#allocation6 + $0x780] sm:$0xff]  ;;  %v4528_v28 = vpack.c.bf16 %v1796_v23, %v1791_v22  ;;  %v1840_v16 = vld [vmem:[#allocation6 + $0x910] sm:$0xff]  ;;  %v1851_v22 = vld [vmem:[#allocation6 + $0x968] sm:$0xff] }
 0x270   :  { %v1856_v23 = vld [vmem:[#allocation6 + $0x990] sm:$0xff] }
 0x272   :  { %4483 = vmatpush1.bf16.msra.mxu1 %v4482_v37  ;;  %4776 = vmatpush3.bf16.msra.mxu0 %v4775_v42  ;;  %v1806_v37 = vld [vmem:[#allocation6 + $0x800] sm:$0xff]  ;;  %v4530_v42 = vpack.c.bf16 %v1795_v29, %v1790_v27  ;;  %v1855_v29 = vld [vmem:[#allocation6 + $0x988] sm:$0xff] }
 0x273   :  { %4485 = vmatprep.subr.bf16.mxu1 %v4484_v24  ;;  %4777 = vmatprep.subr.bf16.mxu0 %v5318_v3  ;;  %v1800_v24 = vld [vmem:[#allocation6 + $0x7d0] sm:$0xff]  ;;  %v4532_v44 = vpack.c.bf16 %v1806_v37, %v1801_v33  ;;  %v1850_v27 = vld [vmem:[#allocation6 + $0x960] sm:$0xff]  ;;  %v1861_v33 = vld [vmem:[#allocation6 + $0x9b8] sm:$0xff] }
 0x274   :  { %v1866_v37 = vld [vmem:[#allocation6 + $0x9e0] sm:$0xff] }
 0x276   :  { %4487 = vmatpush1.bf16.msra.mxu1 %v4486_v47  ;;  %4779 = vmatpush3.bf16.msra.mxu0 %v4778_v48  ;;  %v1816_v47 = vld [vmem:[#allocation6 + $0x850] sm:$0xff]  ;;  %v4534_v48 = vpack.c.bf16 %v1805_v35, %v1800_v24  ;;  %v1865_v35 = vld [vmem:[#allocation6 + $0x9d8] sm:$0xff] }
 0x277   :  { %4489 = vmatprep.subr.bf16.mxu1 %v4488_v51  ;;  %4780 = vmatprep.subr.bf16.mxu0 %v5318_v3  ;;  %v1810_v51 = vld [vmem:[#allocation6 + $0x820] sm:$0xff]  ;;  %v4536_v53 = vpack.c.bf16 %v1816_v47, %v1811_v46  ;;  %v1860_v24 = vld [vmem:[#allocation6 + $0x9b0] sm:$0xff]  ;;  %v1793_v46 = vld [vmem:[#allocation6 + $0x798] sm:$0xff] }
 0x278   :  { %v1798_v47 = vld [vmem:[#allocation6 + $0x7c0] sm:$0xff] }
 0x27a   :  { %4491 = vmatpush1.bf16.msra.mxu1 %v4490_v58  ;;  %4782 = vmatpush3.bf16.msra.mxu0 %v4781_v60  ;;  %v1826_v58 = vld [vmem:[#allocation6 + $0x8a0] sm:$0xff]  ;;  %v4863_v60 = vpack.c.bf16 %v2713_v56, %v2708_v55  ;;  %v2991_v56 = vld [vmem:[#allocation6 + $0x11c8] sm:$0xff] }
 0x27b   :  { %4493 = vmatprep.subr.bf16.mxu1 %v4492_v62  ;;  %4783 = vmatprep.subr.bf16.mxu0 %v5318_v3  ;;  %v4540_v62 = vpack.c.bf16 %v1826_v58, %v1821_v57  ;;  %v2986_v55 = vld [vmem:[#allocation6 + $0x11a0] sm:$0xff]  ;;  %v1803_v57 = vld [vmem:[#allocation6 + $0x7e8] sm:$0xff]  ;;  %v1808_v58 = vld [vmem:[#allocation6 + $0x810] sm:$0xff] }
 0x27e   :  { %4495 = vmatpush1.bf16.msra.mxu1 %v4494_v6  ;;  %4785 = vmatpush3.bf16.msra.mxu0 %v4784_v8  ;;  %v4542_v6 = vpack.c.bf16 %v1825_v63, %v1820_v61  ;;  %v4866_v8 = vpack.c.bf16 %v2723_v2, %v2718_v1  ;;  %v1802_v61 = vld [vmem:[#allocation6 + $0x7e0] sm:$0xff]  ;;  %v1807_v63 = vld [vmem:[#allocation6 + $0x808] sm:$0xff]  ;;  %v2996_v1 = vld [vmem:[#allocation6 + $0x11f0] sm:$0xff] }
 0x27f   :  { %4497 = vmatprep.subr.bf16.mxu1 %v4496_v10  ;;  %4786 = vmatprep.subr.bf16.mxu0 %v5318_v3  ;;  %v4544_v10 = vpack.c.bf16 %v1836_v5, %v1831_v4  ;;  %v3001_v2 = vld [vmem:[#allocation6 + $0x1218] sm:$0xff]  ;;  %v1818_v5 = vld [vmem:[#allocation6 + $0x860] sm:$0xff] }
 0x280   :  { %v1813_v4 = vld [vmem:[#allocation6 + $0x838] sm:$0xff] }
 0x282   :  { %4499 = vmatpush1.bf16.msra.mxu1 %v4498_v15  ;;  %4788 = vmatpush3.bf16.msra.mxu0 %v4787_v41  ;;  %v4546_v15 = vpack.c.bf16 %v1835_v12, %v1830_v9  ;;  %v4869_v41 = vpack.c.bf16 %v2733_v13, %v2728_v39  ;;  %v1812_v9 = vld [vmem:[#allocation6 + $0x830] sm:$0xff]  ;;  %v1817_v12 = vld [vmem:[#allocation6 + $0x858] sm:$0xff]  ;;  %v3006_v39 = vld [vmem:[#allocation6 + $0x1240] sm:$0xff] }
 0x283   :  { %4501 = vmatprep.subr.bf16.mxu1 %v4500_v17  ;;  %4789 = vmatprep.subr.bf16.mxu0 %v5318_v3  ;;  %v4548_v17 = vpack.c.bf16 %v1846_v14, %v1841_v59  ;;  %v3011_v13 = vld [vmem:[#allocation6 + $0x1268] sm:$0xff]  ;;  %v1828_v14 = vld [vmem:[#allocation6 + $0x8b0] sm:$0xff] }
 0x284   :  { %v1823_v59 = vld [vmem:[#allocation6 + $0x888] sm:$0xff] }
 0x286   :  { %4503 = vmatpush1.bf16.msra.mxu1 %v4502_v25  ;;  %4791 = vmatpush3.bf16.msra.mxu0 %v4790_v26  ;;  %v4550_v25 = vpack.c.bf16 %v1845_v19, %v1840_v16  ;;  %v4872_v26 = vpack.c.bf16 %v2743_v21, %v2738_v20  ;;  %v1822_v16 = vld [vmem:[#allocation6 + $0x880] sm:$0xff]  ;;  %v1827_v19 = vld [vmem:[#allocation6 + $0x8a8] sm:$0xff]  ;;  %v3016_v20 = vld [vmem:[#allocation6 + $0x1290] sm:$0xff] }
 0x287   :  { %4529 = vmatprep.subr.bf16.mxu1 %v4528_v28  ;;  %4856 = vmatprep.subr.bf16.mxu0 %v5318_v3  ;;  %v4552_v28 = vpack.c.bf16 %v1856_v23, %v1851_v22  ;;  %v3021_v21 = vld [vmem:[#allocation6 + $0x12b8] sm:$0xff]  ;;  %v1838_v23 = vld [vmem:[#allocation6 + $0x900] sm:$0xff] }
 0x288   :  { %v1833_v22 = vld [vmem:[#allocation6 + $0x8d8] sm:$0xff] }
 0x289   :  { %1708 = vmatmul.mubr.f32.vlgmr.msra.gmra.mrb[4].mxu1 %v5712_v7  ;;  %4121 = vmatmul.mubr.f32.vlgmr.msra.gmra.mrb[42].mxu0 %v5730_v11  ;;  %v4538_v7 = vpack.c.bf16 %v1815_v54, %v1810_v51  ;;  %v1792_v51 = vld [vmem:[#allocation6 + $0x790] sm:$0xff]  ;;  %v1797_v54 = vld [vmem:[#allocation6 + $0x7b8] sm:$0xff] }
 0x28a   :  { %4531 = vmatpush1.bf16.msra.mxu1 %v4530_v42  ;;  %4858 = vmatpush3.bf16.msra.mxu0 %v4857_v43  ;;  %v4554_v42 = vpack.c.bf16 %v1855_v29, %v1850_v27  ;;  %v4875_v43 = vpack.c.bf16 %v2753_v32, %v2748_v30  ;;  %v1832_v27 = vld [vmem:[#allocation6 + $0x8d0] sm:$0xff]  ;;  %v1837_v29 = vld [vmem:[#allocation6 + $0x8f8] sm:$0xff]  ;;  %v3026_v30 = vld [vmem:[#allocation6 + $0x12e0] sm:$0xff] }
 0x28b   :  { %4533 = vmatprep.subr.bf16.mxu1 %v4532_v44  ;;  %4859 = vmatprep.subr.bf16.mxu0 %v5318_v3  ;;  %v4556_v44 = vpack.c.bf16 %v1866_v37, %v1861_v33  ;;  %v3031_v32 = vld [vmem:[#allocation6 + $0x1308] sm:$0xff]  ;;  %v1848_v37 = vld [vmem:[#allocation6 + $0x950] sm:$0xff] }
 0x28c   :  { %1934 = vmatprep.mubr.f32.mxu1 %v5317_v0  ;;  %4155 = vmatprep.mubr.msk.f32.mxu0 %vm5319_vm2, %v5317_v0  ;;  %v1843_v33 = vld [vmem:[#allocation6 + $0x928] sm:$0xff] }
 0x28e   :  { %4535 = vmatpush1.bf16.msra.mxu1 %v4534_v48  ;;  %4861 = vmatpush3.bf16.msra.mxu0 %v4860_v49  ;;  %v4558_v48 = vpack.c.bf16 %v1865_v35, %v1860_v24  ;;  %v4878_v49 = vpack.c.bf16 %v2763_v45, %v2758_v40  ;;  %v1842_v24 = vld [vmem:[#allocation6 + $0x920] sm:$0xff]  ;;  %v1847_v35 = vld [vmem:[#allocation6 + $0x948] sm:$0xff]  ;;  %v3036_v40 = vld [vmem:[#allocation6 + $0x1330] sm:$0xff] }
 0x28f   :  { %4537 = vmatprep.subr.bf16.mxu1 %v4536_v53  ;;  %4862 = vmatprep.subr.bf16.mxu0 %v5318_v3  ;;  %v4560_v53 = vpack.c.bf16 %v1798_v47, %v1793_v46  ;;  %v3041_v45 = vld [vmem:[#allocation6 + $0x1358] sm:$0xff]  ;;  %v1858_v47 = vld [vmem:[#allocation6 + $0x9a0] sm:$0xff] }
 0x290   :  { %v1853_v46 = vld [vmem:[#allocation6 + $0x978] sm:$0xff] }
 0x292   :  { %4539 = vmatpush1.bf16.msra.mxu1 %v4538_v7  ;;  %4864 = vmatpush3.bf16.msra.mxu0 %v4863_v60  ;;  %v4562_v7 = vpack.c.bf16 %v1797_v54, %v1792_v51  ;;  %v4945_v60 = vpack.c.bf16 %v2991_v56, %v2986_v55  ;;  %v1852_v51 = vld [vmem:[#allocation6 + $0x970] sm:$0xff]  ;;  %v1857_v54 = vld [vmem:[#allocation6 + $0x998] sm:$0xff]  ;;  %v3046_v55 = vld [vmem:[#allocation6 + $0x1380] sm:$0xff] }
 0x293   :  { %4541 = vmatprep.subr.bf16.mxu1 %v4540_v62  ;;  %4865 = vmatprep.subr.bf16.mxu0 %v5318_v3  ;;  %v4564_v62 = vpack.c.bf16 %v1808_v58, %v1803_v57  ;;  %v3051_v56 = vld [vmem:[#allocation6 + $0x13a8] sm:$0xff] }
 0x296   :  { %4543 = vmatpush1.bf16.msra.mxu1 %v4542_v6  ;;  %4867 = vmatpush3.bf16.msra.mxu0 %v4866_v8  ;;  %v4566_v6 = vpack.c.bf16 %v1807_v63, %v1802_v61  ;;  %v4948_v8 = vpack.c.bf16 %v3001_v2, %v2996_v1  ;;  %v4586_v63 = vpack.c.bf16 %v1857_v54, %v1852_v51  ;;  %v1862_v2 = vld [vmem:[#allocation6 + $0x9c0] sm:$0xff]  ;;  %v2149_v51 = vld [vmem:[#allocation6 + $0xbe8] sm:$0xff] }
 0x297   :  { %4545 = vmatprep.subr.bf16.mxu1 %v4544_v10  ;;  %4868 = vmatprep.subr.bf16.mxu0 %v5318_v3  ;;  %v4568_v10 = vpack.c.bf16 %v1818_v5, %v1813_v4  ;;  %v4963_v1 = vpack.c.bf16 %v3051_v56, %v3046_v55  ;;  %v1867_v5 = vld [vmem:[#allocation6 + $0x9e8] sm:$0xff]  ;;  %v2148_v56 = vld [vmem:[#allocation6 + $0xbe0] sm:$0xff] }
 0x29a   :  { %4547 = vmatpush1.bf16.msra.mxu1 %v4546_v15  ;;  %4870 = vmatpush3.bf16.msra.mxu0 %v4869_v41  ;;  %v4570_v15 = vpack.c.bf16 %v1817_v12, %v1812_v9  ;;  %v4951_v41 = vpack.c.bf16 %v3011_v13, %v3006_v39  ;;  %v2089_v9 = vld [vmem:[#allocation6 + $0xa08] sm:$0xff]  ;;  %v4590_v12 = vpack.c.bf16 %v1867_v5, %v1862_v2  ;;  %v2158_v5 = vld [vmem:[#allocation6 + $0xc30] sm:$0xff] }
 0x29b   :  { %4549 = vmatprep.subr.bf16.mxu1 %v4548_v17  ;;  %4871 = vmatprep.subr.bf16.mxu0 %v5318_v3  ;;  %v4572_v17 = vpack.c.bf16 %v1828_v14, %v1823_v59  ;;  %v2088_v59 = vld [vmem:[#allocation6 + $0xa00] sm:$0xff]  ;;  %v2093_v14 = vld [vmem:[#allocation6 + $0xa28] sm:$0xff] }
 0x29e   :  { %4551 = vmatpush1.bf16.msra.mxu1 %v4550_v25  ;;  %4873 = vmatpush3.bf16.msra.mxu0 %v4872_v26  ;;  %v4574_v25 = vpack.c.bf16 %v1827_v19, %v1822_v16  ;;  %v4954_v26 = vpack.c.bf16 %v3021_v21, %v3016_v20  ;;  %v4618_v16 = vpack.c.bf16 %v2093_v14, %v2088_v59  ;;  %v2098_v19 = vld [vmem:[#allocation6 + $0xa50] sm:$0xff]  ;;  %v2103_v20 = vld [vmem:[#allocation6 + $0xa78] sm:$0xff]  ;;  %v2109_v21 = vld [vmem:[#allocation6 + $0xaa8] sm:$0xff] }
 0x29f   :  { %4553 = vmatprep.subr.bf16.mxu1 %v4552_v28  ;;  %4874 = vmatprep.subr.bf16.mxu0 %v5318_v3  ;;  %v4576_v28 = vpack.c.bf16 %v1838_v23, %v1833_v22  ;;  %v2114_v22 = vld [vmem:[#allocation6 + $0xad0] sm:$0xff]  ;;  %v4622_v23 = vpack.c.bf16 %v2103_v20, %v2098_v19  ;;  %v2101_v59 = vld [vmem:[#allocation6 + $0xa68] sm:$0xff]  ;;  %v2111_v19 = vld [vmem:[#allocation6 + $0xab8] sm:$0xff] }
 0x2a0   :  { %v2106_v14 = vld [vmem:[#allocation6 + $0xa90] sm:$0xff]  ;;  %v2116_v20 = vld [vmem:[#allocation6 + $0xae0] sm:$0xff] }
 0x2a2   :  { %4555 = vmatpush1.bf16.msra.mxu1 %v4554_v42  ;;  %4876 = vmatpush3.bf16.msra.mxu0 %v4875_v43  ;;  %v4578_v42 = vpack.c.bf16 %v1837_v29, %v1832_v27  ;;  %v4957_v43 = vpack.c.bf16 %v3031_v32, %v3026_v30  ;;  %v2113_v27 = vld [vmem:[#allocation6 + $0xac8] sm:$0xff]  ;;  %v2124_v29 = vld [vmem:[#allocation6 + $0xb20] sm:$0xff] }
 0x2a3   :  { %4557 = vmatprep.subr.bf16.mxu1 %v4556_v44  ;;  %4877 = vmatprep.subr.bf16.mxu0 %v5318_v3  ;;  %v4580_v44 = vpack.c.bf16 %v1848_v37, %v1843_v33  ;;  %v2118_v33 = vld [vmem:[#allocation6 + $0xaf0] sm:$0xff]  ;;  %v2123_v37 = vld [vmem:[#allocation6 + $0xb18] sm:$0xff] }
 0x2a6   :  { %4559 = vmatpush1.bf16.msra.mxu1 %v4558_v48  ;;  %4879 = vmatpush3.bf16.msra.mxu0 %v4878_v49  ;;  %v4582_v48 = vpack.c.bf16 %v1847_v35, %v1842_v24  ;;  %v4960_v49 = vpack.c.bf16 %v3041_v45, %v3036_v40  ;;  %v2133_v35 = vld [vmem:[#allocation6 + $0xb68] sm:$0xff]  ;;  %v2139_v40 = vld [vmem:[#allocation6 + $0xb98] sm:$0xff]  ;;  %v2144_v45 = vld [vmem:[#allocation6 + $0xbc0] sm:$0xff] }
 0x2a7   :  { %4561 = vmatprep.subr.bf16.mxu1 %v4560_v53  ;;  %4944 = vmatprep.subr.bf16.mxu0 %v5318_v3  ;;  %v4584_v53 = vpack.c.bf16 %v1858_v47, %v1853_v46  ;;  %v4636_v47 = vpack.c.bf16 %v2144_v45, %v2139_v40 }
 0x2a9   :  { %1935 = vmatmul.mubr.f32.vlgmr.msra.gmra.mrb[2].mxu1 %v5718_v52  ;;  %4156 = vmatmul.mubr.f32.vlgmr.msra.gmra.mrb[44].mxu0 %v5743_v50 }
 0x2aa   :  { %4563 = vmatpush1.bf16.msra.mxu1 %v4562_v7  ;;  %4946 = vmatpush3.bf16.msra.mxu0 %v4945_v60  ;;  %v1863_v7 = vld [vmem:[#allocation6 + $0x9c8] sm:$0xff]  ;;  %v1868_v60 = vld [vmem:[#allocation6 + $0x9f0] sm:$0xff] }
 0x2ab   :  { %4565 = vmatprep.subr.bf16.mxu1 %v4564_v62  ;;  %4947 = vmatprep.subr.bf16.mxu0 %v5318_v3  ;;  %v4588_v4 = vpack.c.bf16 %v1868_v60, %v1863_v7  ;;  %v2153_v7 = vld [vmem:[#allocation6 + $0xc08] sm:$0xff] }
 0x2ac   :  { %2005 = vmatprep.mubr.f32.mxu1 %v5317_v0  ;;  %4190 = vmatprep.mubr.msk.f32.mxu0 %vm5319_vm2, %v5317_v0  ;;  %v4642_v2 = vpack.c.bf16 %v2153_v7, %v2148_v56  ;;  %v2161_v7 = vld [vmem:[#allocation6 + $0xc48] sm:$0xff] }
 0x2ae   :  { %4567 = vmatpush1.bf16.msra.mxu1 %v4566_v6  ;;  %4949 = vmatpush3.bf16.msra.mxu0 %v4948_v8  ;;  %v3056_v6 = vld [vmem:[#allocation6 + $0x13d0] sm:$0xff]  ;;  %v3061_v8 = vld [vmem:[#allocation6 + $0x13f8] sm:$0xff] }
 0x2af   :  { %4569 = vmatprep.subr.bf16.mxu1 %v4568_v10  ;;  %4950 = vmatprep.subr.bf16.mxu0 %v5318_v3  ;;  %v2094_v10 = vld [vmem:[#allocation6 + $0xa30] sm:$0xff]  ;;  %v4966_v39 = vpack.c.bf16 %v3061_v8, %v3056_v6  ;;  %v2163_v6 = vld [vmem:[#allocation6 + $0xc58] sm:$0xff] }
 0x2b0   :  { %v4616_v13 = vpack.c.bf16 %v2094_v10, %v2089_v9  ;;  %v2091_v8 = vld [vmem:[#allocation6 + $0xa18] sm:$0xff]  ;;  %v2096_v9 = vld [vmem:[#allocation6 + $0xa40] sm:$0xff]  ;;  %v4646_v10 = vpack.c.bf16 %v2163_v6, %v2158_v5  ;;  %v2165_v6 = vld [vmem:[#allocation6 + $0xc68] sm:$0xff] }
 0x2b1   :  { %v2160_v5 = vld [vmem:[#allocation6 + $0xc40] sm:$0xff] }
 0x2b2   :  { %4571 = vmatpush1.bf16.msra.mxu1 %v4570_v15  ;;  %4952 = vmatpush3.bf16.msra.mxu0 %v4951_v41  ;;  %v2099_v15 = vld [vmem:[#allocation6 + $0xa58] sm:$0xff]  ;;  %v2104_v41 = vld [vmem:[#allocation6 + $0xa80] sm:$0xff] }
 0x2b3   :  { %4573 = vmatprep.subr.bf16.mxu1 %v4572_v17  ;;  %4953 = vmatprep.subr.bf16.mxu0 %v5318_v3  ;;  %v4620_v17 = vpack.c.bf16 %v2104_v41, %v2099_v15  ;;  %v4652_v41 = vpack.c.bf16 %v2106_v14, %v2101_v59  ;;  %v2397_v59 = vld [vmem:[#allocation6 + $0xcd8] sm:$0xff]  ;;  %v2402_v14 = vld [vmem:[#allocation6 + $0xd00] sm:$0xff] }
 0x2b6   :  { %4575 = vmatpush1.bf16.msra.mxu1 %v4574_v25  ;;  %4955 = vmatpush3.bf16.msra.mxu0 %v4954_v26  ;;  %v4624_v25 = vpack.c.bf16 %v2114_v22, %v2109_v21  ;;  %v2108_v26 = vld [vmem:[#allocation6 + $0xaa0] sm:$0xff]  ;;  %v4656_v22 = vpack.c.bf16 %v2116_v20, %v2111_v19  ;;  %v2407_v19 = vld [vmem:[#allocation6 + $0xd28] sm:$0xff]  ;;  %v2412_v20 = vld [vmem:[#allocation6 + $0xd50] sm:$0xff] }
 0x2b7   :  { %4577 = vmatprep.subr.bf16.mxu1 %v4576_v28  ;;  %4956 = vmatprep.subr.bf16.mxu0 %v5318_v3  ;;  %v2119_v28 = vld [vmem:[#allocation6 + $0xaf8] sm:$0xff]  ;;  %v4626_v30 = vpack.c.bf16 %v2113_v27, %v2108_v26  ;;  %v2121_v26 = vld [vmem:[#allocation6 + $0xb08] sm:$0xff]  ;;  %v2126_v27 = vld [vmem:[#allocation6 + $0xb30] sm:$0xff] }
 0x2b8   :  { %v4628_v32 = vpack.c.bf16 %v2124_v29, %v2119_v28  ;;  %v4660_v29 = vpack.c.bf16 %v2126_v27, %v2121_v26  ;;  %v2417_v26 = vld [vmem:[#allocation6 + $0xd78] sm:$0xff]  ;;  %v2422_v27 = vld [vmem:[#allocation6 + $0xda0] sm:$0xff] }
 0x2ba   :  { %4579 = vmatpush1.bf16.msra.mxu1 %v4578_v42  ;;  %4958 = vmatpush3.bf16.msra.mxu0 %v4957_v43  ;;  %v2129_v42 = vld [vmem:[#allocation6 + $0xb48] sm:$0xff]  ;;  %v4630_v43 = vpack.c.bf16 %v2123_v37, %v2118_v33  ;;  %v2131_v33 = vld [vmem:[#allocation6 + $0xb58] sm:$0xff]  ;;  %v2136_v37 = vld [vmem:[#allocation6 + $0xb80] sm:$0xff] }
 0x2bb   :  { %4581 = vmatprep.subr.bf16.mxu1 %v4580_v44  ;;  %4959 = vmatprep.subr.bf16.mxu0 %v5318_v3  ;;  %v2128_v44 = vld [vmem:[#allocation6 + $0xb40] sm:$0xff] }
 0x2bc   :  { %v5827_v57 = vpop.f32.mrb[32].mxu0  ;;  %v5829_v58 = vpop.f32.mrb[0].mxu1  ;;  %v4634_v46 = vpack.c.bf16 %v2133_v35, %v2128_v44  ;;  %v2141_v44 = vld [vmem:[#allocation6 + $0xba8] sm:$0xff]  ;;  %v2146_v35 = vld [vmem:[#allocation6 + $0xbd0] sm:$0xff] }
 0x2bd   :  { %v5831_v61 = vpop.f32.mrb[33].mxu0  ;;  %v3947_v62 = vpop.f32.mrb[1].mxu1  ;;  %v4668_v45 = vpack.c.bf16 %v2146_v35, %v2141_v44  ;;  %v2442_v44 = vld [vmem:[#allocation6 + $0xe40] sm:$0xff] }
 0x2be   :  { %4583 = vmatpush1.bf16.msra.mxu1 %v4582_v48  ;;  %4961 = vmatpush3.bf16.msra.mxu0 %v4960_v49  ;;  %v2138_v48 = vld [vmem:[#allocation6 + $0xb90] sm:$0xff]  ;;  %v2143_v49 = vld [vmem:[#allocation6 + $0xbb8] sm:$0xff] }
 0x2bf   :  { %4585 = vmatprep.subr.bf16.mxu1 %v4584_v53  ;;  %4962 = vmatprep.subr.bf16.mxu0 %v5318_v3  ;;  %v2154_v53 = vld [vmem:[#allocation6 + $0xc10] sm:$0xff]  ;;  %v4638_v54 = vpack.c.bf16 %v2143_v49, %v2138_v48  ;;  %v2159_v62 = vld [vmem:[#allocation6 + $0xc38] sm:$0xff]  ;;  %v2156_v49 = vld [vmem:[#allocation6 + $0xc20] sm:$0xff] }
 0x2c0   :  { %v4640_v55 = vpack.c.bf16 %v2154_v53, %v2149_v51  ;;  %v2151_v48 = vld [vmem:[#allocation6 + $0xbf8] sm:$0xff] }
 0x2c1   :  { %v4672_v53 = vpack.c.bf16 %v2156_v49, %v2151_v48  ;;  %v2452_v48 = vld [vmem:[#allocation6 + $0xe90] sm:$0xff] }
 0x2c2   :  { %4587 = vmatpush1.bf16.msra.mxu1 %v4586_v63  ;;  %4964 = vmatpush3.bf16.msra.mxu0 %v4963_v1  ;;  %v2164_v63 = vld [vmem:[#allocation6 + $0xc60] sm:$0xff] }
 0x2c3   :  { %4589 = vmatprep.subr.bf16.mxu1 %v4588_v4  ;;  %4965 = vmatprep.subr.bf16.mxu0 %v5318_v3  ;;  %v4644_v4 = vpack.c.bf16 %v2164_v63, %v2159_v62  ;;  %v2166_v62 = vld [vmem:[#allocation6 + $0xc70] sm:$0xff] }
 0x2c6   :  { %4591 = vmatpush1.bf16.msra.mxu1 %v4590_v12  ;;  %4967 = vmatpush3.bf16.msra.mxu0 %v4966_v39  ;;  %v4648_v12 = vpack.c.bf16 %v2096_v9, %v2091_v8  ;;  %v2090_v39 = vld [vmem:[#allocation6 + $0xa10] sm:$0xff]  ;;  %v2387_v8 = vld [vmem:[#allocation6 + $0xc88] sm:$0xff] }
 0x2c7   :  { %4617 = vmatprep.subr.bf16.mxu1 %v4616_v13  ;;  %v2095_v13 = vld [vmem:[#allocation6 + $0xa38] sm:$0xff]  ;;  %v2392_v9 = vld [vmem:[#allocation6 + $0xcb0] sm:$0xff] }
 0x2c8   :  { %v4650_v15 = vpack.c.bf16 %v2095_v13, %v2090_v39  ;;  %v2386_v39 = vld [vmem:[#allocation6 + $0xc80] sm:$0xff]  ;;  %v2391_v13 = vld [vmem:[#allocation6 + $0xca8] sm:$0xff] }
 0x2c9   :  { %2006 = vmatmul.mubr.f32.vlgmr.msra.gmra.mrb[4].mxu1 %v5718_v52  ;;  %4191 = vmatmul.mubr.f32.vlgmr.msra.gmra.mrb[46].mxu0 %v5749_v18  ;;  %v2134_v52 = vld [vmem:[#allocation6 + $0xb70] sm:$0xff] }
 0x2ca   :  { %4619 = vmatpush1.bf16.msra.mxu1 %v4618_v16  ;;  %2232 = vmatprep.mubr.f32.mxu1 %v5317_v0  ;;  %v4632_v24 = vpack.c.bf16 %v2134_v52, %v2129_v42  ;;  %v2100_v16 = vld [vmem:[#allocation6 + $0xa60] sm:$0xff]  ;;  %v4664_v52 = vpack.c.bf16 %v2136_v37, %v2131_v33  ;;  %v2427_v33 = vld [vmem:[#allocation6 + $0xdc8] sm:$0xff]  ;;  %v2432_v37 = vld [vmem:[#allocation6 + $0xdf0] sm:$0xff] }
 0x2cb   :  { %4621 = vmatprep.subr.bf16.mxu1 %v4620_v17  ;;  %v2105_v17 = vld [vmem:[#allocation6 + $0xa88] sm:$0xff] }
 0x2cc   :  { %v4654_v21 = vpack.c.bf16 %v2105_v17, %v2100_v16  ;;  %v2396_v16 = vld [vmem:[#allocation6 + $0xcd0] sm:$0xff]  ;;  %v2401_v17 = vld [vmem:[#allocation6 + $0xcf8] sm:$0xff] }
 0x2ce   :  { %4623 = vmatpush1.bf16.msra.mxu1 %v4622_v23  ;;  %v2110_v23 = vld [vmem:[#allocation6 + $0xab0] sm:$0xff] }
 0x2cf   :  { %4625 = vmatprep.subr.bf16.mxu1 %v4624_v25  ;;  %v2115_v25 = vld [vmem:[#allocation6 + $0xad8] sm:$0xff] }
 0x2d0   :  { %v4658_v28 = vpack.c.bf16 %v2115_v25, %v2110_v23  ;;  %v2406_v23 = vld [vmem:[#allocation6 + $0xd20] sm:$0xff]  ;;  %v2411_v25 = vld [vmem:[#allocation6 + $0xd48] sm:$0xff] }
 0x2d2   :  { %4627 = vmatpush1.bf16.msra.mxu1 %v4626_v30  ;;  %v2120_v30 = vld [vmem:[#allocation6 + $0xb00] sm:$0xff] }
 0x2d3   :  { %4629 = vmatprep.subr.bf16.mxu1 %v4628_v32  ;;  %v2125_v32 = vld [vmem:[#allocation6 + $0xb28] sm:$0xff] }
 0x2d4   :  { %v4662_v42 = vpack.c.bf16 %v2125_v32, %v2120_v30  ;;  %v2416_v30 = vld [vmem:[#allocation6 + $0xd70] sm:$0xff]  ;;  %v2421_v32 = vld [vmem:[#allocation6 + $0xd98] sm:$0xff] }
 0x2d6   :  { %4631 = vmatpush1.bf16.msra.mxu1 %v4630_v43  ;;  %v2130_v43 = vld [vmem:[#allocation6 + $0xb50] sm:$0xff] }
 0x2d7   :  { %4633 = vmatprep.subr.bf16.mxu1 %v4632_v24  ;;  %v2135_v24 = vld [vmem:[#allocation6 + $0xb78] sm:$0xff] }
 0x2d8   :  { %v4666_v40 = vpack.c.bf16 %v2135_v24, %v2130_v43  ;;  %v2431_v43 = vld [vmem:[#allocation6 + $0xde8] sm:$0xff]  ;;  %v2437_v24 = vld [vmem:[#allocation6 + $0xe18] sm:$0xff] }
 0x2da   :  { %4635 = vmatpush1.bf16.msra.mxu1 %v4634_v46  ;;  %v2140_v46 = vld [vmem:[#allocation6 + $0xba0] sm:$0xff] }
 0x2db   :  { %4637 = vmatprep.subr.bf16.mxu1 %v4636_v47  ;;  %v2145_v47 = vld [vmem:[#allocation6 + $0xbc8] sm:$0xff] }
 0x2dc   :  { %v5838_v60 = vpop.f32.mrb[34].mxu0  ;;  %v4670_v51 = vpack.c.bf16 %v2145_v47, %v2140_v46  ;;  %v2441_v46 = vld [vmem:[#allocation6 + $0xe38] sm:$0xff]  ;;  %v2447_v47 = vld [vmem:[#allocation6 + $0xe68] sm:$0xff] }
 0x2dd   :  { %v5840_v1 = vpop.f32.mrb[35].mxu0 }
 0x2de   :  { %4639 = vmatpush1.bf16.msra.mxu1 %v4638_v54  ;;  %v2150_v54 = vld [vmem:[#allocation6 + $0xbf0] sm:$0xff] }
 0x2df   :  { %4641 = vmatprep.subr.bf16.mxu1 %v4640_v55  ;;  %v2155_v55 = vld [vmem:[#allocation6 + $0xc18] sm:$0xff] }
 0x2e2   :  { %4643 = vmatpush1.bf16.msra.mxu1 %v4642_v2  ;;  %v4674_v2 = vpack.c.bf16 %v2155_v55, %v2150_v54  ;;  %v2451_v54 = vld [vmem:[#allocation6 + $0xe88] sm:$0xff] }
 0x2e3   :  { %4645 = vmatprep.subr.bf16.mxu1 %v4644_v4  ;;  %v4676_v4 = vpack.c.bf16 %v2166_v62, %v2161_v7  ;;  %v2457_v62 = vld [vmem:[#allocation6 + $0xeb8] sm:$0xff] }
 0x2e6   :  { %4647 = vmatpush1.bf16.msra.mxu1 %v4646_v10  ;;  %v4678_v10 = vpack.c.bf16 %v2165_v6, %v2160_v5 }
 0x2e7   :  { %4649 = vmatprep.subr.bf16.mxu1 %v4648_v12  ;;  %v4704_v12 = vpack.c.bf16 %v2392_v9, %v2387_v8 }
 0x2e9   :  { %2233 = vmatmul.mubr.f32.vlgmr.msra.gmra.mrb[2].mxu1 %v5724_v31 }
 0x2ea   :  { %4651 = vmatpush1.bf16.msra.mxu1 %v4650_v15  ;;  %2303 = vmatprep.mubr.f32.mxu1 %v5317_v0  ;;  %v4706_v15 = vpack.c.bf16 %v2391_v13, %v2386_v39  ;;  %v2389_v39 = vld [vmem:[#allocation6 + $0xc98] sm:$0xff]  ;;  %v2394_v13 = vld [vmem:[#allocation6 + $0xcc0] sm:$0xff] }
 0x2eb   :  { %4653 = vmatprep.subr.bf16.mxu1 %v4652_v41  ;;  %v4708_v41 = vpack.c.bf16 %v2402_v14, %v2397_v59 }
 0x2ee   :  { %4655 = vmatpush1.bf16.msra.mxu1 %v4654_v21  ;;  %v4710_v21 = vpack.c.bf16 %v2401_v17, %v2396_v16  ;;  %v2393_v16 = vld [vmem:[#allocation6 + $0xcb8] sm:$0xff]  ;;  %v2404_v17 = vld [vmem:[#allocation6 + $0xd10] sm:$0xff] }
 0x2ef   :  { %4657 = vmatprep.subr.bf16.mxu1 %v4656_v22  ;;  %v4712_v22 = vpack.c.bf16 %v2412_v20, %v2407_v19 }
 0x2f2   :  { %4659 = vmatpush1.bf16.msra.mxu1 %v4658_v28  ;;  %v4714_v28 = vpack.c.bf16 %v2411_v25, %v2406_v23  ;;  %v2414_v23 = vld [vmem:[#allocation6 + $0xd60] sm:$0xff] }
 0x2f3   :  { %4661 = vmatprep.subr.bf16.mxu1 %v4660_v29  ;;  %v4716_v29 = vpack.c.bf16 %v2422_v27, %v2417_v26  ;;  %v2408_v27 = vld [vmem:[#allocation6 + $0xd30] sm:$0xff] }
 0x2f6   :  { %4663 = vmatpush1.bf16.msra.mxu1 %v4662_v42  ;;  %v4720_v42 = vpack.c.bf16 %v2432_v37, %v2427_v33  ;;  %v2418_v37 = vld [vmem:[#allocation6 + $0xd80] sm:$0xff] }
 0x2f7   :  { %4665 = vmatprep.subr.bf16.mxu1 %v4664_v52  ;;  %v2426_v52 = vld [vmem:[#allocation6 + $0xdc0] sm:$0xff] }
 0x2f8   :  { %v4722_v35 = vpack.c.bf16 %v2431_v43, %v2426_v52  ;;  %v2434_v52 = vld [vmem:[#allocation6 + $0xe00] sm:$0xff] }
 0x2fa   :  { %4667 = vmatpush1.bf16.msra.mxu1 %v4666_v40  ;;  %v4724_v40 = vpack.c.bf16 %v2442_v44, %v2437_v24  ;;  %v2428_v44 = vld [vmem:[#allocation6 + $0xdd0] sm:$0xff] }
 0x2fb   :  { %4669 = vmatprep.subr.bf16.mxu1 %v4668_v45  ;;  %v2436_v45 = vld [vmem:[#allocation6 + $0xe10] sm:$0xff] }
 0x2fc   :  { %v5844_v56 = vpop.f32.mrb[36].mxu0  ;;  %v4726_v49 = vpack.c.bf16 %v2441_v46, %v2436_v45  ;;  %v2444_v45 = vld [vmem:[#allocation6 + $0xe50] sm:$0xff] }
 0x2fd   :  { %v4017_v63 = vpop.f32.mrb[37].mxu0 }
 0x2fe   :  { %4671 = vmatpush1.bf16.msra.mxu1 %v4670_v51  ;;  %v4728_v51 = vpack.c.bf16 %v2452_v48, %v2447_v47  ;;  %v2462_v63 = vld [vmem:[#allocation6 + $0xee0] sm:$0xff] }
 0x2ff   :  { %4673 = vmatprep.subr.bf16.mxu1 %v4672_v53  ;;  %v2446_v53 = vld [vmem:[#allocation6 + $0xe60] sm:$0xff]  ;;  %v4732_v9 = vpack.c.bf16 %v2462_v63, %v2457_v62  ;;  %v2453_v62 = vld [vmem:[#allocation6 + $0xe98] sm:$0xff] }
 0x300   :  { %v4730_v6 = vpack.c.bf16 %v2451_v54, %v2446_v53  ;;  %v2438_v48 = vld [vmem:[#allocation6 + $0xe20] sm:$0xff] }
 0x301   :  { %v2454_v53 = vld [vmem:[#allocation6 + $0xea0] sm:$0xff] }
 0x302   :  { %4675 = vmatpush1.bf16.msra.mxu1 %v4674_v2 }
 0x303   :  { %4677 = vmatprep.subr.bf16.mxu1 %v4676_v4 }
 0x306   :  { %4679 = vmatpush1.bf16.msra.mxu1 %v4678_v10  ;;  %v2456_v10 = vld [vmem:[#allocation6 + $0xeb0] sm:$0xff] }
 0x307   :  { %4705 = vmatprep.subr.bf16.mxu1 %v4704_v12  ;;  %v2461_v12 = vld [vmem:[#allocation6 + $0xed8] sm:$0xff] }
 0x308   :  { %v4734_v14 = vpack.c.bf16 %v2461_v12, %v2456_v10  ;;  %v2458_v10 = vld [vmem:[#allocation6 + $0xec0] sm:$0xff]  ;;  %v2463_v12 = vld [vmem:[#allocation6 + $0xee8] sm:$0xff] }
 0x309   :  { %2304 = vmatmul.mubr.f32.vlgmr.msra.gmra.mrb[4].mxu1 %v5724_v31  ;;  %v4718_v31 = vpack.c.bf16 %v2421_v32, %v2416_v30  ;;  %v2424_v30 = vld [vmem:[#allocation6 + $0xdb0] sm:$0xff] }
 0x30a   :  { %4707 = vmatpush1.bf16.msra.mxu1 %v4706_v15  ;;  %2530 = vmatprep.mubr.f32.mxu1 %v5317_v0  ;;  %v4736_v15 = vpack.c.bf16 %v2394_v13, %v2389_v39  ;;  %v2685_v39 = vld [vmem:[#allocation6 + $0xf08] sm:$0xff]  ;;  %v2690_v13 = vld [vmem:[#allocation6 + $0xf30] sm:$0xff] }
 0x30b   :  { %4709 = vmatprep.subr.bf16.mxu1 %v4708_v41  ;;  %v2388_v41 = vld [vmem:[#allocation6 + $0xc90] sm:$0xff] }
 0x30c   :  { %v4738_v19 = vpack.c.bf16 %v2393_v16, %v2388_v41  ;;  %v2684_v41 = vld [vmem:[#allocation6 + $0xf00] sm:$0xff]  ;;  %v2689_v16 = vld [vmem:[#allocation6 + $0xf28] sm:$0xff] }
 0x30e   :  { %4711 = vmatpush1.bf16.msra.mxu1 %v4710_v21  ;;  %v2403_v21 = vld [vmem:[#allocation6 + $0xd08] sm:$0xff] }
 0x30f   :  { %4713 = vmatprep.subr.bf16.mxu1 %v4712_v22  ;;  %v2409_v22 = vld [vmem:[#allocation6 + $0xd38] sm:$0xff] }
 0x310   :  { %v4744_v26 = vpack.c.bf16 %v2414_v23, %v2409_v22  ;;  %v2710_v22 = vld [vmem:[#allocation6 + $0xfd0] sm:$0xff]  ;;  %v2704_v23 = vld [vmem:[#allocation6 + $0xfa0] sm:$0xff] }
 0x312   :  { %4715 = vmatpush1.bf16.msra.mxu1 %v4714_v28  ;;  %v2413_v28 = vld [vmem:[#allocation6 + $0xd58] sm:$0xff] }
 0x313   :  { %4717 = vmatprep.subr.bf16.mxu1 %v4716_v29  ;;  %v2419_v29 = vld [vmem:[#allocation6 + $0xd88] sm:$0xff]  ;;  %v4746_v32 = vpack.c.bf16 %v2413_v28, %v2408_v27 }
 0x314   :  { %v4748_v33 = vpack.c.bf16 %v2424_v30, %v2419_v29  ;;  %v3333_v27 = vld [vmem:[#allocation9 + $0x88] sm:$0xff]  ;;  %v3316_v28 = vld [vmem:[#allocation9] sm:$0xff] }
 0x316   :  { %4719 = vmatpush1.bf16.msra.mxu1 %v4718_v31  ;;  %v2423_v31 = vld [vmem:[#allocation6 + $0xda8] sm:$0xff] }
 0x317   :  { %4721 = vmatprep.subr.bf16.mxu1 %v4720_v42  ;;  %v2429_v42 = vld [vmem:[#allocation6 + $0xdd8] sm:$0xff]  ;;  %v4750_v43 = vpack.c.bf16 %v2423_v31, %v2418_v37 }
 0x318   :  { %v4752_v24 = vpack.c.bf16 %v2434_v52, %v2429_v42  ;;  %v3335_v37 = vld [vmem:[#allocation9 + $0x98] sm:$0xff] }
 0x31a   :  { %4723 = vmatpush1.bf16.msra.mxu1 %v4722_v35  ;;  %v2433_v35 = vld [vmem:[#allocation6 + $0xdf8] sm:$0xff] }
 0x31b   :  { %4725 = vmatprep.subr.bf16.mxu1 %v4724_v40  ;;  %v2439_v40 = vld [vmem:[#allocation6 + $0xe28] sm:$0xff]  ;;  %v4754_v46 = vpack.c.bf16 %v2433_v35, %v2428_v44  ;;  %v2715_v44 = vld [vmem:[#allocation6 + $0xff8] sm:$0xff]  ;;  %v2720_v35 = vld [vmem:[#allocation6 + $0x1020] sm:$0xff] }
 0x31c   :  { %v1487_v55 = vpop.f32.mrb[6].mxu1  ;;  %v2078_v7 = vpop.f32.mrb[38].mxu0  ;;  %v4756_v47 = vpack.c.bf16 %v2444_v45, %v2439_v40  ;;  %v3337_v40 = vld [vmem:[#allocation9 + $0xa8] sm:$0xff] }
 0x31d   :  { %v1488_v2 = vadd.f32 %v1487_v55, %v5829_v58  ;;  %v3982_v4 = vpop.f32.mrb[7].mxu1  ;;  %v4052_v5 = vpop.f32.mrb[39].mxu0  ;;  %v2399_v58 = vld [vmem:[#allocation6 + $0xce8] sm:$0xff] }
 0x31e   :  { %4727 = vmatpush1.bf16.msra.mxu1 %v4726_v49  ;;  %v4740_v20 = vpack.c.bf16 %v2404_v17, %v2399_v58  ;;  %v2443_v49 = vld [vmem:[#allocation6 + $0xe48] sm:$0xff]  ;;  %v2464_v4 = vld [vmem:[#allocation6 + $0xef0] sm:$0xff]  ;;  %v2695_v58 = vld [vmem:[#allocation6 + $0xf58] sm:$0xff] }
 0x31f   :  { %v1788_v8 = vadd.f32 %v5844_v56, %v1488_v2  ;;  %4729 = vmatprep.subr.bf16.mxu1 %v4728_v51  ;;  %v2398_v56 = vld [vmem:[#allocation6 + $0xce0] sm:$0xff]  ;;  %v2449_v51 = vld [vmem:[#allocation6 + $0xe78] sm:$0xff]  ;;  %v4758_v54 = vpack.c.bf16 %v2443_v49, %v2438_v48  ;;  %v2459_v2 = vld [vmem:[#allocation6 + $0xec8] sm:$0xff] }
 0x320   :  { %v4742_v25 = vpack.c.bf16 %v2403_v21, %v2398_v56  ;;  %v4760_v55 = vpack.c.bf16 %v2454_v53, %v2449_v51  ;;  %v2700_v17 = vld [vmem:[#allocation6 + $0xf80] sm:$0xff]  ;;  %v2699_v56 = vld [vmem:[#allocation6 + $0xf78] sm:$0xff]  ;;  %v2705_v21 = vld [vmem:[#allocation6 + $0xfa8] sm:$0xff]  ;;  %v4804_v53 = vpack.c.bf16 %v2720_v35, %v2715_v44 }
 0x321   :  { %v2086_v59 = vadd.f32 %v2078_v7, %v1788_v8  ;;  %v2448_v7 = vld [vmem:[#allocation6 + $0xe70] sm:$0xff]  ;;  %v4800_v31 = vpack.c.bf16 %v2710_v22, %v2705_v21  ;;  %v3320_v49 = vld [vmem:[#allocation9 + $0x20] sm:$0xff]  ;;  %v2739_v21 = vld [vmem:[#allocation6 + $0x10b8] sm:$0xff] }
 0x322   :  { %4731 = vmatpush1.bf16.msra.mxu1 %v4730_v6  ;;  %v4762_v8 = vpack.c.bf16 %v2453_v62, %v2448_v7  ;;  %v3321_v51 = vld [vmem:[#allocation9 + $0x28] sm:$0xff]  ;;  %v3339_v7 = vld [vmem:[#allocation9 + $0xb8] sm:$0xff]  ;;  %v3342_v22 = vld [vmem:[#allocation9 + $0xd0] sm:$0xff] }
 0x323   :  { %4733 = vmatprep.subr.bf16.mxu1 %v4732_v9  ;;  %v4764_v9 = vpack.c.bf16 %v2464_v4, %v2459_v2  ;;  %v2725_v62 = vld [vmem:[#allocation6 + $0x1048] sm:$0xff]  ;;  %v4978_v2 = vpack.c.bf16 %v3321_v51, %v3320_v49 }
 0x326   :  { %4735 = vmatpush1.bf16.msra.mxu1 %v4734_v14  ;;  %v4766_v14 = vpack.c.bf16 %v2463_v12, %v2458_v10  ;;  %v3323_v10 = vld [vmem:[#allocation9 + $0x38] sm:$0xff] }
 0x327   :  { %4737 = vmatprep.subr.bf16.mxu1 %v4736_v15  ;;  %v4792_v15 = vpack.c.bf16 %v2690_v13, %v2685_v39  ;;  %v2729_v39 = vld [vmem:[#allocation6 + $0x1068] sm:$0xff] }
 0x328   :  { %v3340_v13 = vld [vmem:[#allocation9 + $0xc0] sm:$0xff] }
 0x329   :  { %2531 = vmatmul.mubr.f32.vlgmr.msra.gmra.mrb[2].mxu1 %v5730_v11 }
 0x32a   :  { %4739 = vmatpush1.bf16.msra.mxu1 %v4738_v19  ;;  %2601 = vmatprep.mubr.f32.mxu1 %v5317_v0  ;;  %v4796_v19 = vpack.c.bf16 %v2700_v17, %v2695_v58  ;;  %v2734_v17 = vld [vmem:[#allocation6 + $0x1090] sm:$0xff] }
 0x32b   :  { %4741 = vmatprep.subr.bf16.mxu1 %v4740_v20  ;;  %v2694_v20 = vld [vmem:[#allocation6 + $0xf50] sm:$0xff] }
 0x32c   :  { %v4798_v29 = vpack.c.bf16 %v2699_v56, %v2694_v20  ;;  %v3325_v20 = vld [vmem:[#allocation9 + $0x48] sm:$0xff] }
 0x32e   :  { %4743 = vmatpush1.bf16.msra.mxu1 %v4742_v25  ;;  %v2709_v25 = vld [vmem:[#allocation6 + $0xfc8] sm:$0xff] }
 0x32f   :  { %4745 = vmatprep.subr.bf16.mxu1 %v4744_v26  ;;  %v3332_v26 = vld [vmem:[#allocation9 + $0x80] sm:$0xff] }
 0x330   :  { %v4968_v30 = vpack.c.bf16 %v3333_v27, %v3332_v26  ;;  %v2750_v26 = vld [vmem:[#allocation6 + $0x1110] sm:$0xff] }
 0x332   :  { %4747 = vmatpush1.bf16.msra.mxu1 %v4746_v32  ;;  %v3317_v32 = vld [vmem:[#allocation9 + $0x8] sm:$0xff]  ;;  %4969 = vmatprep.subr.bf16.mxu0 %v4968_v30  ;;  %v3326_v30 = vld [vmem:[#allocation9 + $0x50] sm:$0xff] }
 0x333   :  { %4749 = vmatprep.subr.bf16.mxu1 %v4748_v33  ;;  %v3334_v33 = vld [vmem:[#allocation9 + $0x90] sm:$0xff]  ;;  %v4970_v42 = vpack.c.bf16 %v3317_v32, %v3316_v28  ;;  %v4814_v28 = vpack.c.bf16 %v2739_v21, %v2734_v17  ;;  %v3327_v32 = vld [vmem:[#allocation9 + $0x58] sm:$0xff]  ;;  %v2737_v21 = vld [vmem:[#allocation6 + $0x10a8] sm:$0xff] }
 0x334   :  { %v4972_v52 = vpack.c.bf16 %v3335_v37, %v3334_v33  ;;  %v2744_v37 = vld [vmem:[#allocation6 + $0x10e0] sm:$0xff]  ;;  %v4990_v44 = vpack.c.bf16 %v3327_v32, %v3326_v30 }
 0x335   :  { %4971 = vmatpush3.bf16.msra.mxu0 %v4970_v42  ;;  %v2732_v17 = vld [vmem:[#allocation6 + $0x1080] sm:$0xff] }
 0x336   :  { %4751 = vmatpush1.bf16.msra.mxu1 %v4750_v43  ;;  %v3318_v43 = vld [vmem:[#allocation9 + $0x10] sm:$0xff]  ;;  %4973 = vmatprep.subr.bf16.mxu0 %v4972_v52 }
 0x337   :  { %4753 = vmatprep.subr.bf16.mxu1 %v4752_v24  ;;  %v3319_v24 = vld [vmem:[#allocation9 + $0x18] sm:$0xff] }
 0x338   :  { %v4974_v45 = vpack.c.bf16 %v3319_v24, %v3318_v43  ;;  %v2755_v52 = vld [vmem:[#allocation6 + $0x1138] sm:$0xff]  ;;  %v2760_v43 = vld [vmem:[#allocation6 + $0x1160] sm:$0xff] }
 0x33a   :  { %4755 = vmatpush1.bf16.msra.mxu1 %v4754_v46  ;;  %v4802_v46 = vpack.c.bf16 %v2709_v25, %v2704_v23  ;;  %4975 = vmatpush3.bf16.msra.mxu0 %v4974_v45  ;;  %v3343_v23 = vld [vmem:[#allocation9 + $0xd8] sm:$0xff]  ;;  %v2745_v25 = vld [vmem:[#allocation6 + $0x10e8] sm:$0xff]  ;;  %v2754_v45 = vld [vmem:[#allocation6 + $0x1130] sm:$0xff] }
 0x33b   :  { %4757 = vmatprep.subr.bf16.mxu1 %v4756_v47  ;;  %v2714_v47 = vld [vmem:[#allocation6 + $0xff0] sm:$0xff]  ;;  %v4816_v33 = vpack.c.bf16 %v2750_v26, %v2745_v25  ;;  %v2736_v26 = vld [vmem:[#allocation6 + $0x10a0] sm:$0xff] }
 0x33c   :  { %v2376_v63 = vpop.f32.mrb[40].mxu0 }
 0x33d   :  { %v5852_v5 = vadd.f32 %v2376_v63, %v2086_v59  ;;  %v4087_v6 = vpop.f32.mrb[41].mxu0  ;;  %v4794_v59 = vpack.c.bf16 %v2689_v16, %v2684_v41  ;;  %v2730_v63 = vld [vmem:[#allocation6 + $0x1070] sm:$0xff]  ;;  %v2740_v41 = vld [vmem:[#allocation6 + $0x10c0] sm:$0xff] }
 0x33e   :  { %4759 = vmatpush1.bf16.msra.mxu1 %v4758_v54  ;;  %v2719_v54 = vld [vmem:[#allocation6 + $0x1018] sm:$0xff]  ;;  %v2724_v6 = vld [vmem:[#allocation6 + $0x1040] sm:$0xff]  ;;  %v4808_v12 = vpack.c.bf16 %v2730_v63, %v2725_v62 }
 0x33f   :  { %4761 = vmatprep.subr.bf16.mxu1 %v4760_v55  ;;  %v3338_v55 = vld [vmem:[#allocation9 + $0xb0] sm:$0xff]  ;;  %v4806_v4 = vpack.c.bf16 %v2719_v54, %v2714_v47  ;;  %v4810_v58 = vpack.c.bf16 %v2729_v39, %v2724_v6  ;;  %v2697_v54 = vld [vmem:[#allocation6 + $0xf68] sm:$0xff]  ;;  %v2696_v63 = vld [vmem:[#allocation6 + $0xf60] sm:$0xff] }
 0x340   :  { %v2687_v47 = vld [vmem:[#allocation6 + $0xf18] sm:$0xff]  ;;  %v2712_v6 = vld [vmem:[#allocation6 + $0xfe0] sm:$0xff]  ;;  %v2717_v39 = vld [vmem:[#allocation6 + $0x1008] sm:$0xff] }
 0x342   :  { %4763 = vmatpush1.bf16.msra.mxu1 %v4762_v8  ;;  %v4980_v8 = vpack.c.bf16 %v3339_v7, %v3338_v55  ;;  %v2702_v55 = vld [vmem:[#allocation6 + $0xf90] sm:$0xff] }
 0x343   :  { %4765 = vmatprep.subr.bf16.mxu1 %v4764_v9  ;;  %v3322_v9 = vld [vmem:[#allocation9 + $0x30] sm:$0xff]  ;;  %v4828_v62 = vpack.c.bf16 %v2702_v55, %v2697_v54  ;;  %v2998_v54 = vld [vmem:[#allocation6 + $0x1200] sm:$0xff] }
 0x344   :  { %v4982_v16 = vpack.c.bf16 %v3323_v10, %v3322_v9  ;;  %v2706_v10 = vld [vmem:[#allocation6 + $0xfb0] sm:$0xff] }
 0x346   :  { %4767 = vmatpush1.bf16.msra.mxu1 %v4766_v14  ;;  %v3341_v14 = vld [vmem:[#allocation9 + $0xc8] sm:$0xff] }
 0x347   :  { %4793 = vmatprep.subr.bf16.mxu1 %v4792_v15  ;;  %v2735_v15 = vld [vmem:[#allocation6 + $0x1098] sm:$0xff] }
 0x348   :  { %v4812_v56 = vpack.c.bf16 %v2740_v41, %v2735_v15  ;;  %v2716_v41 = vld [vmem:[#allocation6 + $0x1000] sm:$0xff] }
 0x349   :  { %2602 = vmatmul.mubr.f32.vlgmr.msra.gmra.mrb[4].mxu1 %v5730_v11  ;;  %v3336_v11 = vld [vmem:[#allocation9 + $0xa0] sm:$0xff] }
 0x34a   :  { %4795 = vmatpush1.bf16.msra.mxu1 %v4794_v59  ;;  %2828 = vmatprep.mubr.f32.mxu1 %v5317_v0  ;;  %v4976_v48 = vpack.c.bf16 %v3337_v40, %v3336_v11  ;;  %v4984_v59 = vpack.c.bf16 %v3341_v14, %v3340_v13  ;;  %v4820_v40 = vpack.c.bf16 %v2760_v43, %v2755_v52  ;;  %v2722_v13 = vld [vmem:[#allocation6 + $0x1030] sm:$0xff] }
 0x34b   :  { %4797 = vmatprep.subr.bf16.mxu1 %v4796_v19  ;;  %v3324_v19 = vld [vmem:[#allocation9 + $0x40] sm:$0xff]  ;;  %v4836_v15 = vpack.c.bf16 %v2722_v13, %v2717_v39  ;;  %v2762_v52 = vld [vmem:[#allocation6 + $0x1170] sm:$0xff] }
 0x34c   :  { %4977 = vmatprep.subr.bf16.mxu0 %v4976_v48  ;;  %v4986_v27 = vpack.c.bf16 %v3325_v20, %v3324_v19  ;;  %v2692_v48 = vld [vmem:[#allocation6 + $0xf40] sm:$0xff]  ;;  %v2726_v20 = vld [vmem:[#allocation6 + $0x1050] sm:$0xff] }
 0x34d   :  { %4979 = vmatpush3.bf16.msra.mxu0 %v4978_v2  ;;  %v4824_v51 = vpack.c.bf16 %v2692_v48, %v2687_v47  ;;  %v2701_v2 = vld [vmem:[#allocation6 + $0xf88] sm:$0xff]  ;;  %v2988_v47 = vld [vmem:[#allocation6 + $0x11b0] sm:$0xff] }
 0x34e   :  { %4799 = vmatpush1.bf16.msra.mxu1 %v4798_v29  ;;  %4981 = vmatprep.subr.bf16.mxu0 %v4980_v8  ;;  %v4988_v29 = vpack.c.bf16 %v3343_v23, %v3342_v22  ;;  %v4830_v8 = vpack.c.bf16 %v2701_v2, %v2696_v63  ;;  %v2742_v22 = vld [vmem:[#allocation6 + $0x10d0] sm:$0xff]  ;;  %v3003_v63 = vld [vmem:[#allocation6 + $0x1228] sm:$0xff] }
 0x34f   :  { %4801 = vmatprep.subr.bf16.mxu1 %v4800_v31  ;;  %v2749_v31 = vld [vmem:[#allocation6 + $0x1108] sm:$0xff]  ;;  %v4844_v25 = vpack.c.bf16 %v2742_v22, %v2737_v21  ;;  %v3008_v2 = vld [vmem:[#allocation6 + $0x1250] sm:$0xff] }
 0x350   :  { %v4818_v35 = vpack.c.bf16 %v2749_v31, %v2744_v37  ;;  %v2751_v37 = vld [vmem:[#allocation6 + $0x1118] sm:$0xff]  ;;  %v3032_v22 = vld [vmem:[#allocation6 + $0x1310] sm:$0xff] }
 0x351   :  { %4983 = vmatpush3.bf16.msra.mxu0 %v4982_v16  ;;  %v2721_v16 = vld [vmem:[#allocation6 + $0x1028] sm:$0xff] }
 0x352   :  { %4803 = vmatpush1.bf16.msra.mxu1 %v4802_v46  ;;  %4985 = vmatprep.subr.bf16.mxu0 %v4984_v59  ;;  %v2759_v46 = vld [vmem:[#allocation6 + $0x1158] sm:$0xff]  ;;  %v4838_v59 = vpack.c.bf16 %v2721_v16, %v2716_v41  ;;  %v3023_v41 = vld [vmem:[#allocation6 + $0x12c8] sm:$0xff]  ;;  %v3028_v16 = vld [vmem:[#allocation6 + $0x12f0] sm:$0xff] }
 0x353   :  { %4805 = vmatprep.subr.bf16.mxu1 %v4804_v53  ;;  %v4822_v49 = vpack.c.bf16 %v2759_v46, %v2754_v45  ;;  %v2686_v53 = vld [vmem:[#allocation6 + $0xf10] sm:$0xff]  ;;  %v2761_v45 = vld [vmem:[#allocation6 + $0x1168] sm:$0xff] }
 0x354   :  { %v2983_v46 = vld [vmem:[#allocation6 + $0x1188] sm:$0xff] }
 0x355   :  { %4987 = vmatpush3.bf16.msra.mxu0 %v4986_v27  ;;  %v2741_v27 = vld [vmem:[#allocation6 + $0x10c8] sm:$0xff] }
 0x356   :  { %4807 = vmatpush1.bf16.msra.mxu1 %v4806_v4  ;;  %4989 = vmatprep.subr.bf16.mxu0 %v4988_v29  ;;  %v2707_v4 = vld [vmem:[#allocation6 + $0xfb8] sm:$0xff]  ;;  %v2752_v29 = vld [vmem:[#allocation6 + $0x1120] sm:$0xff]  ;;  %v4846_v30 = vpack.c.bf16 %v2741_v27, %v2736_v26  ;;  %v3048_v26 = vld [vmem:[#allocation6 + $0x1390] sm:$0xff] }
 0x357   :  { %4809 = vmatprep.subr.bf16.mxu1 %v4808_v12  ;;  %v4832_v9 = vpack.c.bf16 %v2712_v6, %v2707_v4  ;;  %v2711_v12 = vld [vmem:[#allocation6 + $0xfd8] sm:$0xff]  ;;  %v4888_v6 = vpack.c.bf16 %v3008_v2, %v3003_v63  ;;  %v3004_v2 = vld [vmem:[#allocation6 + $0x1230] sm:$0xff] }
 0x358   :  { %v4834_v14 = vpack.c.bf16 %v2711_v12, %v2706_v10  ;;  %v3013_v10 = vld [vmem:[#allocation6 + $0x1278] sm:$0xff]  ;;  %v3018_v12 = vld [vmem:[#allocation6 + $0x12a0] sm:$0xff] }
 0x359   :  { %4991 = vmatpush3.bf16.msra.mxu0 %v4990_v44  ;;  %v4892_v13 = vpack.c.bf16 %v3018_v12, %v3013_v10  ;;  %v3014_v12 = vld [vmem:[#allocation6 + $0x1280] sm:$0xff] }
 0x35a   :  { %4811 = vmatpush1.bf16.msra.mxu1 %v4810_v58  ;;  %v2727_v58 = vld [vmem:[#allocation6 + $0x1058] sm:$0xff] }
 0x35b   :  { %4813 = vmatprep.subr.bf16.mxu1 %v4812_v56  ;;  %v4840_v19 = vpack.c.bf16 %v2732_v17, %v2727_v58  ;;  %v2731_v56 = vld [vmem:[#allocation6 + $0x1078] sm:$0xff]  ;;  %v4896_v58 = vpack.c.bf16 %v3028_v16, %v3023_v41  ;;  %v3022_v17 = vld [vmem:[#allocation6 + $0x12c0] sm:$0xff]  ;;  %v3024_v16 = vld [vmem:[#allocation6 + $0x12d0] sm:$0xff] }
 0x35c   :  { %v2674_v42 = vpop.f32.mrb[42].mxu0  ;;  %v4842_v23 = vpack.c.bf16 %v2731_v56, %v2726_v20  ;;  %v3038_v20 = vld [vmem:[#allocation6 + $0x1340] sm:$0xff] }
 0x35d   :  { %v5857_v24 = vadd.f32 %v2674_v42, %v5852_v5  ;;  %v4122_v11 = vpop.f32.mrb[43].mxu0  ;;  %v2691_v5 = vld [vmem:[#allocation6 + $0xf38] sm:$0xff]  ;;  %v2757_v42 = vld [vmem:[#allocation6 + $0x1148] sm:$0xff] }
 0x35e   :  { %4815 = vmatpush1.bf16.msra.mxu1 %v4814_v28  ;;  %v4826_v7 = vpack.c.bf16 %v2691_v5, %v2686_v53  ;;  %v2747_v28 = vld [vmem:[#allocation6 + $0x10f8] sm:$0xff]  ;;  %v2987_v53 = vld [vmem:[#allocation6 + $0x11a8] sm:$0xff] }
 0x35f   :  { %4817 = vmatprep.subr.bf16.mxu1 %v4816_v33  ;;  %v4848_v32 = vpack.c.bf16 %v2752_v29, %v2747_v28  ;;  %v2746_v33 = vld [vmem:[#allocation6 + $0x10f0] sm:$0xff]  ;;  %v2993_v5 = vld [vmem:[#allocation6 + $0x11d8] sm:$0xff]  ;;  %v3042_v29 = vld [vmem:[#allocation6 + $0x1360] sm:$0xff] }
 0x360   :  { %v4850_v44 = vpack.c.bf16 %v2751_v37, %v2746_v33  ;;  %v4884_v55 = vpack.c.bf16 %v2998_v54, %v2993_v5  ;;  %v3053_v33 = vld [vmem:[#allocation6 + $0x13b8] sm:$0xff]  ;;  %v3058_v37 = vld [vmem:[#allocation6 + $0x13e0] sm:$0xff] }
 0x361   :  { %v2994_v54 = vld [vmem:[#allocation6 + $0x11e0] sm:$0xff] }
 0x362   :  { %4819 = vmatpush1.bf16.msra.mxu1 %v4818_v35  ;;  %v4852_v35 = vpack.c.bf16 %v2762_v52, %v2757_v42 }
 0x363   :  { %4821 = vmatprep.subr.bf16.mxu1 %v4820_v40  ;;  %v2756_v40 = vld [vmem:[#allocation6 + $0x1140] sm:$0xff] }
 0x364   :  { %v4854_v48 = vpack.c.bf16 %v2761_v45, %v2756_v40  ;;  %v2985_v40 = vld [vmem:[#allocation6 + $0x1198] sm:$0xff]  ;;  %v2990_v45 = vld [vmem:[#allocation6 + $0x11c0] sm:$0xff] }
 0x366   :  { %4823 = vmatpush1.bf16.msra.mxu1 %v4822_v49  ;;  %v4880_v49 = vpack.c.bf16 %v2988_v47, %v2983_v46  ;;  %v4912_v47 = vpack.c.bf16 %v2990_v45, %v2985_v40  ;;  %v3329_v40 = vld [vmem:[#allocation9 + $0x68] sm:$0xff] }
 0x367   :  { %4825 = vmatprep.subr.bf16.mxu1 %v4824_v51  ;;  %v2982_v51 = vld [vmem:[#allocation6 + $0x1180] sm:$0xff] }
 0x369   :  { %2829 = vmatmul.mubr.f32.vlgmr.msra.gmra.mrb[2].mxu1 %v5743_v50 }
 0x36a   :  { %4827 = vmatpush1.bf16.msra.mxu1 %v4826_v7  ;;  %2899 = vmatprep.mubr.f32.mxu1 %v5317_v0  ;;  %v2992_v7 = vld [vmem:[#allocation6 + $0x11d0] sm:$0xff] }
 0x36b   :  { %4829 = vmatprep.subr.bf16.mxu1 %v4828_v62  ;;  %v2997_v62 = vld [vmem:[#allocation6 + $0x11f8] sm:$0xff] }
 0x36c   :  { %v4886_v4 = vpack.c.bf16 %v2997_v62, %v2992_v7  ;;  %v3010_v7 = vld [vmem:[#allocation6 + $0x1260] sm:$0xff] }
 0x36e   :  { %4831 = vmatpush1.bf16.msra.mxu1 %v4830_v8  ;;  %v3002_v8 = vld [vmem:[#allocation6 + $0x1220] sm:$0xff] }
 0x36f   :  { %4833 = vmatprep.subr.bf16.mxu1 %v4832_v9  ;;  %v3007_v9 = vld [vmem:[#allocation6 + $0x1248] sm:$0xff] }
 0x370   :  { %v4890_v39 = vpack.c.bf16 %v3007_v9, %v3002_v8  ;;  %v3020_v8 = vld [vmem:[#allocation6 + $0x12b0] sm:$0xff] }
 0x372   :  { %4835 = vmatpush1.bf16.msra.mxu1 %v4834_v14  ;;  %v3012_v14 = vld [vmem:[#allocation6 + $0x1270] sm:$0xff] }
 0x373   :  { %4837 = vmatprep.subr.bf16.mxu1 %v4836_v15  ;;  %v3017_v15 = vld [vmem:[#allocation6 + $0x1298] sm:$0xff] }
 0x376   :  { %4839 = vmatpush1.bf16.msra.mxu1 %v4838_v59  ;;  %v3027_v59 = vld [vmem:[#allocation6 + $0x12e8] sm:$0xff] }
 0x377   :  { %4841 = vmatprep.subr.bf16.mxu1 %v4840_v19  ;;  %v3033_v19 = vld [vmem:[#allocation6 + $0x1318] sm:$0xff]  ;;  %v4898_v56 = vpack.c.bf16 %v3027_v59, %v3022_v17  ;;  %v3040_v17 = vld [vmem:[#allocation6 + $0x1350] sm:$0xff] }
 0x378   :  { %v4900_v21 = vpack.c.bf16 %v3038_v20, %v3033_v19  ;;  %v3034_v20 = vld [vmem:[#allocation6 + $0x1320] sm:$0xff] }
 0x37a   :  { %4843 = vmatpush1.bf16.msra.mxu1 %v4842_v23  ;;  %v3037_v23 = vld [vmem:[#allocation6 + $0x1338] sm:$0xff] }
 0x37b   :  { %4845 = vmatprep.subr.bf16.mxu1 %v4844_v25  ;;  %v3043_v25 = vld [vmem:[#allocation6 + $0x1368] sm:$0xff]  ;;  %v4902_v27 = vpack.c.bf16 %v3037_v23, %v3032_v22  ;;  %v3050_v22 = vld [vmem:[#allocation6 + $0x13a0] sm:$0xff] }
 0x37c   :  { %v2972_v31 = vpop.f32.mrb[44].mxu0  ;;  %v4904_v28 = vpack.c.bf16 %v3048_v26, %v3043_v25  ;;  %v3044_v26 = vld [vmem:[#allocation6 + $0x1370] sm:$0xff] }
 0x37d   :  { %v5862_v43 = vadd.f32 %v2972_v31, %v5857_v24  ;;  %v4157_v11 = vpop.f32.mrb[45].mxu0  ;;  %v4882_v24 = vpack.c.bf16 %v2987_v53, %v2982_v51  ;;  %v2995_v51 = vld [vmem:[#allocation6 + $0x11e8] sm:$0xff]  ;;  %v3000_v53 = vld [vmem:[#allocation6 + $0x1210] sm:$0xff] }
 0x37e   :  { %4847 = vmatpush1.bf16.msra.mxu1 %v4846_v30  ;;  %v3047_v30 = vld [vmem:[#allocation6 + $0x1388] sm:$0xff]  ;;  %v4908_v11 = vpack.c.bf16 %v3058_v37, %v3053_v33  ;;  %v4916_v5 = vpack.c.bf16 %v3000_v53, %v2995_v51  ;;  %v3054_v33 = vld [vmem:[#allocation6 + $0x13c0] sm:$0xff] }
 0x37f   :  { %4849 = vmatprep.subr.bf16.mxu1 %v4848_v32  ;;  %v4906_v52 = vpack.c.bf16 %v3047_v30, %v3042_v29  ;;  %v3060_v29 = vld [vmem:[#allocation6 + $0x13f0] sm:$0xff]  ;;  %v3059_v37 = vld [vmem:[#allocation6 + $0x13e8] sm:$0xff]  ;;  %v3331_v51 = vld [vmem:[#allocation9 + $0x78] sm:$0xff] }
 0x382   :  { %4851 = vmatpush1.bf16.msra.mxu1 %v4850_v44  ;;  %v3052_v44 = vld [vmem:[#allocation6 + $0x13b0] sm:$0xff] }
 0x383   :  { %4853 = vmatprep.subr.bf16.mxu1 %v4852_v35  ;;  %v3057_v35 = vld [vmem:[#allocation6 + $0x13d8] sm:$0xff] }
 0x384   :  { %v4910_v46 = vpack.c.bf16 %v3057_v35, %v3052_v44  ;;  %v3328_v35 = vld [vmem:[#allocation9 + $0x60] sm:$0xff] }
 0x385   :  { %v4994_v45 = vpack.c.bf16 %v3329_v40, %v3328_v35  ;;  %v3291_v35 = vsub.s32 2, %v5678_v34 }
 0x386   :  { %4855 = vmatpush1.bf16.msra.mxu1 %v4854_v48  ;;  %v2984_v48 = vld [vmem:[#allocation6 + $0x1190] sm:$0xff] }
 0x387   :  { %4881 = vmatprep.subr.bf16.mxu1 %v4880_v49  ;;  %v2989_v49 = vld [vmem:[#allocation6 + $0x11b8] sm:$0xff] }
 0x389   :  { %2900 = vmatmul.mubr.f32.vlgmr.msra.gmra.mrb[4].mxu1 %v5743_v50  ;;  %v4894_v50 = vpack.c.bf16 %v3017_v15, %v3012_v14  ;;  %v3030_v14 = vld [vmem:[#allocation6 + $0x1300] sm:$0xff] }
 0x38a   :  { %4883 = vmatpush1.bf16.msra.mxu1 %v4882_v24  ;;  %3126 = vmatprep.mubr.f32.mxu1 %v5317_v0  ;;  %v2999_v24 = vld [vmem:[#allocation6 + $0x1208] sm:$0xff] }
 0x38b   :  { %4885 = vmatprep.subr.bf16.mxu1 %v4884_v55  ;;  %v3005_v55 = vld [vmem:[#allocation6 + $0x1238] sm:$0xff]  ;;  %v4918_v62 = vpack.c.bf16 %v2999_v24, %v2994_v54 }
 0x38c   :  { %v4920_v63 = vpack.c.bf16 %v3010_v7, %v3005_v55 }
 0x38e   :  { %4887 = vmatpush1.bf16.msra.mxu1 %v4886_v4  ;;  %v3009_v4 = vld [vmem:[#allocation6 + $0x1258] sm:$0xff] }
 0x38f   :  { %4889 = vmatprep.subr.bf16.mxu1 %v4888_v6  ;;  %v3015_v6 = vld [vmem:[#allocation6 + $0x1288] sm:$0xff]  ;;  %v4922_v9 = vpack.c.bf16 %v3009_v4, %v3004_v2 }
 0x390   :  { %v4924_v10 = vpack.c.bf16 %v3020_v8, %v3015_v6  ;;  %v3348_v6 = vld [vmem:[#allocation9 + $0x100] sm:$0xff]  ;;  %v3349_v8 = vld [vmem:[#allocation9 + $0x108] sm:$0xff] }
 0x392   :  { %4891 = vmatpush1.bf16.msra.mxu1 %v4890_v39  ;;  %v3019_v39 = vld [vmem:[#allocation6 + $0x12a8] sm:$0xff] }
 0x393   :  { %4893 = vmatprep.subr.bf16.mxu1 %v4892_v13  ;;  %v3025_v13 = vld [vmem:[#allocation6 + $0x12d8] sm:$0xff]  ;;  %v4926_v15 = vpack.c.bf16 %v3019_v39, %v3014_v12 }
 0x394   :  { %v4928_v41 = vpack.c.bf16 %v3030_v14, %v3025_v13  ;;  %v3367_v12 = vld [vmem:[#allocation9 + $0x198] sm:$0xff]  ;;  %v5002_v13 = vpack.c.bf16 %v3349_v8, %v3348_v6  ;;  %v3380_v6 = vld [vmem:[#allocation9 + $0x200] sm:$0xff]  ;;  %v3381_v8 = vld [vmem:[#allocation9 + $0x208] sm:$0xff] }
 0x396   :  { %4895 = vmatpush1.bf16.msra.mxu1 %v4894_v50  ;;  %v3029_v50 = vld [vmem:[#allocation6 + $0x12f8] sm:$0xff] }
 0x397   :  { %4897 = vmatprep.subr.bf16.mxu1 %v4896_v58  ;;  %v3035_v58 = vld [vmem:[#allocation6 + $0x1328] sm:$0xff]  ;;  %v4930_v59 = vpack.c.bf16 %v3029_v50, %v3024_v16 }
 0x398   :  { %v4932_v19 = vpack.c.bf16 %v3040_v17, %v3035_v58  ;;  %v3368_v16 = vld [vmem:[#allocation9 + $0x1a0] sm:$0xff]  ;;  %v3353_v58 = vld [vmem:[#allocation9 + $0x128] sm:$0xff]  ;;  %v3370_v17 = vld [vmem:[#allocation9 + $0x1b0] sm:$0xff] }
 0x399   :  { %v3352_v50 = vld [vmem:[#allocation9 + $0x120] sm:$0xff] }
 0x39a   :  { %4899 = vmatpush1.bf16.msra.mxu1 %v4898_v56  ;;  %v3039_v56 = vld [vmem:[#allocation6 + $0x1348] sm:$0xff] }
 0x39b   :  { %4901 = vmatprep.subr.bf16.mxu1 %v4900_v21  ;;  %v3045_v21 = vld [vmem:[#allocation6 + $0x1378] sm:$0xff]  ;;  %v4934_v23 = vpack.c.bf16 %v3039_v56, %v3034_v20 }
 0x39c   :  { %v3270_v32 = vpop.f32.mrb[46].mxu0  ;;  %v4936_v25 = vpack.c.bf16 %v3050_v22, %v3045_v21  ;;  %v3354_v56 = vld [vmem:[#allocation9 + $0x130] sm:$0xff]  ;;  %v3355_v21 = vld [vmem:[#allocation9 + $0x138] sm:$0xff]  ;;  %v3372_v22 = vld [vmem:[#allocation9 + $0x1c0] sm:$0xff] }
 0x39d   :  { %v5867_v31 = vadd.f32 %v3270_v32, %v5862_v43  ;;  %v4192_v42 = vpop.f32.mrb[47].mxu0  ;;  %v4914_v43 = vpack.c.bf16 %v2989_v49, %v2984_v48  ;;  %v3330_v49 = vld [vmem:[#allocation9 + $0x70] sm:$0xff] }
 0x39e   :  { %4903 = vmatpush1.bf16.msra.mxu1 %v4902_v27  ;;  %v3049_v27 = vld [vmem:[#allocation6 + $0x1398] sm:$0xff]  ;;  %v4942_v42 = vpack.c.bf16 %v3059_v37, %v3054_v33  ;;  %v4998_v53 = vpack.c.bf16 %v3331_v51, %v3330_v49 }
 0x39f   :  { %4905 = vmatprep.subr.bf16.mxu1 %v4904_v28  ;;  %v3055_v28 = vld [vmem:[#allocation6 + $0x13c8] sm:$0xff]  ;;  %v4938_v30 = vpack.c.bf16 %v3049_v27, %v3044_v26  ;;  %v3358_v37 = vld [vmem:[#allocation9 + $0x150] sm:$0xff]  ;;  %v3379_v49 = vld [vmem:[#allocation9 + $0x1f8] sm:$0xff] }
 0x3a0   :  { %v4940_v32 = vpack.c.bf16 %v3060_v29, %v3055_v28  ;;  %v3356_v27 = vld [vmem:[#allocation9 + $0x140] sm:$0xff]  ;;  %v3357_v28 = vld [vmem:[#allocation9 + $0x148] sm:$0xff]  ;;  %v3374_v29 = vld [vmem:[#allocation9 + $0x1d0] sm:$0xff] }
 0x3a2   :  { %4907 = vmatpush1.bf16.msra.mxu1 %v4906_v52  ;;  %v3344_v52 = vld [vmem:[#allocation9 + $0xe0] sm:$0xff] }
 0x3a3   :  { %4909 = vmatprep.subr.bf16.mxu1 %v4908_v11  ;;  %v3345_v11 = vld [vmem:[#allocation9 + $0xe8] sm:$0xff] }
 0x3a4   :  { %v4992_v44 = vpack.c.bf16 %v3345_v11, %v3344_v52  ;;  %v3376_v52 = vld [vmem:[#allocation9 + $0x1e0] sm:$0xff]  ;;  %v3377_v11 = vld [vmem:[#allocation9 + $0x1e8] sm:$0xff] }
 0x3a5   :  { %v5024_v40 = vpack.c.bf16 %v3377_v11, %v3376_v52 }
 0x3a6   :  { %4911 = vmatpush1.bf16.msra.mxu1 %v4910_v46  ;;  %4993 = vmatprep.subr.bf16.mxu0 %v4992_v44  ;;  %v3346_v46 = vld [vmem:[#allocation9 + $0xf0] sm:$0xff] }
 0x3a7   :  { %4913 = vmatprep.subr.bf16.mxu1 %v4912_v47  ;;  %4995 = vmatpush3.bf16.msra.mxu0 %v4994_v45  ;;  %v3347_v47 = vld [vmem:[#allocation9 + $0xf8] sm:$0xff]  ;;  %v3360_v45 = vld [vmem:[#allocation9 + $0x160] sm:$0xff] }
 0x3a8   :  { %v4996_v48 = vpack.c.bf16 %v3347_v47, %v3346_v46  ;;  %v3361_v46 = vld [vmem:[#allocation9 + $0x168] sm:$0xff]  ;;  %v3295_v47 = vsub.s32 3, %v5678_v34 }
 0x3a9   :  { %3127 = vmatmul.mubr.f32.vlgmr.msra.gmra.mrb[2].mxu1 %v5749_v18  ;;  %v5026_v51 = vpack.c.bf16 %v3361_v46, %v3360_v45 }
 0x3aa   :  { %4915 = vmatpush1.bf16.msra.mxu1 %v4914_v43  ;;  %3197 = vmatprep.mubr.f32.mxu1 %v5317_v0  ;;  %v3364_v43 = vld [vmem:[#allocation9 + $0x180] sm:$0xff] }
 0x3ab   :  { %4917 = vmatprep.subr.bf16.mxu1 %v4916_v5  ;;  %4997 = vmatprep.subr.bf16.mxu0 %v4996_v48  ;;  %v3365_v5 = vld [vmem:[#allocation9 + $0x188] sm:$0xff]  ;;  %v3378_v48 = vld [vmem:[#allocation9 + $0x1f0] sm:$0xff] }
 0x3ac   :  { %4999 = vmatpush3.bf16.msra.mxu0 %v4998_v53  ;;  %v5000_v54 = vpack.c.bf16 %v3365_v5, %v3364_v43  ;;  %v5028_v43 = vpack.c.bf16 %v3379_v49, %v3378_v48  ;;  %v3362_v5 = vld [vmem:[#allocation9 + $0x170] sm:$0xff] }
 0x3ae   :  { %4919 = vmatpush1.bf16.msra.mxu1 %v4918_v62  ;;  %5001 = vmatprep.subr.bf16.mxu0 %v5000_v54  ;;  %v3363_v54 = vld [vmem:[#allocation9 + $0x178] sm:$0xff] }
 0x3af   :  { %4921 = vmatprep.subr.bf16.mxu1 %v4920_v63 }
 0x3b2   :  { %4923 = vmatpush1.bf16.msra.mxu1 %v4922_v9 }
 0x3b3   :  { %4925 = vmatprep.subr.bf16.mxu1 %v4924_v10  ;;  %v3366_v10 = vld [vmem:[#allocation9 + $0x190] sm:$0xff] }
 0x3b6   :  { %4927 = vmatpush1.bf16.msra.mxu1 %v4926_v15  ;;  %v3350_v15 = vld [vmem:[#allocation9 + $0x110] sm:$0xff] }
 0x3b7   :  { %4929 = vmatprep.subr.bf16.mxu1 %v4928_v41  ;;  %v3351_v41 = vld [vmem:[#allocation9 + $0x118] sm:$0xff] }
 0x3ba   :  { %4931 = vmatpush1.bf16.msra.mxu1 %v4930_v59  ;;  %v3371_v59 = vld [vmem:[#allocation9 + $0x1b8] sm:$0xff] }
 0x3bb   :  { %4933 = vmatprep.subr.bf16.mxu1 %v4932_v19  ;;  %v5010_v19 = vpack.c.bf16 %v3353_v58, %v3352_v50  ;;  %v5012_v20 = vpack.c.bf16 %v3371_v59, %v3370_v17  ;;  %v3391_v58 = vld [vmem:[#allocation9 + $0x258] sm:$0xff]  ;;  %v3299_v59 = vsub.s32 4, %v5678_v34 }
 0x3be   :  { %4935 = vmatpush1.bf16.msra.mxu1 %v4934_v23  ;;  %v3373_v23 = vld [vmem:[#allocation9 + $0x1c8] sm:$0xff] }
 0x3bf   :  { %4937 = vmatprep.subr.bf16.mxu1 %v4936_v25  ;;  %v5014_v25 = vpack.c.bf16 %v3355_v21, %v3354_v56  ;;  %v5016_v26 = vpack.c.bf16 %v3373_v23, %v3372_v22  ;;  %v3394_v22 = vld [vmem:[#allocation9 + $0x270] sm:$0xff]  ;;  %v3395_v23 = vld [vmem:[#allocation9 + $0x278] sm:$0xff] }
 0x3c2   :  { %4939 = vmatpush1.bf16.msra.mxu1 %v4938_v30  ;;  %v3375_v30 = vld [vmem:[#allocation9 + $0x1d8] sm:$0xff] }
 0x3c3   :  { %4941 = vmatprep.subr.bf16.mxu1 %v4940_v32  ;;  %v5018_v32 = vpack.c.bf16 %v3357_v28, %v3356_v27  ;;  %v5020_v33 = vpack.c.bf16 %v3375_v30, %v3374_v29  ;;  %v5320_v27 = vmov 17  }
 0x3c4   :  { %5164 = vset.pattern.permute.xlu0 %v5320_v27 }
 0x3c6   :  { %4943 = vmatpush1.bf16.msra.mxu1 %v4942_v42  ;;  %v3359_v42 = vld [vmem:[#allocation9 + $0x158] sm:$0xff] }
 0x3c7   :  { %v5022_v44 = vpack.c.bf16 %v3359_v42, %v3358_v37 }
 0x3c9   :  { %3198 = vmatmul.mubr.f32.vlgmr.msra.gmra.mrb[4].mxu1 %v5749_v18  ;;  %v5872_v18 = vld [vmem:[#allocation7] sm:$0x1f] }
 0x3ca   :  { %v3284_v24 = vrot.slane %v5872_v18, %v817_v36  ;;  %v3288_v7 = vrot.slane %v5872_v18, %v821_v38  ;;  %v5004_v36 = vpack.c.bf16 %v3367_v12, %v3366_v10  ;;  %v3369_v38 = vld [vmem:[#allocation9 + $0x1a8] sm:$0xff]  ;;  %v3292_v53 = vrot.slane %v5872_v18, %v3291_v35 }
 0x3cb   :  { %v5033_v12 = vpack.c.bf16 %v3381_v8, %v3380_v6  ;;  %v3300_v21 = vrot.slane %v5872_v18, %v3299_v59 }
 0x47c   :  { %v3128_v55 = vpop.f32.mrb[2].mxu1 }
 0x47d   :  { %v5056_v62 = vadd.f32 %v3128_v55, %v5827_v57  ;;  %v3130_v63 = vpop.f32.mrb[3].mxu1  ;;  %v5006_v57 = vpack.c.bf16 %v3351_v41, %v3350_v15  ;;  %v3296_v55 = vrot.slane %v5872_v18, %v3295_v47  ;;  %v3386_v41 = vld [vmem:[#allocation9 + $0x230] sm:$0xff] }
 0x47e   :  { %v5057_v2 = vadd.f32 %v3130_v63, %v5831_v61  ;;  %v5008_v61 = vpack.c.bf16 %v3369_v38, %v3368_v16  ;;  %v3387_v16 = vld [vmem:[#allocation9 + $0x238] sm:$0xff] }
 0x47f   :  { %v3306_v4 = vadd.f32 %v5056_v62, %v3284_v24  ;;  %v5042_v38 = vpack.c.bf16 %v3387_v16, %v3386_v41 }
 0x480   :  { %v3307_v9 = vadd.f32 %v5057_v2, %v3288_v7  ;;  %v5030_v2 = vpack.c.bf16 %v3363_v54, %v3362_v5 }
 0x481   :  { %v3311_v14 = vmax.f32 %v3306_v4, 0.0 }
 0x482   :  { %v3312_v39 = vmax.f32 %v3307_v9, 0.0 }
 0x484   :  { %3467 = vmatprep.mubr.f32.mxu0 %v3312_v39 }
 0x485   :  { %3468 = vmatmul.mubr.f32.vlgmr.msra.gmra.mrb[48].mxu0 %v3311_v14  ;;  %v3383_v14 = vld [vmem:[#allocation9 + $0x218] sm:$0xff] }
 0x486   :  { %5003 = vmatpush3.bf16.msra.mxu0 %v5002_v13  ;;  %v3382_v13 = vld [vmem:[#allocation9 + $0x210] sm:$0xff] }
 0x487   :  { %5005 = vmatprep.subr.bf16.mxu0 %v5004_v36  ;;  %v3385_v36 = vld [vmem:[#allocation9 + $0x228] sm:$0xff] }
 0x48a   :  { %5007 = vmatpush3.bf16.msra.mxu0 %v5006_v57  ;;  %v3388_v57 = vld [vmem:[#allocation9 + $0x240] sm:$0xff] }
 0x48b   :  { %5009 = vmatprep.subr.bf16.mxu0 %v5008_v61  ;;  %v3389_v61 = vld [vmem:[#allocation9 + $0x248] sm:$0xff] }
 0x48c   :  { %v5045_v50 = vpack.c.bf16 %v3389_v61, %v3388_v57 }
 0x48e   :  { %5011 = vmatpush3.bf16.msra.mxu0 %v5010_v19  ;;  %v3392_v19 = vld [vmem:[#allocation9 + $0x260] sm:$0xff] }
 0x48f   :  { %5013 = vmatprep.subr.bf16.mxu0 %v5012_v20  ;;  %v3393_v20 = vld [vmem:[#allocation9 + $0x268] sm:$0xff] }
 0x490   :  { %v5051_v56 = vpack.c.bf16 %v3393_v20, %v3392_v19 }
 0x492   :  { %5015 = vmatpush3.bf16.msra.mxu0 %v5014_v25  ;;  %v5054_v25 = vpack.c.bf16 %v3395_v23, %v3394_v22 }
 0x493   :  { %5017 = vmatprep.subr.bf16.mxu0 %v5016_v26  ;;  %v3310_v26 = vadd.f32 %v3300_v21, %v5867_v31 }
 0x495   :  { %v3315_v34 = vmax.f32 %v3310_v26, 0.0 }
 0x496   :  { %5019 = vmatpush3.bf16.msra.mxu0 %v5018_v32  ;;  %v3689_v32 = vld [vmem:[#allocation10] ss:$0 sm:$0xff] }
 0x497   :  { %5021 = vmatprep.subr.bf16.mxu0 %v5020_v33 }
 0x49a   :  { %5023 = vmatpush3.bf16.msra.mxu0 %v5022_v44 }
 0x49b   :  { %5025 = vmatprep.subr.bf16.mxu0 %v5024_v40 }
 0x49c   :  { %v3199_v24 = vpop.f32.mrb[4].mxu1 }
 0x49d   :  { %v5058_v7 = vadd.f32 %v3199_v24, %v5838_v60  ;;  %v3201_v62 = vpop.f32.mrb[5].mxu1  ;;  %v5036_v60 = vpack.c.bf16 %v3383_v14, %v3382_v13 }
 0x49e   :  { %v5059_v63 = vadd.f32 %v3201_v62, %v5840_v1  ;;  %5027 = vmatpush3.bf16.msra.mxu0 %v5026_v51  ;;  %v3384_v1 = vld [vmem:[#allocation9 + $0x220] sm:$0xff] }
 0x49f   :  { %v3308_v4 = vadd.f32 %v5058_v7, %v3292_v53  ;;  %5029 = vmatprep.subr.bf16.mxu0 %v5028_v43  ;;  %v5039_v15 = vpack.c.bf16 %v3385_v36, %v3384_v1 }
 0x4a0   :  { %v3309_v9 = vadd.f32 %v5059_v63, %v3296_v55 }
 0x4a1   :  { %v3313_v39 = vmax.f32 %v3308_v4, 0.0 }
 0x4a2   :  { %v3314_v10 = vmax.f32 %v3309_v9, 0.0  ;;  %5031 = vmatpush3.bf16.msra.mxu0 %v5030_v2 }
 0x4a3   :  { %5032 = vmatprep.subr.bf16.mxu0 %v5318_v3 }
 0x4a4   :  { %3537 = vmatprep.mubr.f32.mxu0 %v3314_v10 }
 0x4a5   :  { %3538 = vmatmul.mubr.f32.vlgmr.msra.gmra.mrb[50].mxu0 %v3313_v39 }
 0x4a6   :  { %5034 = vmatpush3.bf16.msra.mxu0 %v5033_v12  ;;  %4225 = vmatprep.mubr.msk.f32.mxu0 %vm5319_vm2, %v5317_v0  ;;  %v3390_v0 = vld [vmem:[#allocation9 + $0x250] sm:$0xff] }
 0x4a7   :  { %5035 = vmatprep.subr.bf16.mxu0 %v5318_v3  ;;  %v5048_v17 = vpack.c.bf16 %v3391_v58, %v3390_v0 }
 0x4aa   :  { %5037 = vmatpush3.bf16.msra.mxu0 %v5036_v60 }
 0x4ab   :  { %5038 = vmatprep.subr.bf16.mxu0 %v5318_v3 }
 0x4ae   :  { %5040 = vmatpush3.bf16.msra.mxu0 %v5039_v15 }
 0x4af   :  { %5041 = vmatprep.subr.bf16.mxu0 %v5318_v3 }
 0x4b2   :  { %5043 = vmatpush3.bf16.msra.mxu0 %v5042_v38 }
 0x4b3   :  { %5044 = vmatprep.subr.bf16.mxu0 %v5318_v3 }
 0x4b6   :  { %5046 = vmatpush3.bf16.msra.mxu0 %v5045_v50 }
 0x4b7   :  { %5047 = vmatprep.subr.bf16.mxu0 %v5318_v3 }
 0x4ba   :  { %5049 = vmatpush3.bf16.msra.mxu0 %v5048_v17 }
 0x4bb   :  { %5050 = vmatprep.subr.bf16.mxu0 %v5318_v3 }
 0x4be   :  { %5052 = vmatpush3.bf16.msra.mxu0 %v5051_v56 }
 0x4bf   :  { %5053 = vmatprep.subr.bf16.mxu0 %v5318_v3 }
 0x4c2   :  { %5055 = vmatpush3.bf16.msra.mxu0 %v5054_v25 }
 0x4c5   :  { %4226 = vmatmul.mubr.f32.vlgmr.msra.gmra.mrb[52].mxu0 %v3315_v34 }
 0x558   :  { %v3858_v28 = vpop.f32.mrb[48].mxu0 }
 0x559   :  { %v3859_v29 = vpop.f32.mrb[49].mxu0 }
 0x55a   :  { %v3860_v30 = vadd.f32 %v3859_v29, %v3858_v28 }
 0x55c   :  { %v3470_v37 = vadd.f32 %v3860_v30, %v3689_v32 }
 0x578   :  { %v3893_v18 = vpop.f32.mrb[50].mxu0 }
 0x579   :  { %v3894_v33 = vpop.f32.mrb[51].mxu0 }
 0x57a   :  { %v3895_v42 = vadd.f32 %v3894_v33, %v3893_v18 }
 0x57c   :  { %v3540_v52 = vadd.f32 %v3895_v42, %v3470_v37 }
 0x598   :  { %v3609_v11 = vpop.f32.mrb[52].mxu0 }
 0x599   :  { %v3610_v44 = vadd.f32 %v3609_v11, %v3540_v52  ;;  %v4227_v31 = vpop.f32.mrb[53].mxu0 }
 0x59b   :  { %v3614_v35 = vsel %vm3613_vm3, %v3610_v44, 0.0 }
 0x59c   :  { %3615 = vadd.xlane.f32.xlu0 %v3614_v35 }
 0x5b2   :  { %3621 = vperm.xlu0 %5164, %v3610_v44  }
 0x629   :  { %v3616_v3 = vpop.xlane.xlu0 %3615 }
 0x62a   :  { %v3618_v45 = vmul.f32 0.05882353, %v3616_v3 }
 0x631   :  { %v3622_v40 = vpop.permute.xlu0 %3621 }
 0x632   :  { %v3624_v46 = vadd.f32 %v3622_v40, %v3610_v44 }
 0x634   :  { %v3625_v47 = vsub.f32 %v3624_v46, %v3618_v45 }
 0x636   :  { %3626 = vst [vmem:[%s5911_s7] sm:$0xff] %v3625_v47 }
 0x637   :  { %3631 = vsyncpa [#allocation3], 1 }
 0x638   :  { %3632 = vsyncpa [#allocation5], 1 }
 0x639   :  { %3633 = vsyncpa [#allocation8], 1 }
 0x63a   :  { %3634 = vsyncpa [#allocation11], 1 }

</bundles_post_ra>
